<compile_context>
chip_gen: v5e
topology: v5e:2x2
jax: 0.10.0
libtpu: 0.0.40
codegen_flags: <defaults>
</compile_context>

<pallas_src>
import functools
import math

import jax
import jax.numpy as jnp
from jax.experimental import pallas as pl
from jax.experimental.pallas import tpu as pltpu


# ------------------------------ tiling helper -------------------------------

def _pick_tile(dim, target, base):
    """Largest tile <= target that divides dim and is a multiple of `base`.

    Falls back to the full dimension, which is always a legal BlockSpec block
    (block == full array dim); with RoBERTa-sized dims (multiples of 128) the
    fallback never produces an oversized block."""
    if dim <= target:
        return dim
    t = (target // base) * base
    while t >= base:
        if dim % t == 0:
            return t
        t -= base
    return dim


# ----------------------------- Pallas kernels ------------------------------

def _dense_kernel(x_ref, w_ref, b_ref, o_ref, acc_ref, *, act):
    """Tiled out = act(x @ W + b); bf16 MXU operands, f32 accumulation, bf16 out."""
    k = pl.program_id(2)
    prod = jnp.dot(x_ref[...], w_ref[...], preferred_element_type=jnp.float32)

    @pl.when(k == 0)
    def _():
        acc_ref[...] = prod            # no zero-store + add on the first K step

    @pl.when(k > 0)
    def _():
        acc_ref[...] += prod

    @pl.when(k == pl.num_programs(2) - 1)
    def _():
        y = acc_ref[...] + b_ref[...]
        if act == "gelu":
            # exact (erf) GELU, matching HF RoBERTa default hidden_act="gelu"
            y = 0.5 * y * (1.0 + jax.lax.erf(y * 0.7071067811865476))
        o_ref[...] = y.astype(o_ref.dtype)


def pallas_dense(x, w, b, act="none", tm=256, tn=256, tk=512):
    M, K = x.shape
    N = w.shape[1]
    tm = _pick_tile(M, tm, 16)          # bf16 activations: 16-row sublane packing
    tn = _pick_tile(N, tn, 128)
    tk = _pick_tile(K, tk, 128)
    kern = functools.partial(_dense_kernel, act=act)
    return pl.pallas_call(
        kern,
        out_shape=jax.ShapeDtypeStruct((M, N), jnp.bfloat16),
        grid=(M // tm, N // tn, K // tk),
        in_specs=[
            pl.BlockSpec((tm, tk), lambda i, j, k: (i, k)),
            pl.BlockSpec((tk, tn), lambda i, j, k: (k, j)),
            pl.BlockSpec((1, tn), lambda i, j, k: (0, j)),
        ],
        out_specs=pl.BlockSpec((tm, tn), lambda i, j, k: (i, j)),
        scratch_shapes=[pltpu.VMEM((tm, tn), jnp.float32)],
        compiler_params=pltpu.CompilerParams(
            dimension_semantics=("parallel", "parallel", "arbitrary")),
    )(x, w, b.reshape(1, N))


def _dense_res_ln_kernel(x_ref, w_ref, b_ref, r_ref, g_ref, be_ref,
                         o_ref, acc_ref, *, eps):
    """Tiled out = LayerNorm(x @ W + b + residual) * gamma + beta.

    N (hidden) is untiled so the LayerNorm reduction sees the full row.
    Residual is bf16; bias / LN params / statistics are f32."""
    k = pl.program_id(1)
    prod = jnp.dot(x_ref[...], w_ref[...], preferred_element_type=jnp.float32)

    @pl.when(k == 0)
    def _():
        acc_ref[...] = prod

    @pl.when(k > 0)
    def _():
        acc_ref[...] += prod

    @pl.when(k == pl.num_programs(1) - 1)
    def _():
        y = acc_ref[...] + b_ref[...] + r_ref[...].astype(jnp.float32)
        mu = jnp.mean(y, axis=-1, keepdims=True)
        yc = y - mu
        var = jnp.mean(yc * yc, axis=-1, keepdims=True)
        yn = yc * jax.lax.rsqrt(var + eps)
        o_ref[...] = (yn * g_ref[...] + be_ref[...]).astype(o_ref.dtype)


def pallas_dense_res_ln(x, w, b, res, gamma, beta, eps=1e-5, tm=256, tk=512):
    M, K = x.shape
    N = w.shape[1]
    tm = _pick_tile(M, tm, 16)
    tk = _pick_tile(K, tk, 128)
    kern = functools.partial(_dense_res_ln_kernel, eps=eps)
    return pl.pallas_call(
        kern,
        out_shape=jax.ShapeDtypeStruct((M, N), jnp.bfloat16),
        grid=(M // tm, K // tk),
        in_specs=[
            pl.BlockSpec((tm, tk), lambda i, k: (i, k)),
            pl.BlockSpec((tk, N), lambda i, k: (k, 0)),
            pl.BlockSpec((1, N), lambda i, k: (0, 0)),
            pl.BlockSpec((tm, N), lambda i, k: (i, 0)),     # residual (bf16, k-invariant)
            pl.BlockSpec((1, N), lambda i, k: (0, 0)),
            pl.BlockSpec((1, N), lambda i, k: (0, 0)),
        ],
        out_specs=pl.BlockSpec((tm, N), lambda i, k: (i, 0)),
        scratch_shapes=[pltpu.VMEM((tm, N), jnp.float32)],
        compiler_params=pltpu.CompilerParams(
            dimension_semantics=("parallel", "arbitrary")),
    )(x, w, b.reshape(1, N), res, gamma.reshape(1, N), beta.reshape(1, N))


def _ln_kernel(x_ref, g_ref, b_ref, o_ref, *, eps):
    """out = LayerNorm(x) * gamma + beta (no residual, f32 statistics, bf16 out)."""
    x = x_ref[...]
    mu = jnp.mean(x, axis=-1, keepdims=True)
    xc = x - mu
    var = jnp.mean(xc * xc, axis=-1, keepdims=True)
    y = xc * jax.lax.rsqrt(var + eps)
    o_ref[...] = (y * g_ref[...] + b_ref[...]).astype(o_ref.dtype)


def pallas_layernorm(x, gamma, beta, eps=1e-5, tm=512):
    M, H = x.shape
    tm = _pick_tile(M, tm, 16)
    kern = functools.partial(_ln_kernel, eps=eps)
    return pl.pallas_call(
        kern,
        out_shape=jax.ShapeDtypeStruct((M, H), jnp.bfloat16),
        grid=(M // tm,),
        in_specs=[
            pl.BlockSpec((tm, H), lambda i: (i, 0)),
            pl.BlockSpec((1, H), lambda i: (0, 0)),
            pl.BlockSpec((1, H), lambda i: (0, 0)),
        ],
        out_specs=pl.BlockSpec((tm, H), lambda i: (i, 0)),
        compiler_params=pltpu.CompilerParams(dimension_semantics=("parallel",)),
    )(x, gamma.reshape(1, H), beta.reshape(1, H))


def _attn_kernel(q_ref, k_ref, v_ref, m_ref, o_ref, *, hpg, dh, scale):
    """Attention for one (batch, head-group) grid step.

    q/k/v blocks: (1, S, hpg*dh) bf16 (128-lane dense in the real config);
    m_ref block: (1, 1, S) f32 additive key mask; o_ref block: (1, S, hpg*dh).
    NOTE: the mask is key-only; fully-padded *query* rows produce unnormalized
    garbage — harmless here because only the CLS row is consumed downstream."""
    mask = m_ref[0]                       # (1, S) f32, broadcasts over queries
    qg = q_ref[0]                         # (S, hpg*dh) bf16 — one lane-dense load
    kg = k_ref[0]
    vg = v_ref[0]
    ctx = []
    for h in range(hpg):                  # small bounded unroll (2 heads / group)
        lo, hi = h * dh, (h + 1) * dh
        q = qg[:, lo:hi] * scale          # fold softmax scale into q (S*dh muls)
        k = kg[:, lo:hi]
        v = vg[:, lo:hi]
        s = jax.lax.dot_general(q, k, (((1,), (1,)), ((), ())),
                                preferred_element_type=jnp.float32)   # (S, S) f32
        s = s + mask
        s = s - jnp.max(s, axis=-1, keepdims=True)
        p = jnp.exp(s)
        p = p * pl.reciprocal(jnp.sum(p, axis=-1, keepdims=True), approx=True)
        ctx.append(jnp.dot(p.astype(jnp.bfloat16), v,
                           preferred_element_type=jnp.float32))
    out = ctx[0] if hpg == 1 else jnp.concatenate(ctx, axis=-1)
    o_ref[0] = out.astype(o_ref.dtype)    # single lane-dense store per group


def pallas_attention(qkv, add_mask, *, nh, dh, scale):
    """qkv: (B, S, 3H) bf16 fused [Q|K|V]; add_mask: (B, 1, S) f32 additive mask."""
    B, S, H3 = qkv.shape
    H = nh * dh
    assert H3 == 3 * H

    # heads-per-group: smallest divisor of nh whose width hpg*dh is a multiple
    # of 128 lanes (dh=64 -> 2 heads / 128 lanes); else all heads in one group.
    hpg = nh
    for cand in range(1, nh):
        if nh % cand == 0 and (cand * dh) % 128 == 0:
            hpg = cand
            break
    gd = hpg * dh                 # lane width of one head group
    G = nh // hpg                 # number of head groups (second grid axis)

    if gd % 128 == 0:
        # carve Q/K/V head-group blocks directly out of the fused tensor
        q_in = k_in = v_in = qkv
        nqb = H // gd             # head-group blocks per Q/K/V section
        qi = lambda b, g: (b, 0, g)
        ki = lambda b, g: (b, 0, nqb + g)
        vi = lambda b, g: (b, 0, 2 * nqb + g)
    else:
        # tiny-head fallback: split in plain JAX so each block spans its full last dim
        q_in = qkv[:, :, :H]
        k_in = qkv[:, :, H:2 * H]
        v_in = qkv[:, :, 2 * H:]
        qi = ki = vi = lambda b, g: (b, 0, g)

    kern = functools.partial(_attn_kernel, hpg=hpg, dh=dh, scale=scale)
    return pl.pallas_call(
        kern,
        out_shape=jax.ShapeDtypeStruct((B, S, H), jnp.bfloat16),
        grid=(B, G),
        in_specs=[
            pl.BlockSpec((1, S, gd), qi),
            pl.BlockSpec((1, S, gd), ki),
            pl.BlockSpec((1, S, gd), vi),
            pl.BlockSpec((1, 1, S), lambda b, g: (b, 0, 0)),
        ],
        out_specs=pl.BlockSpec((1, S, gd), lambda b, g: (b, 0, g)),
        compiler_params=pltpu.CompilerParams(
            dimension_semantics=("parallel", "parallel"),
            vmem_limit_bytes=32 * 1024 * 1024),
    )(q_in, k_in, v_in, add_mask)


# ------------------------------- model glue --------------------------------

def roberta_model(p, input_ids, attn_mask, cfg):
    """RobertaModel(input_ids, attention_mask) -> pooler_output (B, hidden)."""
    B, S = input_ids.shape
    H, nh = cfg["hidden"], cfg["heads"]
    dh = H // nh
    pad = cfg["pad_id"]
    eps = cfg["ln_eps"]

    # RoBERTa position ids: cumsum over non-pad positions, offset by padding_idx.
    m = (input_ids != pad).astype(jnp.int32)
    pos_ids = jnp.cumsum(m, axis=1) * m + pad

    x = (jnp.take(p["word_emb"], input_ids, axis=0)
         + jnp.take(p["pos_emb"], pos_ids, axis=0)
         + p["type_emb"][0][None, None, :])                        # (B, S, H) f32
    h2 = pallas_layernorm(x.reshape(B * S, H),
                          p["emb_ln_g"], p["emb_ln_b"], eps=eps)   # (B*S, H) bf16

    add_mask = (1.0 - attn_mask)[:, None, :] * -10000.0            # (B, 1, S) f32
    scale = 1.0 / math.sqrt(dh)

    def layer_step(carry, lw):
        h2 = carry                                                 # (B*S, H) bf16
        qkv = pallas_dense(h2, lw["qkv_w"], lw["qkv_b"], tn=512)   # (B*S, 3H) bf16
        ctx = pallas_attention(qkv.reshape(B, S, 3 * H), add_mask,
                               nh=nh, dh=dh, scale=scale)          # (B, S, H) bf16
        h2 = pallas_dense_res_ln(ctx.reshape(B * S, H),
                                 lw["o_w"], lw["o_b"], h2,
                                 lw["ln1_g"], lw["ln1_b"], eps=eps)
        inter = pallas_dense(h2, lw["i_w"], lw["i_b"], act="gelu", tn=512)
        h2 = pallas_dense_res_ln(inter, lw["f_w"], lw["f_b"], h2,
                                 lw["ln2_g"], lw["ln2_b"], eps=eps)
        return h2, None

    h2, _ = jax.lax.scan(layer_step, h2, p["layers"])

    # Pooler: tanh(W @ [CLS]); M = n_chunks (<=2) so this is launch-overhead
    # dominated -> plain jnp inside the jit instead of a pallas_call.
    cls = h2.reshape(B, S, H)[:, 0, :].astype(jnp.float32)         # (B, H)
    pooled = jnp.tanh(cls @ p["pool_w"] + p["pool_b"])
    return pooled                                                  # (B, H) f32


def roberta_encoder_forward(params, src_tokens, cfg):
    """Mirrors RobertaEncoder.forward after tokenization.

    src_tokens: (1, n_chunks, seq) int32 — same as _prepare_input's output.
    """
    # TODO(synk): string tokenization (self._tokenizer) and checkpoint loading
    # have no Pallas equivalent; token ids / weights are synthesized in-script.
    embeds = []
    for i in range(src_tokens.shape[0]):
        src_single = src_tokens[i]                                  # (n_chunks, seq)
        mask = (src_single != cfg["pad_id"]).astype(jnp.float32)    # _get_attention_mask
        pooler_output = roberta_model(params["roberta"], src_single, mask, cfg)
        embeds.append(jnp.mean(pooler_output, axis=0))              # mean over chunks
    embed = jnp.stack(embeds)                                       # (1, hidden) f32

    # Fused genre/rating/emotion heads: (1, H) x (H, 34) — tiny, plain jnp.
    logits = embed @ params["head_w"] + params["head_b"]
    ng, nr = cfg["num_genre"], cfg["num_rating"]
    logit_genre = logits[:, :ng]
    logit_rating = logits[:, ng:ng + nr]
    logit_emotion = logits[:, ng + nr:]
    return logit_genre, logit_rating, logit_emotion


# ------------------------------ parameter init ------------------------------

def init_params(key, cfg):
    H, I = cfg["hidden"], cfg["inter"]
    V, P, L = cfg["vocab"], cfg["max_pos"], cfg["layers"]
    keys = iter(jax.random.split(key, 16))

    def w(shape, dtype=jnp.bfloat16, scale=0.02):
        return (scale * jax.random.normal(next(keys), shape)).astype(dtype)

    def zeros(shape):
        return jnp.zeros(shape, jnp.float32)

    def ones(shape):
        return jnp.ones(shape, jnp.float32)

    # Stacked-per-layer weights (leading dim L) for lax.scan; matmul weights bf16,
    # biases / LN params f32. Q/K/V fused into a single (H, 3H) projection.
    layers = dict(
        qkv_w=w((L, H, 3 * H)), qkv_b=zeros((L, 3 * H)),
        o_w=w((L, H, H)), o_b=zeros((L, H)),
        ln1_g=ones((L, H)), ln1_b=zeros((L, H)),
        i_w=w((L, H, I)), i_b=zeros((L, I)),
        f_w=w((L, I, H)), f_b=zeros((L, H)),
        ln2_g=ones((L, H)), ln2_b=zeros((L, H)),
    )
    roberta = dict(
        word_emb=w((V, H), dtype=jnp.float32),
        pos_emb=w((P, H), dtype=jnp.float32),
        type_emb=w((1, H), dtype=jnp.float32),
        emb_ln_g=ones((H,)), emb_ln_b=zeros((H,)),
        layers=layers,
        # pooler runs in plain jnp -> keep f32
        pool_w=w((H, H), dtype=jnp.float32), pool_b=zeros((H,)),
    )
    n_out = cfg["num_genre"] + cfg["num_rating"] + cfg["num_emotion"]
    return dict(
        roberta=roberta,
        head_w=w((H, n_out), dtype=jnp.float32),   # fused genre|rating|emotion heads
        head_b=zeros((n_out,)),
    )


# ----------------------------------- main -----------------------------------

if __name__ == "__main__":
    # Small-but-lane-friendly config: hidden=128, 2 heads of dh=64 (same head
    # width as the real RoBERTa-base), 2 layers, inter=512.
    cfg = dict(hidden=128, heads=2, layers=2, inter=512, vocab=100,
               max_pos=24, pad_id=1, ln_eps=1e-5,
               num_genre=24, num_rating=5, num_emotion=5)

    key = jax.random.PRNGKey(0)
    pkey, tkey = jax.random.split(key)
    params = init_params(pkey, cfg)

    # Synthesize what _prepare_input would return: (1, n_chunks, seq) token ids
    # with bos=0, eos=2, pad=1 (second chunk partially padded to exercise the
    # attention mask).
    n_chunks, seq = 2, 16
    body = jax.random.randint(tkey, (n_chunks, seq), 3, cfg["vocab"], dtype=jnp.int32)
    tokens = body.at[:, 0].set(0)          # bos
    tokens = tokens.at[0, seq - 1].set(2)  # eos chunk 0
    tokens = tokens.at[1, 10].set(2)       # eos chunk 1
    tokens = tokens.at[1, 11:].set(1)      # pad tail chunk 1
    src_tokens = tokens[None]              # (1, n_chunks, seq) — unsqueeze(0)

    fwd = jax.jit(lambda p, t: roberta_encoder_forward(p, t, cfg))
    lg, lr, le = fwd(params, src_tokens)
    jax.block_until_ready((lg, lr, le))
    assert lg.shape == (1, cfg["num_genre"])
    assert lr.shape == (1, cfg["num_rating"])
    assert le.shape == (1, cfg["num_emotion"])
    print("KERNEL_OK")
</pallas_src>

<mosaic_0001>
module attributes {stable_mosaic.version = 11 : i64} {
  func.func @_ln_kernel(%arg0: i32, %arg1: memref<32x128xf32, #tpu.memory_space<vmem>>, %arg2: memref<1x128xf32, #tpu.memory_space<vmem>>, %arg3: memref<1x128xf32, #tpu.memory_space<vmem>>, %arg4: memref<32x128xbf16, #tpu.memory_space<vmem>>) attributes {dimension_semantics = [#tpu.dimension_semantics<parallel>], iteration_bounds = array<i64: 1>, scalar_prefetch = 0 : i64, scratch_operands = 0 : i64, tpu.core_type = #tpu.core_type<tc>, window_params = [{transform_indices = @transform_0, window_bounds = array<i64: 32, 128>}, {pipeline_mode = #tpu.pipeline_mode<synchronous>, transform_indices = @transform_1, window_bounds = array<i64: 1, 128>}, {pipeline_mode = #tpu.pipeline_mode<synchronous>, transform_indices = @transform_2, window_bounds = array<i64: 1, 128>}, {transform_indices = @transform_3, window_bounds = array<i64: 32, 128>}]} {
    %c0 = arith.constant 0 : index
    %c0_0 = arith.constant 0 : index
    %0 = vector.load %arg1[%c0, %c0_0] : memref<32x128xf32, #tpu.memory_space<vmem>>, vector<32x128xf32>
    %cst = arith.constant dense<0.000000e+00> : vector<32xf32>
    %1 = vector.multi_reduction <add>, %0, %cst [1] : vector<32x128xf32> to vector<32xf32>
    %2 = vector.shape_cast %1 : vector<32xf32> to vector<32x1xf32>
    %cst_1 = arith.constant 1.280000e+02 : f32
    %3 = vector.broadcast %cst_1 : f32 to vector<32x1xf32>
    %4 = arith.divf %2, %3 : vector<32x1xf32>
    %5 = vector.broadcast %4 : vector<32x1xf32> to vector<32x128xf32>
    %6 = arith.subf %0, %5 : vector<32x128xf32>
    %7 = arith.mulf %6, %6 : vector<32x128xf32>
    %cst_2 = arith.constant dense<0.000000e+00> : vector<32xf32>
    %8 = vector.multi_reduction <add>, %7, %cst_2 [1] : vector<32x128xf32> to vector<32xf32>
    %9 = vector.shape_cast %8 : vector<32xf32> to vector<32x1xf32>
    %cst_3 = arith.constant 1.280000e+02 : f32
    %10 = vector.broadcast %cst_3 : f32 to vector<32x1xf32>
    %11 = arith.divf %9, %10 : vector<32x1xf32>
    %cst_4 = arith.constant 9.99999974E-6 : f32
    %12 = vector.broadcast %cst_4 : f32 to vector<32x1xf32>
    %13 = arith.addf %11, %12 : vector<32x1xf32>
    %14 = math.rsqrt %13 : vector<32x1xf32>
    %15 = vector.broadcast %14 : vector<32x1xf32> to vector<32x128xf32>
    %16 = arith.mulf %6, %15 : vector<32x128xf32>
    %c0_5 = arith.constant 0 : index
    %c0_6 = arith.constant 0 : index
    %17 = vector.load %arg2[%c0_5, %c0_6] : memref<1x128xf32, #tpu.memory_space<vmem>>, vector<1x128xf32>
    %18 = vector.broadcast %17 : vector<1x128xf32> to vector<32x128xf32>
    %19 = arith.mulf %16, %18 : vector<32x128xf32>
    %c0_7 = arith.constant 0 : index
    %c0_8 = arith.constant 0 : index
    %20 = vector.load %arg3[%c0_7, %c0_8] : memref<1x128xf32, #tpu.memory_space<vmem>>, vector<1x128xf32>
    %21 = vector.broadcast %20 : vector<1x128xf32> to vector<32x128xf32>
    %22 = arith.addf %19, %21 : vector<32x128xf32>
    %23 = arith.truncf %22 : vector<32x128xf32> to vector<32x128xbf16>
    %c0_9 = arith.constant 0 : index
    %c0_10 = arith.constant 0 : index
    %24 = vector.load %arg4[%c0_9, %c0_10] : memref<32x128xbf16, #tpu.memory_space<vmem>>, vector<32x128xbf16>
    tpu.vector_store %arg4[%c0_9, %c0_10], %23 {strides = array<i32>} : memref<32x128xbf16, #tpu.memory_space<vmem>>, vector<32x128xbf16>,
    return
  }
  func.func @transform_0(%arg0: i32) -> (i32, i32) {
    %c0_i32 = arith.constant 0 : i32
    %c0_i32_0 = arith.constant 0 : i32
    return %arg0, %c0_i32 : i32, i32
  }
  func.func @transform_1(%arg0: i32) -> (i32, i32) {
    %c0_i32 = arith.constant 0 : i32
    %c0_i32_0 = arith.constant 0 : i32
    %c0_i32_1 = arith.constant 0 : i32
    return %c0_i32, %c0_i32_0 : i32, i32
  }
  func.func @transform_2(%arg0: i32) -> (i32, i32) {
    %c0_i32 = arith.constant 0 : i32
    %c0_i32_0 = arith.constant 0 : i32
    %c0_i32_1 = arith.constant 0 : i32
    return %c0_i32, %c0_i32_0 : i32, i32
  }
  func.func @transform_3(%arg0: i32) -> (i32, i32) {
    %c0_i32 = arith.constant 0 : i32
    %c0_i32_0 = arith.constant 0 : i32
    return %arg0, %c0_i32 : i32, i32
  }
}

module attributes {stable_mosaic.version = 11 : i64} {
  func.func @_dense_kernel(%arg0: i32, %arg1: i32, %arg2: i32, %arg3: memref<32x128xbf16, #tpu.memory_space<vmem>>, %arg4: memref<128x384xbf16, #tpu.memory_space<vmem>>, %arg5: memref<1x384xf32, #tpu.memory_space<vmem>>, %arg6: memref<32x384xbf16, #tpu.memory_space<vmem>>, %arg7: memref<32x384xf32, #tpu.memory_space<vmem>>) attributes {dimension_semantics = [#tpu.dimension_semantics<parallel>, #tpu.dimension_semantics<parallel>, #tpu.dimension_semantics<arbitrary>], iteration_bounds = array<i64: 1, 1, 1>, scalar_prefetch = 0 : i64, scratch_operands = 1 : i64, tpu.core_type = #tpu.core_type<tc>, window_params = [{transform_indices = @transform_0, window_bounds = array<i64: 32, 128>}, {transform_indices = @transform_1, window_bounds = array<i64: 128, 384>}, {transform_indices = @transform_2, window_bounds = array<i64: 1, 384>}, {transform_indices = @transform_3, window_bounds = array<i64: 32, 384>}]} {
    %c0 = arith.constant 0 : index
    %c0_0 = arith.constant 0 : index
    %0 = vector.load %arg3[%c0, %c0_0] : memref<32x128xbf16, #tpu.memory_space<vmem>>, vector<32x128xbf16>
    %c0_1 = arith.constant 0 : index
    %c0_2 = arith.constant 0 : index
    %1 = vector.load %arg4[%c0_1, %c0_2] : memref<128x384xbf16, #tpu.memory_space<vmem>>, vector<128x384xbf16>
    %cst = arith.constant dense<0.000000e+00> : vector<32x384xf32>
    %2 = tpu.matmul %0, %1, %cst {dimension_numbers = #tpu.dot_dimension_numbers<[1], [0], [0], [1], [0, 0, 1, 1], [], []>} : vector<32x128xbf16>, vector<128x384xbf16>, vector<32x384xf32> -> vector<32x384xf32>
    %c0_i32 = arith.constant 0 : i32
    %3 = arith.cmpi eq, %arg2, %c0_i32 : i32
    %4 = arith.extui %3 : i1 to i32
    %c0_i32_3 = arith.constant 0 : i32
    %5 = arith.cmpi ne, %4, %c0_i32_3 : i32
    scf.if %5 {
      %c0_8 = arith.constant 0 : index
      %c0_9 = arith.constant 0 : index
      %12 = vector.load %arg7[%c0_8, %c0_9] : memref<32x384xf32, #tpu.memory_space<vmem>>, vector<32x384xf32>
      tpu.vector_store %arg7[%c0_8, %c0_9], %2 {strides = array<i32>} : memref<32x384xf32, #tpu.memory_space<vmem>>, vector<32x384xf32>,
    } else {
    }
    %c0_i32_4 = arith.constant 0 : i32
    %6 = arith.cmpi sgt, %arg2, %c0_i32_4 : i32
    %7 = arith.extui %6 : i1 to i32
    %c0_i32_5 = arith.constant 0 : i32
    %8 = arith.cmpi ne, %7, %c0_i32_5 : i32
    scf.if %8 {
      %c0_8 = arith.constant 0 : index
      %c0_9 = arith.constant 0 : index
      %12 = vector.load %arg7[%c0_8, %c0_9] : memref<32x384xf32, #tpu.memory_space<vmem>>, vector<32x384xf32>
      %13 = arith.addf %12, %2 : vector<32x384xf32>
      %c0_10 = arith.constant 0 : index
      %c0_11 = arith.constant 0 : index
      %14 = vector.load %arg7[%c0_10, %c0_11] : memref<32x384xf32, #tpu.memory_space<vmem>>, vector<32x384xf32>
      tpu.vector_store %arg7[%c0_10, %c0_11], %13 {strides = array<i32>} : memref<32x384xf32, #tpu.memory_space<vmem>>, vector<32x384xf32>,
    } else {
    }
    %c0_i32_6 = arith.constant 0 : i32
    %9 = arith.cmpi eq, %arg2, %c0_i32_6 : i32
    %10 = arith.extui %9 : i1 to i32
    %c0_i32_7 = arith.constant 0 : i32
    %11 = arith.cmpi ne, %10, %c0_i32_7 : i32
    scf.if %11 {
      %c0_8 = arith.constant 0 : index
      %c0_9 = arith.constant 0 : index
      %12 = vector.load %arg7[%c0_8, %c0_9] : memref<32x384xf32, #tpu.memory_space<vmem>>, vector<32x384xf32>
      %c0_10 = arith.constant 0 : index
      %c0_11 = arith.constant 0 : index
      %13 = vector.load %arg5[%c0_10, %c0_11] : memref<1x384xf32, #tpu.memory_space<vmem>>, vector<1x384xf32>
      %14 = vector.broadcast %13 : vector<1x384xf32> to vector<32x384xf32>
      %15 = arith.addf %12, %14 : vector<32x384xf32>
      %16 = arith.truncf %15 : vector<32x384xf32> to vector<32x384xbf16>
      %c0_12 = arith.constant 0 : index
      %c0_13 = arith.constant 0 : index
      %17 = vector.load %arg6[%c0_12, %c0_13] : memref<32x384xbf16, #tpu.memory_space<vmem>>, vector<32x384xbf16>
      tpu.vector_store %arg6[%c0_12, %c0_13], %16 {strides = array<i32>} : memref<32x384xbf16, #tpu.memory_space<vmem>>, vector<32x384xbf16>,
    } else {
    }
    return
  }
  func.func @transform_0(%arg0: i32, %arg1: i32, %arg2: i32) -> (i32, i32) {
    %c0_i32 = arith.constant 0 : i32
    return %arg0, %arg2 : i32, i32
  }
  func.func @transform_1(%arg0: i32, %arg1: i32, %arg2: i32) -> (i32, i32) {
    %c0_i32 = arith.constant 0 : i32
    return %arg2, %arg1 : i32, i32
  }
  func.func @transform_2(%arg0: i32, %arg1: i32, %arg2: i32) -> (i32, i32) {
    %c0_i32 = arith.constant 0 : i32
    %c0_i32_0 = arith.constant 0 : i32
    return %c0_i32, %arg1 : i32, i32
  }
  func.func @transform_3(%arg0: i32, %arg1: i32, %arg2: i32) -> (i32, i32) {
    %c0_i32 = arith.constant 0 : i32
    return %arg0, %arg1 : i32, i32
  }
}

module attributes {stable_mosaic.version = 11 : i64} {
  func.func @_attn_kernel(%arg0: i32, %arg1: i32, %arg2: memref<1x16x128xbf16, #tpu.memory_space<vmem>>, %arg3: memref<1x16x128xbf16, #tpu.memory_space<vmem>>, %arg4: memref<1x16x128xbf16, #tpu.memory_space<vmem>>, %arg5: memref<1x1x16xf32, #tpu.memory_space<vmem>>, %arg6: memref<1x16x128xbf16, #tpu.memory_space<vmem>>) attributes {dimension_semantics = [#tpu.dimension_semantics<parallel>, #tpu.dimension_semantics<parallel>], iteration_bounds = array<i64: 2, 1>, scalar_prefetch = 0 : i64, scratch_operands = 0 : i64, tpu.core_type = #tpu.core_type<tc>, window_params = [{transform_indices = @transform_0, window_bounds = array<i64: 1, 16, 128>}, {transform_indices = @transform_1, window_bounds = array<i64: 1, 16, 128>}, {transform_indices = @transform_2, window_bounds = array<i64: 1, 16, 128>}, {transform_indices = @transform_3, window_bounds = array<i64: 1, 1, 16>}, {transform_indices = @transform_4, window_bounds = array<i64: 1, 16, 128>}]} {
    %c0 = arith.constant 0 : index
    %c0_0 = arith.constant 0 : index
    %c0_1 = arith.constant 0 : index
    %0 = vector.load %arg5[%c0, %c0_0, %c0_1] : memref<1x1x16xf32, #tpu.memory_space<vmem>>, vector<1x1x16xf32>
    %1 = vector.shape_cast %0 : vector<1x1x16xf32> to vector<1x16xf32>
    %c0_2 = arith.constant 0 : index
    %c0_3 = arith.constant 0 : index
    %c0_4 = arith.constant 0 : index
    %2 = vector.load %arg2[%c0_2, %c0_3, %c0_4] : memref<1x16x128xbf16, #tpu.memory_space<vmem>>, vector<1x16x128xbf16>
    %3 = vector.shape_cast %2 : vector<1x16x128xbf16> to vector<16x128xbf16>
    %c0_5 = arith.constant 0 : index
    %c0_6 = arith.constant 0 : index
    %c0_7 = arith.constant 0 : index
    %4 = vector.load %arg3[%c0_5, %c0_6, %c0_7] : memref<1x16x128xbf16, #tpu.memory_space<vmem>>, vector<1x16x128xbf16>
    %5 = vector.shape_cast %4 : vector<1x16x128xbf16> to vector<16x128xbf16>
    %c0_8 = arith.constant 0 : index
    %c0_9 = arith.constant 0 : index
    %c0_10 = arith.constant 0 : index
    %6 = vector.load %arg4[%c0_8, %c0_9, %c0_10] : memref<1x16x128xbf16, #tpu.memory_space<vmem>>, vector<1x16x128xbf16>
    %7 = vector.shape_cast %6 : vector<1x16x128xbf16> to vector<16x128xbf16>
    %8 = vector.extract_strided_slice %3 {offsets = [0, 0], sizes = [16, 64], strides = [1, 1]} : vector<16x128xbf16> to vector<16x64xbf16>
    %cst = arith.constant 1.250000e-01 : bf16
    %9 = vector.broadcast %cst : bf16 to vector<16x64xbf16>
    %10 = arith.mulf %8, %9 : vector<16x64xbf16>
    %11 = vector.extract_strided_slice %5 {offsets = [0, 0], sizes = [16, 64], strides = [1, 1]} : vector<16x128xbf16> to vector<16x64xbf16>
    %12 = vector.extract_strided_slice %7 {offsets = [0, 0], sizes = [16, 64], strides = [1, 1]} : vector<16x128xbf16> to vector<16x64xbf16>
    %cst_11 = arith.constant dense<0.000000e+00> : vector<16x16xf32>
    %13 = tpu.matmul %10, %11, %cst_11 {dimension_numbers = #tpu.dot_dimension_numbers<[1], [1], [0], [0], [0, 0, 1, 0], [], []>} : vector<16x64xbf16>, vector<16x64xbf16>, vector<16x16xf32> -> vector<16x16xf32>
    %14 = vector.broadcast %1 : vector<1x16xf32> to vector<16x16xf32>
    %15 = arith.addf %13, %14 : vector<16x16xf32>
    %cst_12 = arith.constant dense<0xFF800000> : vector<16xf32>
    %16 = vector.multi_reduction <maximumf>, %15, %cst_12 [1] : vector<16x16xf32> to vector<16xf32>
    %17 = vector.shape_cast %16 : vector<16xf32> to vector<16x1xf32>
    %18 = vector.broadcast %17 : vector<16x1xf32> to vector<16x16xf32>
    %19 = arith.subf %15, %18 : vector<16x16xf32>
    %20 = math.exp %19 : vector<16x16xf32>
    %cst_13 = arith.constant dense<0.000000e+00> : vector<16xf32>
    %21 = vector.multi_reduction <add>, %20, %cst_13 [1] : vector<16x16xf32> to vector<16xf32>
    %22 = vector.shape_cast %21 : vector<16xf32> to vector<16x1xf32>
    %23 = tpu.reciprocal %22 {approx = true} : vector<16x1xf32> -> vector<16x1xf32>
    %24 = vector.broadcast %23 : vector<16x1xf32> to vector<16x16xf32>
    %25 = arith.mulf %20, %24 : vector<16x16xf32>
    %26 = arith.truncf %25 : vector<16x16xf32> to vector<16x16xbf16>
    %cst_14 = arith.constant dense<0.000000e+00> : vector<16x64xf32>
    %27 = tpu.matmul %26, %12, %cst_14 {dimension_numbers = #tpu.dot_dimension_numbers<[1], [0], [0], [1], [0, 0, 1, 1], [], []>} : vector<16x16xbf16>, vector<16x64xbf16>, vector<16x64xf32> -> vector<16x64xf32>
    %28 = vector.extract_strided_slice %3 {offsets = [0, 64], sizes = [16, 64], strides = [1, 1]} : vector<16x128xbf16> to vector<16x64xbf16>
    %cst_15 = arith.constant 1.250000e-01 : bf16
    %29 = vector.broadcast %cst_15 : bf16 to vector<16x64xbf16>
    %30 = arith.mulf %28, %29 : vector<16x64xbf16>
    %31 = vector.extract_strided_slice %5 {offsets = [0, 64], sizes = [16, 64], strides = [1, 1]} : vector<16x128xbf16> to vector<16x64xbf16>
    %32 = vector.extract_strided_slice %7 {offsets = [0, 64], sizes = [16, 64], strides = [1, 1]} : vector<16x128xbf16> to vector<16x64xbf16>
    %cst_16 = arith.constant dense<0.000000e+00> : vector<16x16xf32>
    %33 = tpu.matmul %30, %31, %cst_16 {dimension_numbers = #tpu.dot_dimension_numbers<[1], [1], [0], [0], [0, 0, 1, 0], [], []>} : vector<16x64xbf16>, vector<16x64xbf16>, vector<16x16xf32> -> vector<16x16xf32>
    %34 = vector.broadcast %1 : vector<1x16xf32> to vector<16x16xf32>
    %35 = arith.addf %33, %34 : vector<16x16xf32>
    %cst_17 = arith.constant dense<0xFF800000> : vector<16xf32>
    %36 = vector.multi_reduction <maximumf>, %35, %cst_17 [1] : vector<16x16xf32> to vector<16xf32>
    %37 = vector.shape_cast %36 : vector<16xf32> to vector<16x1xf32>
    %38 = vector.broadcast %37 : vector<16x1xf32> to vector<16x16xf32>
    %39 = arith.subf %35, %38 : vector<16x16xf32>
    %40 = math.exp %39 : vector<16x16xf32>
    %cst_18 = arith.constant dense<0.000000e+00> : vector<16xf32>
    %41 = vector.multi_reduction <add>, %40, %cst_18 [1] : vector<16x16xf32> to vector<16xf32>
    %42 = vector.shape_cast %41 : vector<16xf32> to vector<16x1xf32>
    %43 = tpu.reciprocal %42 {approx = true} : vector<16x1xf32> -> vector<16x1xf32>
    %44 = vector.broadcast %43 : vector<16x1xf32> to vector<16x16xf32>
    %45 = arith.mulf %40, %44 : vector<16x16xf32>
    %46 = arith.truncf %45 : vector<16x16xf32> to vector<16x16xbf16>
    %cst_19 = arith.constant dense<0.000000e+00> : vector<16x64xf32>
    %47 = tpu.matmul %46, %32, %cst_19 {dimension_numbers = #tpu.dot_dimension_numbers<[1], [0], [0], [1], [0, 0, 1, 1], [], []>} : vector<16x16xbf16>, vector<16x64xbf16>, vector<16x64xf32> -> vector<16x64xf32>
    %48 = tpu.concatenate %27, %47 in 1 : vector<16x64xf32>, vector<16x64xf32> -> vector<16x128xf32>
    %49 = arith.truncf %48 : vector<16x128xf32> to vector<16x128xbf16>
    %c0_20 = arith.constant 0 : index
    %c0_21 = arith.constant 0 : index
    %c0_22 = arith.constant 0 : index
    %50 = vector.load %arg6[%c0_20, %c0_21, %c0_22] : memref<1x16x128xbf16, #tpu.memory_space<vmem>>, vector<1x16x128xbf16>
    %51 = vector.shape_cast %50 : vector<1x16x128xbf16> to vector<16x128xbf16>
    %52 = vector.shape_cast %49 : vector<16x128xbf16> to vector<1x16x128xbf16>
    tpu.vector_store %arg6[%c0_20, %c0_21, %c0_22], %52 {strides = array<i32>} : memref<1x16x128xbf16, #tpu.memory_space<vmem>>, vector<1x16x128xbf16>,
    return
  }
  func.func @transform_0(%arg0: i32, %arg1: i32) -> (i32, i32, i32) {
    %c0_i32 = arith.constant 0 : i32
    %c0_i32_0 = arith.constant 0 : i32
    return %arg0, %c0_i32, %arg1 : i32, i32, i32
  }
  func.func @transform_1(%arg0: i32, %arg1: i32) -> (i32, i32, i32) {
    %c1_i32 = arith.constant 1 : i32
    %0 = arith.addi %c1_i32, %arg1 : i32
    %c0_i32 = arith.constant 0 : i32
    %c0_i32_0 = arith.constant 0 : i32
    return %arg0, %c0_i32, %0 : i32, i32, i32
  }
  func.func @transform_2(%arg0: i32, %arg1: i32) -> (i32, i32, i32) {
    %c2_i32 = arith.constant 2 : i32
    %0 = arith.addi %c2_i32, %arg1 : i32
    %c0_i32 = arith.constant 0 : i32
    %c0_i32_0 = arith.constant 0 : i32
    return %arg0, %c0_i32, %0 : i32, i32, i32
  }
  func.func @transform_3(%arg0: i32, %arg1: i32) -> (i32, i32, i32) {
    %c0_i32 = arith.constant 0 : i32
    %c0_i32_0 = arith.constant 0 : i32
    %c0_i32_1 = arith.constant 0 : i32
    return %arg0, %c0_i32, %c0_i32_0 : i32, i32, i32
  }
  func.func @transform_4(%arg0: i32, %arg1: i32) -> (i32, i32, i32) {
    %c0_i32 = arith.constant 0 : i32
    %c0_i32_0 = arith.constant 0 : i32
    return %arg0, %c0_i32, %arg1 : i32, i32, i32
  }
}

module attributes {stable_mosaic.version = 11 : i64} {
  func.func @_dense_res_ln_kernel(%arg0: i32, %arg1: i32, %arg2: memref<32x128xbf16, #tpu.memory_space<vmem>>, %arg3: memref<128x128xbf16, #tpu.memory_space<vmem>>, %arg4: memref<1x128xf32, #tpu.memory_space<vmem>>, %arg5: memref<32x128xbf16, #tpu.memory_space<vmem>>, %arg6: memref<1x128xf32, #tpu.memory_space<vmem>>, %arg7: memref<1x128xf32, #tpu.memory_space<vmem>>, %arg8: memref<32x128xbf16, #tpu.memory_space<vmem>>, %arg9: memref<32x128xf32, #tpu.memory_space<vmem>>) attributes {dimension_semantics = [#tpu.dimension_semantics<parallel>, #tpu.dimension_semantics<arbitrary>], iteration_bounds = array<i64: 1, 1>, scalar_prefetch = 0 : i64, scratch_operands = 1 : i64, tpu.core_type = #tpu.core_type<tc>, window_params = [{transform_indices = @transform_0, window_bounds = array<i64: 32, 128>}, {transform_indices = @transform_1, window_bounds = array<i64: 128, 128>}, {pipeline_mode = #tpu.pipeline_mode<synchronous>, transform_indices = @transform_2, window_bounds = array<i64: 1, 128>}, {transform_indices = @transform_3, window_bounds = array<i64: 32, 128>}, {pipeline_mode = #tpu.pipeline_mode<synchronous>, transform_indices = @transform_4, window_bounds = array<i64: 1, 128>}, {pipeline_mode = #tpu.pipeline_mode<synchronous>, transform_indices = @transform_5, window_bounds = array<i64: 1, 128>}, {transform_indices = @transform_6, window_bounds = array<i64: 32, 128>}]} {
    %c0 = arith.constant 0 : index
    %c0_0 = arith.constant 0 : index
    %0 = vector.load %arg2[%c0, %c0_0] : memref<32x128xbf16, #tpu.memory_space<vmem>>, vector<32x128xbf16>
    %c0_1 = arith.constant 0 : index
    %c0_2 = arith.constant 0 : index
    %1 = vector.load %arg3[%c0_1, %c0_2] : memref<128x128xbf16, #tpu.memory_space<vmem>>, vector<128x128xbf16>
    %cst = arith.constant dense<0.000000e+00> : vector<32x128xf32>
    %2 = tpu.matmul %0, %1, %cst {dimension_numbers = #tpu.dot_dimension_numbers<[1], [0], [0], [1], [0, 0, 1, 1], [], []>} : vector<32x128xbf16>, vector<128x128xbf16>, vector<32x128xf32> -> vector<32x128xf32>
    %c0_i32 = arith.constant 0 : i32
    %3 = arith.cmpi eq, %arg1, %c0_i32 : i32
    %4 = arith.extui %3 : i1 to i32
    %c0_i32_3 = arith.constant 0 : i32
    %5 = arith.cmpi ne, %4, %c0_i32_3 : i32
    scf.if %5 {
      %c0_8 = arith.constant 0 : index
      %c0_9 = arith.constant 0 : index
      %12 = vector.load %arg9[%c0_8, %c0_9] : memref<32x128xf32, #tpu.memory_space<vmem>>, vector<32x128xf32>
      tpu.vector_store %arg9[%c0_8, %c0_9], %2 {strides = array<i32>} : memref<32x128xf32, #tpu.memory_space<vmem>>, vector<32x128xf32>,
    } else {
    }
    %c0_i32_4 = arith.constant 0 : i32
    %6 = arith.cmpi sgt, %arg1, %c0_i32_4 : i32
    %7 = arith.extui %6 : i1 to i32
    %c0_i32_5 = arith.constant 0 : i32
    %8 = arith.cmpi ne, %7, %c0_i32_5 : i32
    scf.if %8 {
      %c0_8 = arith.constant 0 : index
      %c0_9 = arith.constant 0 : index
      %12 = vector.load %arg9[%c0_8, %c0_9] : memref<32x128xf32, #tpu.memory_space<vmem>>, vector<32x128xf32>
      %13 = arith.addf %12, %2 : vector<32x128xf32>
      %c0_10 = arith.constant 0 : index
      %c0_11 = arith.constant 0 : index
      %14 = vector.load %arg9[%c0_10, %c0_11] : memref<32x128xf32, #tpu.memory_space<vmem>>, vector<32x128xf32>
      tpu.vector_store %arg9[%c0_10, %c0_11], %13 {strides = array<i32>} : memref<32x128xf32, #tpu.memory_space<vmem>>, vector<32x128xf32>,
    } else {
    }
    %c0_i32_6 = arith.constant 0 : i32
    %9 = arith.cmpi eq, %arg1, %c0_i32_6 : i32
    %10 = arith.extui %9 : i1 to i32
    %c0_i32_7 = arith.constant 0 : i32
    %11 = arith.cmpi ne, %10, %c0_i32_7 : i32
    scf.if %11 {
      %c0_8 = arith.constant 0 : index
      %c0_9 = arith.constant 0 : index
      %12 = vector.load %arg9[%c0_8, %c0_9] : memref<32x128xf32, #tpu.memory_space<vmem>>, vector<32x128xf32>
      %c0_10 = arith.constant 0 : index
      %c0_11 = arith.constant 0 : index
      %13 = vector.load %arg4[%c0_10, %c0_11] : memref<1x128xf32, #tpu.memory_space<vmem>>, vector<1x128xf32>
      %14 = vector.broadcast %13 : vector<1x128xf32> to vector<32x128xf32>
      %15 = arith.addf %12, %14 : vector<32x128xf32>
      %c0_12 = arith.constant 0 : index
      %c0_13 = arith.constant 0 : index
      %16 = vector.load %arg5[%c0_12, %c0_13] : memref<32x128xbf16, #tpu.memory_space<vmem>>, vector<32x128xbf16>
      %17 = arith.extf %16 : vector<32x128xbf16> to vector<32x128xf32>
      %18 = arith.addf %15, %17 : vector<32x128xf32>
      %cst_14 = arith.constant dense<0.000000e+00> : vector<32xf32>
      %19 = vector.multi_reduction <add>, %18, %cst_14 [1] : vector<32x128xf32> to vector<32xf32>
      %20 = vector.shape_cast %19 : vector<32xf32> to vector<32x1xf32>
      %cst_15 = arith.constant 1.280000e+02 : f32
      %21 = vector.broadcast %cst_15 : f32 to vector<32x1xf32>
      %22 = arith.divf %20, %21 : vector<32x1xf32>
      %23 = vector.broadcast %22 : vector<32x1xf32> to vector<32x128xf32>
      %24 = arith.subf %18, %23 : vector<32x128xf32>
      %25 = arith.mulf %24, %24 : vector<32x128xf32>
      %cst_16 = arith.constant dense<0.000000e+00> : vector<32xf32>
      %26 = vector.multi_reduction <add>, %25, %cst_16 [1] : vector<32x128xf32> to vector<32xf32>
      %27 = vector.shape_cast %26 : vector<32xf32> to vector<32x1xf32>
      %cst_17 = arith.constant 1.280000e+02 : f32
      %28 = vector.broadcast %cst_17 : f32 to vector<32x1xf32>
      %29 = arith.divf %27, %28 : vector<32x1xf32>
      %cst_18 = arith.constant 9.99999974E-6 : f32
      %30 = vector.broadcast %cst_18 : f32 to vector<32x1xf32>
      %31 = arith.addf %29, %30 : vector<32x1xf32>
      %32 = math.rsqrt %31 : vector<32x1xf32>
      %33 = vector.broadcast %32 : vector<32x1xf32> to vector<32x128xf32>
      %34 = arith.mulf %24, %33 : vector<32x128xf32>
      %c0_19 = arith.constant 0 : index
      %c0_20 = arith.constant 0 : index
      %35 = vector.load %arg6[%c0_19, %c0_20] : memref<1x128xf32, #tpu.memory_space<vmem>>, vector<1x128xf32>
      %36 = vector.broadcast %35 : vector<1x128xf32> to vector<32x128xf32>
      %37 = arith.mulf %34, %36 : vector<32x128xf32>
      %c0_21 = arith.constant 0 : index
      %c0_22 = arith.constant 0 : index
      %38 = vector.load %arg7[%c0_21, %c0_22] : memref<1x128xf32, #tpu.memory_space<vmem>>, vector<1x128xf32>
      %39 = vector.broadcast %38 : vector<1x128xf32> to vector<32x128xf32>
      %40 = arith.addf %37, %39 : vector<32x128xf32>
      %41 = arith.truncf %40 : vector<32x128xf32> to vector<32x128xbf16>
      %c0_23 = arith.constant 0 : index
      %c0_24 = arith.constant 0 : index
      %42 = vector.load %arg8[%c0_23, %c0_24] : memref<32x128xbf16, #tpu.memory_space<vmem>>, vector<32x128xbf16>
      tpu.vector_store %arg8[%c0_23, %c0_24], %41 {strides = array<i32>} : memref<32x128xbf16, #tpu.memory_space<vmem>>, vector<32x128xbf16>,
    } else {
    }
    return
  }
  func.func @transform_0(%arg0: i32, %arg1: i32) -> (i32, i32) {
    %c0_i32 = arith.constant 0 : i32
    return %arg0, %arg1 : i32, i32
  }
  func.func @transform_1(%arg0: i32, %arg1: i32) -> (i32, i32) {
    %c0_i32 = arith.constant 0 : i32
    %c0_i32_0 = arith.constant 0 : i32
    return %arg1, %c0_i32 : i32, i32
  }
  func.func @transform_2(%arg0: i32, %arg1: i32) -> (i32, i32) {
    %c0_i32 = arith.constant 0 : i32
    %c0_i32_0 = arith.constant 0 : i32
    %c0_i32_1 = arith.constant 0 : i32
    return %c0_i32, %c0_i32_0 : i32, i32
  }
  func.func @transform_3(%arg0: i32, %arg1: i32) -> (i32, i32) {
    %c0_i32 = arith.constant 0 : i32
    %c0_i32_0 = arith.constant 0 : i32
    return %arg0, %c0_i32 : i32, i32
  }
  func.func @transform_4(%arg0: i32, %arg1: i32) -> (i32, i32) {
    %c0_i32 = arith.constant 0 : i32
    %c0_i32_0 = arith.constant 0 : i32
    %c0_i32_1 = arith.constant 0 : i32
    return %c0_i32, %c0_i32_0 : i32, i32
  }
  func.func @transform_5(%arg0: i32, %arg1: i32) -> (i32, i32) {
    %c0_i32 = arith.constant 0 : i32
    %c0_i32_0 = arith.constant 0 : i32
    %c0_i32_1 = arith.constant 0 : i32
    return %c0_i32, %c0_i32_0 : i32, i32
  }
  func.func @transform_6(%arg0: i32, %arg1: i32) -> (i32, i32) {
    %c0_i32 = arith.constant 0 : i32
    %c0_i32_0 = arith.constant 0 : i32
    return %arg0, %c0_i32 : i32, i32
  }
}

module attributes {stable_mosaic.version = 11 : i64} {
  func.func @_dense_kernel(%arg0: i32, %arg1: i32, %arg2: i32, %arg3: memref<32x128xbf16, #tpu.memory_space<vmem>>, %arg4: memref<128x512xbf16, #tpu.memory_space<vmem>>, %arg5: memref<1x512xf32, #tpu.memory_space<vmem>>, %arg6: memref<32x512xbf16, #tpu.memory_space<vmem>>, %arg7: memref<32x512xf32, #tpu.memory_space<vmem>>) attributes {dimension_semantics = [#tpu.dimension_semantics<parallel>, #tpu.dimension_semantics<parallel>, #tpu.dimension_semantics<arbitrary>], iteration_bounds = array<i64: 1, 1, 1>, scalar_prefetch = 0 : i64, scratch_operands = 1 : i64, tpu.core_type = #tpu.core_type<tc>, window_params = [{transform_indices = @transform_0, window_bounds = array<i64: 32, 128>}, {transform_indices = @transform_1, window_bounds = array<i64: 128, 512>}, {transform_indices = @transform_2, window_bounds = array<i64: 1, 512>}, {transform_indices = @transform_3, window_bounds = array<i64: 32, 512>}]} {
    %c0 = arith.constant 0 : index
    %c0_0 = arith.constant 0 : index
    %0 = vector.load %arg3[%c0, %c0_0] : memref<32x128xbf16, #tpu.memory_space<vmem>>, vector<32x128xbf16>
    %c0_1 = arith.constant 0 : index
    %c0_2 = arith.constant 0 : index
    %1 = vector.load %arg4[%c0_1, %c0_2] : memref<128x512xbf16, #tpu.memory_space<vmem>>, vector<128x512xbf16>
    %cst = arith.constant dense<0.000000e+00> : vector<32x512xf32>
    %2 = tpu.matmul %0, %1, %cst {dimension_numbers = #tpu.dot_dimension_numbers<[1], [0], [0], [1], [0, 0, 1, 1], [], []>} : vector<32x128xbf16>, vector<128x512xbf16>, vector<32x512xf32> -> vector<32x512xf32>
    %c0_i32 = arith.constant 0 : i32
    %3 = arith.cmpi eq, %arg2, %c0_i32 : i32
    %4 = arith.extui %3 : i1 to i32
    %c0_i32_3 = arith.constant 0 : i32
    %5 = arith.cmpi ne, %4, %c0_i32_3 : i32
    scf.if %5 {
      %c0_8 = arith.constant 0 : index
      %c0_9 = arith.constant 0 : index
      %12 = vector.load %arg7[%c0_8, %c0_9] : memref<32x512xf32, #tpu.memory_space<vmem>>, vector<32x512xf32>
      tpu.vector_store %arg7[%c0_8, %c0_9], %2 {strides = array<i32>} : memref<32x512xf32, #tpu.memory_space<vmem>>, vector<32x512xf32>,
    } else {
    }
    %c0_i32_4 = arith.constant 0 : i32
    %6 = arith.cmpi sgt, %arg2, %c0_i32_4 : i32
    %7 = arith.extui %6 : i1 to i32
    %c0_i32_5 = arith.constant 0 : i32
    %8 = arith.cmpi ne, %7, %c0_i32_5 : i32
    scf.if %8 {
      %c0_8 = arith.constant 0 : index
      %c0_9 = arith.constant 0 : index
      %12 = vector.load %arg7[%c0_8, %c0_9] : memref<32x512xf32, #tpu.memory_space<vmem>>, vector<32x512xf32>
      %13 = arith.addf %12, %2 : vector<32x512xf32>
      %c0_10 = arith.constant 0 : index
      %c0_11 = arith.constant 0 : index
      %14 = vector.load %arg7[%c0_10, %c0_11] : memref<32x512xf32, #tpu.memory_space<vmem>>, vector<32x512xf32>
      tpu.vector_store %arg7[%c0_10, %c0_11], %13 {strides = array<i32>} : memref<32x512xf32, #tpu.memory_space<vmem>>, vector<32x512xf32>,
    } else {
    }
    %c0_i32_6 = arith.constant 0 : i32
    %9 = arith.cmpi eq, %arg2, %c0_i32_6 : i32
    %10 = arith.extui %9 : i1 to i32
    %c0_i32_7 = arith.constant 0 : i32
    %11 = arith.cmpi ne, %10, %c0_i32_7 : i32
    scf.if %11 {
      %c0_8 = arith.constant 0 : index
      %c0_9 = arith.constant 0 : index
      %12 = vector.load %arg7[%c0_8, %c0_9] : memref<32x512xf32, #tpu.memory_space<vmem>>, vector<32x512xf32>
      %c0_10 = arith.constant 0 : index
      %c0_11 = arith.constant 0 : index
      %13 = vector.load %arg5[%c0_10, %c0_11] : memref<1x512xf32, #tpu.memory_space<vmem>>, vector<1x512xf32>
      %14 = vector.broadcast %13 : vector<1x512xf32> to vector<32x512xf32>
      %15 = arith.addf %12, %14 : vector<32x512xf32>
      %cst_12 = arith.constant 5.000000e-01 : f32
      %16 = vector.broadcast %cst_12 : f32 to vector<32x512xf32>
      %17 = arith.mulf %16, %15 : vector<32x512xf32>
      %cst_13 = arith.constant 0.707106769 : f32
      %18 = vector.broadcast %cst_13 : f32 to vector<32x512xf32>
      %19 = arith.mulf %15, %18 : vector<32x512xf32>
      %20 = math.erf %19 : vector<32x512xf32>
      %cst_14 = arith.constant 1.000000e+00 : f32
      %21 = vector.broadcast %cst_14 : f32 to vector<32x512xf32>
      %22 = arith.addf %21, %20 : vector<32x512xf32>
      %23 = arith.mulf %17, %22 : vector<32x512xf32>
      %24 = arith.truncf %23 : vector<32x512xf32> to vector<32x512xbf16>
      %c0_15 = arith.constant 0 : index
      %c0_16 = arith.constant 0 : index
      %25 = vector.load %arg6[%c0_15, %c0_16] : memref<32x512xbf16, #tpu.memory_space<vmem>>, vector<32x512xbf16>
      tpu.vector_store %arg6[%c0_15, %c0_16], %24 {strides = array<i32>} : memref<32x512xbf16, #tpu.memory_space<vmem>>, vector<32x512xbf16>,
    } else {
    }
    return
  }
  func.func @transform_0(%arg0: i32, %arg1: i32, %arg2: i32) -> (i32, i32) {
    %c0_i32 = arith.constant 0 : i32
    return %arg0, %arg2 : i32, i32
  }
  func.func @transform_1(%arg0: i32, %arg1: i32, %arg2: i32) -> (i32, i32) {
    %c0_i32 = arith.constant 0 : i32
    return %arg2, %arg1 : i32, i32
  }
  func.func @transform_2(%arg0: i32, %arg1: i32, %arg2: i32) -> (i32, i32) {
    %c0_i32 = arith.constant 0 : i32
    %c0_i32_0 = arith.constant 0 : i32
    return %c0_i32, %arg1 : i32, i32
  }
  func.func @transform_3(%arg0: i32, %arg1: i32, %arg2: i32) -> (i32, i32) {
    %c0_i32 = arith.constant 0 : i32
    return %arg0, %arg1 : i32, i32
  }
}

module attributes {stable_mosaic.version = 11 : i64} {
  func.func @_dense_res_ln_kernel(%arg0: i32, %arg1: i32, %arg2: memref<32x512xbf16, #tpu.memory_space<vmem>>, %arg3: memref<512x128xbf16, #tpu.memory_space<vmem>>, %arg4: memref<1x128xf32, #tpu.memory_space<vmem>>, %arg5: memref<32x128xbf16, #tpu.memory_space<vmem>>, %arg6: memref<1x128xf32, #tpu.memory_space<vmem>>, %arg7: memref<1x128xf32, #tpu.memory_space<vmem>>, %arg8: memref<32x128xbf16, #tpu.memory_space<vmem>>, %arg9: memref<32x128xf32, #tpu.memory_space<vmem>>) attributes {dimension_semantics = [#tpu.dimension_semantics<parallel>, #tpu.dimension_semantics<arbitrary>], iteration_bounds = array<i64: 1, 1>, scalar_prefetch = 0 : i64, scratch_operands = 1 : i64, tpu.core_type = #tpu.core_type<tc>, window_params = [{transform_indices = @transform_0, window_bounds = array<i64: 32, 512>}, {transform_indices = @transform_1, window_bounds = array<i64: 512, 128>}, {pipeline_mode = #tpu.pipeline_mode<synchronous>, transform_indices = @transform_2, window_bounds = array<i64: 1, 128>}, {transform_indices = @transform_3, window_bounds = array<i64: 32, 128>}, {pipeline_mode = #tpu.pipeline_mode<synchronous>, transform_indices = @transform_4, window_bounds = array<i64: 1, 128>}, {pipeline_mode = #tpu.pipeline_mode<synchronous>, transform_indices = @transform_5, window_bounds = array<i64: 1, 128>}, {transform_indices = @transform_6, window_bounds = array<i64: 32, 128>}]} {
    %c0 = arith.constant 0 : index
    %c0_0 = arith.constant 0 : index
    %0 = vector.load %arg2[%c0, %c0_0] : memref<32x512xbf16, #tpu.memory_space<vmem>>, vector<32x512xbf16>
    %c0_1 = arith.constant 0 : index
    %c0_2 = arith.constant 0 : index
    %1 = vector.load %arg3[%c0_1, %c0_2] : memref<512x128xbf16, #tpu.memory_space<vmem>>, vector<512x128xbf16>
    %cst = arith.constant dense<0.000000e+00> : vector<32x128xf32>
    %2 = tpu.matmul %0, %1, %cst {dimension_numbers = #tpu.dot_dimension_numbers<[1], [0], [0], [1], [0, 0, 1, 1], [], []>} : vector<32x512xbf16>, vector<512x128xbf16>, vector<32x128xf32> -> vector<32x128xf32>
    %c0_i32 = arith.constant 0 : i32
    %3 = arith.cmpi eq, %arg1, %c0_i32 : i32
    %4 = arith.extui %3 : i1 to i32
    %c0_i32_3 = arith.constant 0 : i32
    %5 = arith.cmpi ne, %4, %c0_i32_3 : i32
    scf.if %5 {
      %c0_8 = arith.constant 0 : index
      %c0_9 = arith.constant 0 : index
      %12 = vector.load %arg9[%c0_8, %c0_9] : memref<32x128xf32, #tpu.memory_space<vmem>>, vector<32x128xf32>
      tpu.vector_store %arg9[%c0_8, %c0_9], %2 {strides = array<i32>} : memref<32x128xf32, #tpu.memory_space<vmem>>, vector<32x128xf32>,
    } else {
    }
    %c0_i32_4 = arith.constant 0 : i32
    %6 = arith.cmpi sgt, %arg1, %c0_i32_4 : i32
    %7 = arith.extui %6 : i1 to i32
    %c0_i32_5 = arith.constant 0 : i32
    %8 = arith.cmpi ne, %7, %c0_i32_5 : i32
    scf.if %8 {
      %c0_8 = arith.constant 0 : index
      %c0_9 = arith.constant 0 : index
      %12 = vector.load %arg9[%c0_8, %c0_9] : memref<32x128xf32, #tpu.memory_space<vmem>>, vector<32x128xf32>
      %13 = arith.addf %12, %2 : vector<32x128xf32>
      %c0_10 = arith.constant 0 : index
      %c0_11 = arith.constant 0 : index
      %14 = vector.load %arg9[%c0_10, %c0_11] : memref<32x128xf32, #tpu.memory_space<vmem>>, vector<32x128xf32>
      tpu.vector_store %arg9[%c0_10, %c0_11], %13 {strides = array<i32>} : memref<32x128xf32, #tpu.memory_space<vmem>>, vector<32x128xf32>,
    } else {
    }
    %c0_i32_6 = arith.constant 0 : i32
    %9 = arith.cmpi eq, %arg1, %c0_i32_6 : i32
    %10 = arith.extui %9 : i1 to i32
    %c0_i32_7 = arith.constant 0 : i32
    %11 = arith.cmpi ne, %10, %c0_i32_7 : i32
    scf.if %11 {
      %c0_8 = arith.constant 0 : index
      %c0_9 = arith.constant 0 : index
      %12 = vector.load %arg9[%c0_8, %c0_9] : memref<32x128xf32, #tpu.memory_space<vmem>>, vector<32x128xf32>
      %c0_10 = arith.constant 0 : index
      %c0_11 = arith.constant 0 : index
      %13 = vector.load %arg4[%c0_10, %c0_11] : memref<1x128xf32, #tpu.memory_space<vmem>>, vector<1x128xf32>
      %14 = vector.broadcast %13 : vector<1x128xf32> to vector<32x128xf32>
      %15 = arith.addf %12, %14 : vector<32x128xf32>
      %c0_12 = arith.constant 0 : index
      %c0_13 = arith.constant 0 : index
      %16 = vector.load %arg5[%c0_12, %c0_13] : memref<32x128xbf16, #tpu.memory_space<vmem>>, vector<32x128xbf16>
      %17 = arith.extf %16 : vector<32x128xbf16> to vector<32x128xf32>
      %18 = arith.addf %15, %17 : vector<32x128xf32>
      %cst_14 = arith.constant dense<0.000000e+00> : vector<32xf32>
      %19 = vector.multi_reduction <add>, %18, %cst_14 [1] : vector<32x128xf32> to vector<32xf32>
      %20 = vector.shape_cast %19 : vector<32xf32> to vector<32x1xf32>
      %cst_15 = arith.constant 1.280000e+02 : f32
      %21 = vector.broadcast %cst_15 : f32 to vector<32x1xf32>
      %22 = arith.divf %20, %21 : vector<32x1xf32>
      %23 = vector.broadcast %22 : vector<32x1xf32> to vector<32x128xf32>
      %24 = arith.subf %18, %23 : vector<32x128xf32>
      %25 = arith.mulf %24, %24 : vector<32x128xf32>
      %cst_16 = arith.constant dense<0.000000e+00> : vector<32xf32>
      %26 = vector.multi_reduction <add>, %25, %cst_16 [1] : vector<32x128xf32> to vector<32xf32>
      %27 = vector.shape_cast %26 : vector<32xf32> to vector<32x1xf32>
      %cst_17 = arith.constant 1.280000e+02 : f32
      %28 = vector.broadcast %cst_17 : f32 to vector<32x1xf32>
      %29 = arith.divf %27, %28 : vector<32x1xf32>
      %cst_18 = arith.constant 9.99999974E-6 : f32
      %30 = vector.broadcast %cst_18 : f32 to vector<32x1xf32>
      %31 = arith.addf %29, %30 : vector<32x1xf32>
      %32 = math.rsqrt %31 : vector<32x1xf32>
      %33 = vector.broadcast %32 : vector<32x1xf32> to vector<32x128xf32>
      %34 = arith.mulf %24, %33 : vector<32x128xf32>
      %c0_19 = arith.constant 0 : index
      %c0_20 = arith.constant 0 : index
      %35 = vector.load %arg6[%c0_19, %c0_20] : memref<1x128xf32, #tpu.memory_space<vmem>>, vector<1x128xf32>
      %36 = vector.broadcast %35 : vector<1x128xf32> to vector<32x128xf32>
      %37 = arith.mulf %34, %36 : vector<32x128xf32>
      %c0_21 = arith.constant 0 : index
      %c0_22 = arith.constant 0 : index
      %38 = vector.load %arg7[%c0_21, %c0_22] : memref<1x128xf32, #tpu.memory_space<vmem>>, vector<1x128xf32>
      %39 = vector.broadcast %38 : vector<1x128xf32> to vector<32x128xf32>
      %40 = arith.addf %37, %39 : vector<32x128xf32>
      %41 = arith.truncf %40 : vector<32x128xf32> to vector<32x128xbf16>
      %c0_23 = arith.constant 0 : index
      %c0_24 = arith.constant 0 : index
      %42 = vector.load %arg8[%c0_23, %c0_24] : memref<32x128xbf16, #tpu.memory_space<vmem>>, vector<32x128xbf16>
      tpu.vector_store %arg8[%c0_23, %c0_24], %41 {strides = array<i32>} : memref<32x128xbf16, #tpu.memory_space<vmem>>, vector<32x128xbf16>,
    } else {
    }
    return
  }
  func.func @transform_0(%arg0: i32, %arg1: i32) -> (i32, i32) {
    %c0_i32 = arith.constant 0 : i32
    return %arg0, %arg1 : i32, i32
  }
  func.func @transform_1(%arg0: i32, %arg1: i32) -> (i32, i32) {
    %c0_i32 = arith.constant 0 : i32
    %c0_i32_0 = arith.constant 0 : i32
    return %arg1, %c0_i32 : i32, i32
  }
  func.func @transform_2(%arg0: i32, %arg1: i32) -> (i32, i32) {
    %c0_i32 = arith.constant 0 : i32
    %c0_i32_0 = arith.constant 0 : i32
    %c0_i32_1 = arith.constant 0 : i32
    return %c0_i32, %c0_i32_0 : i32, i32
  }
  func.func @transform_3(%arg0: i32, %arg1: i32) -> (i32, i32) {
    %c0_i32 = arith.constant 0 : i32
    %c0_i32_0 = arith.constant 0 : i32
    return %arg0, %c0_i32 : i32, i32
  }
  func.func @transform_4(%arg0: i32, %arg1: i32) -> (i32, i32) {
    %c0_i32 = arith.constant 0 : i32
    %c0_i32_0 = arith.constant 0 : i32
    %c0_i32_1 = arith.constant 0 : i32
    return %c0_i32, %c0_i32_0 : i32, i32
  }
  func.func @transform_5(%arg0: i32, %arg1: i32) -> (i32, i32) {
    %c0_i32 = arith.constant 0 : i32
    %c0_i32_0 = arith.constant 0 : i32
    %c0_i32_1 = arith.constant 0 : i32
    return %c0_i32, %c0_i32_0 : i32, i32
  }
  func.func @transform_6(%arg0: i32, %arg1: i32) -> (i32, i32) {
    %c0_i32 = arith.constant 0 : i32
    %c0_i32_0 = arith.constant 0 : i32
    return %arg0, %c0_i32 : i32, i32
  }
}

</mosaic_0001>

<bundles_post_ra>
// kernel: _lambda_.1
= control target key start
LH: loop header
LB: loop body
LE: loop exit
PB: predicated region body
PF: predicated region fallthrough
CT: control target
= control target key end

     0   :  { %v157_v4 = vmov 128.0   ;;  %s222_s0 = inlined_call_operand.vmem [shape: f32[32,128], index: 0, kind: input, shape index: {}]   ;;  %s223_s1 = inlined_call_operand.vmem [shape: f32[1,128], index: 1, kind: input, shape index: {}]   ;;  %s224_s2 = inlined_call_operand.vmem [shape: f32[1,128], index: 2, kind: input, shape index: {}]   ;;  %s225_s3 = inlined_call_operand.vmem [shape: bf16[32,128], index: 3, kind: output, shape index: {}]  }
   0x1   :  { %v16_v0 = vld [vmem:[%s222_s0 + $0x10] sm:$0xff]  ;;  %v14_v1 = vld [vmem:[%s222_s0] sm:$0xff]  ;;  %v17_v2 = vld [vmem:[%s222_s0 + $0x18] sm:$0xff]  ;;  %147 = vrcp.f32 %v157_v4 }
   0x2   :  { %22 = vadd.xlane.f32.xlu1 %v16_v0  ;;  %18 = vadd.xlane.f32.xlu0 %v14_v1  ;;  %v15_v3 = vld [vmem:[%s222_s0 + $0x8] sm:$0xff]  ;;  %v145_v62 = vld [vmem:[%s223_s1] ss:$0 sm:$0xff] }
   0x7   :  { %v148_v5 = vpop.eup %147 }
   0x8   :  { %v27_v6 = vmul.f32 128.0, %v148_v5  ;;  %vm31_vm0 = vweird.f32 %v148_v5 }
   0xa   :  { %24 = vadd.xlane.f32.xlu1 %v17_v2  ;;  %20 = vadd.xlane.f32.xlu0 %v15_v3  ;;  %v28_v7 = vsub.f32 1.0, %v27_v6 }
   0xc   :  { %v29_v8 = vmul.f32 %v148_v5, %v28_v7 }
   0xe   :  { %v30_v9 = vadd.f32 %v148_v5, %v29_v8 }
  0x10   :  { %v32_v10 = vsel %vm31_vm0, %v148_v5, %v30_v9  ;;  %v146_v5 = vld [vmem:[%s224_s2] ss:$0 sm:$0xff] }
  0x75   :  { %v23_v11 = vpop.xlane.xlu1 %22  ;;  %v19_v12 = vpop.xlane.xlu0 %18 }
  0x76   :  { %v35_v13 = vmul.f32 %v32_v10, %v23_v11  ;;  %v33_v14 = vmul.f32 %v32_v10, %v19_v12 }
  0x78   :  { %v190_v15 = vsub.f32 %v16_v0, %v35_v13  ;;  %v192_v16 = vsub.f32 %v14_v1, %v33_v14 }
  0x7a   :  { %v43_v17 = vmul.f32 %v190_v15, %v190_v15  ;;  %v41_v18 = vmul.f32 %v192_v16, %v192_v16 }
  0x7c   :  { %49 = vadd.xlane.f32.xlu0 %v43_v17  ;;  %45 = vadd.xlane.f32.xlu2 %v41_v18 }
  0x7d   :  { %v25_v19 = vpop.xlane.xlu1 %24  ;;  %v21_v20 = vpop.xlane.xlu0 %20 }
  0x7e   :  { %v36_v21 = vmul.f32 %v32_v10, %v25_v19  ;;  %v34_v22 = vmul.f32 %v32_v10, %v21_v20 }
  0x80   :  { %v198_v23 = vsub.f32 %v17_v2, %v36_v21  ;;  %v200_v24 = vsub.f32 %v15_v3, %v34_v22 }
  0x82   :  { %v44_v25 = vmul.f32 %v198_v23, %v198_v23  ;;  %v42_v26 = vmul.f32 %v200_v24, %v200_v24 }
  0x84   :  { %51 = vadd.xlane.f32.xlu1 %v44_v25  ;;  %47 = vadd.xlane.f32.xlu2 %v42_v26 }
  0xef   :  { %v46_v27 = vpop.xlane.xlu2 %45  ;;  %v50_v28 = vpop.xlane.xlu0 %49 }
  0xf0   :  { %v53_v29 = vmul.f32 %v46_v27, %v32_v10  ;;  %v55_v30 = vmul.f32 %v50_v28, %v32_v10 }
  0xf2   :  { %v57_v31 = vadd.f32 1e-05, %v53_v29  ;;  %v59_v32 = vadd.f32 1e-05, %v55_v30 }
  0xf4   :  { %149 = vrsqrt.f32 %v57_v31  ;;  %vm87_vm3 = vweird.f32 %v59_v32  ;;  %vm67_vm4 = vweird.f32 %v57_v31 }
  0xf5   :  { %151 = vrsqrt.f32 %v59_v32 }
  0xf7   :  { %v52_v33 = vpop.xlane.xlu1 %51  ;;  %v48_v34 = vpop.xlane.xlu2 %47 }
  0xf8   :  { %v56_v35 = vmul.f32 %v52_v33, %v32_v10  ;;  %v54_v36 = vmul.f32 %v48_v34, %v32_v10 }
  0xfa   :  { %v150_v37 = vpop.eup %149  ;;  %v60_v38 = vadd.f32 1e-05, %v56_v35  ;;  %v58_v39 = vadd.f32 1e-05, %v54_v36 }
  0xfb   :  { %v152_v40 = vpop.eup %151  ;;  %v62_v41 = vmul.f32 %v150_v37, %v57_v31  ;;  %vm68_vm2 = vweird.f32 %v150_v37 }
  0xfc   :  { %v82_v42 = vmul.f32 %v152_v40, %v59_v32  ;;  %153 = vrsqrt.f32 %v60_v38  ;;  %vm88_vm1 = vweird.f32 %v152_v40  ;;  %vm69_vm6 = vmor %vm67_vm4, %vm68_vm2  ;;  %vm97_vm9 = vweird.f32 %v60_v38 }
  0xfd   :  { %v63_v43 = vmul.f32 %v150_v37, %v62_v41  ;;  %155 = vrsqrt.f32 %v58_v39  ;;  %vm89_vm5 = vmor %vm87_vm3, %vm88_vm1  ;;  %vm77_vm11 = vweird.f32 %v58_v39 }
  0xfe   :  { %v83_v44 = vmul.f32 %v152_v40, %v82_v42 }
  0xff   :  { %v64_v45 = vmul.f32 0.5, %v63_v43 }
 0x100   :  { %v84_v46 = vmul.f32 0.5, %v83_v44 }
 0x101   :  { %v65_v47 = vsub.f32 1.5, %v64_v45 }
 0x102   :  { %v154_v48 = vpop.eup %153  ;;  %v85_v49 = vsub.f32 1.5, %v84_v46 }
 0x103   :  { %v156_v50 = vpop.eup %155  ;;  %v92_v51 = vmul.f32 %v154_v48, %v60_v38  ;;  %v66_v52 = vmul.f32 %v150_v37, %v65_v47  ;;  %vm98_vm7 = vweird.f32 %v154_v48 }
 0x104   :  { %v86_v53 = vmul.f32 %v152_v40, %v85_v49  ;;  %v72_v54 = vmul.f32 %v156_v50, %v58_v39  ;;  %vm78_vm8 = vweird.f32 %v156_v50  ;;  %vm99_vm10 = vmor %vm97_vm9, %vm98_vm7 }
 0x105   :  { %v93_v55 = vmul.f32 %v154_v48, %v92_v51  ;;  %v70_v59 = vsel %vm69_vm6, %v150_v37, %v66_v52  ;;  %vm79_vm12 = vmor %vm77_vm11, %vm78_vm8 }
 0x106   :  { %v73_v56 = vmul.f32 %v156_v50, %v72_v54  ;;  %v90_v57 = vsel %vm89_vm5, %v152_v40, %v86_v53  ;;  %v101_v1 = vmul.f32 %v70_v59, %v192_v16 }
 0x107   :  { %v94_v58 = vmul.f32 0.5, %v93_v55  ;;  %v103_v63 = vmul.f32 %v90_v57, %v190_v15 }
 0x108   :  { %v74_v60 = vmul.f32 0.5, %v73_v56  ;;  %v109_v9 = vmul.f32 %v145_v62, %v101_v1 }
 0x109   :  { %v95_v61 = vsub.f32 1.5, %v94_v58  ;;  %v111_v6 = vmul.f32 %v145_v62, %v103_v63 }
 0x10a   :  { %v75_v0 = vsub.f32 1.5, %v74_v60  ;;  %v117_v15 = vadd.f32 %v146_v5, %v109_v9 }
 0x10b   :  { %v96_v2 = vmul.f32 %v154_v48, %v95_v61  ;;  %v119_v13 = vadd.f32 %v146_v5, %v111_v6 }
 0x10c   :  { %v76_v3 = vmul.f32 %v156_v50, %v75_v0 }
 0x10d   :  { %v100_v4 = vsel %vm99_vm10, %v154_v48, %v96_v2 }
 0x10e   :  { %v104_v7 = vmul.f32 %v100_v4, %v198_v23  ;;  %v80_v8 = vsel %vm79_vm12, %v156_v50, %v76_v3 }
 0x10f   :  { %v102_v10 = vmul.f32 %v80_v8, %v200_v24 }
 0x110   :  { %v112_v11 = vmul.f32 %v145_v62, %v104_v7 }
 0x111   :  { %v110_v12 = vmul.f32 %v145_v62, %v102_v10 }
 0x112   :  { %v120_v14 = vadd.f32 %v146_v5, %v112_v11 }
 0x113   :  { %v118_v16 = vadd.f32 %v146_v5, %v110_v12 }
 0x114   :  { %v141_v17 = vpack.c.bf16 %v120_v14, %v119_v13 }
 0x115   :  { %v136_v18 = vpack.c.bf16 %v118_v16, %v117_v15 }
 0x116   :  { %143 = vst [vmem:[%s225_s3 + $0x8] sm:$0xff] %v141_v17  }
 0x117   :  { %137 = vst [vmem:[%s225_s3] sm:$0xff] %v136_v18  }

// kernel: closed_call.17
= control target key start
LH: loop header
LB: loop body
LE: loop exit
PB: predicated region body
PF: predicated region fallthrough
CT: control target
= control target key end

     0   :  { %s916_s15 = smov 0   ;;  %s918_s16 = smov 0   ;;  %s1034_s0 = inlined_call_operand.vmem [shape: bf16[2,16,384], index: 0, kind: input, shape index: {}, may-alias: {0,1,2}]   ;;  %s1035_s1 = inlined_call_operand.vmem [shape: bf16[2,16,384], index: 1, kind: input, shape index: {}, may-alias: {0,1,2}]   ;;  %s1036_s2 = inlined_call_operand.vmem [shape: bf16[2,16,384], index: 2, kind: input, shape index: {}, may-alias: {0,1,2}]   ;;  %s1037_s3 = inlined_call_operand.vmem [shape: f32[2,1,16], index: 3, kind: input, shape index: {}]   ;;  %s1038_s4 = inlined_call_operand.vmem [shape: bf16[2,16,128], index: 4, kind: output, shape index: {}]  }
   0x1   :  { %s920_s17 = smov 0   ;;  %s922_s18 = smov 0  }
   0x2   :  { %s924_s19 = smov 0  }
   0x3 LB: > { %s26_s20 = sadd.s32 1, %s884_s18  ;;  %p42_p1 = scmp.ne.s32.totalorder %s876_s16, %s872_s15  ;;  %s888_s19 = sphi %s924_s19, %s14_s19   ;;  %s884_s18 = sphi %s922_s18, %s1043_s18   ;;  %s880_s17 = sphi %s920_s17, %s1042_s17   ;;  %s876_s16 = sphi %s918_s16, %s1041_s16   ;;  %s872_s15 = sphi %s916_s15, %s1040_s15  }
   0x4   : > { %p28_p0 = scmp.ge.s32.totalorder %s26_s20, 2  ;;  %p43_p2 = scmp.eq.s32.totalorder %s888_s19, 0 }
   0x5   : > { %s35_s23 = sadd.s32 1, %s876_s16  ;;  %p743_p5 = scmp.ge.s32.totalorder %s888_s19, 2 }
   0x6   : > { %s1045_s20 = smov (%p28_p0, %s26_s20), 0  ;;  %p947_p3 = por %p43_p2, %p42_p1 }
   0x7   : > { %s30_s22 = ssub.s32 %s884_s18, %s1045_s20  ;;  %182 = sbr.rel (%p743_p5) target bundleno = 33 (0x21), region = 16 }
   0x8   : > { %p33_p4 = scmp.eq.s32.totalorder %s30_s22, 0 }
   0xa   : > { %s955_s24 = scalar_select %p33_p4, %s876_s16, %s35_s23  }
   0xc   : > { %185 = sbr.rel (!%p947_p3) target bundleno = 19 (0x13), region = 20  ;;  %s187_s25 = sand.u32 (%p947_p3), 1, %s876_s16  }
   0xd   : > { %s786_s26 = smul.u32 (%p947_p3), 24, %s884_s18  ;;  %s744_s27 = sshll.u32 (%p947_p3), %s187_s25, 3 }
   0xe   : > { %s189_s5 = scalar_lea.vmem (%p947_p3), [#allocation2], %s744_s27 }
   0xf   : > { %s193_s30 = scalar_lea.vmem (%p947_p3), %s1034_s0, %s786_s26 }
  0x10   : > { %v210_v0 = vld [vmem:[%s193_s30] sm:$0xf] (%p947_p3)  ;;  %v212_v1 = vld [vmem:[%s193_s30 + $0xc] sm:$0xf] (%p947_p3) }
  0x11   : > { %211 = vst [vmem:[%s189_s5] sm:$0xf] %v210_v0 }
  0x12   : > { %213 = vst [vmem:[%s189_s5 + $0x4] sm:$0xf] %v212_v1 }
  0x13 PF: > { %241 = sbr.rel (!%p947_p3) target bundleno = 26 (0x1a), region = 61  ;;  %s243_s6 = sand.u32 (%p947_p3), 1, %s876_s16  }
  0x14   : > { %s747_s7 = smul.u32 (%p947_p3), 24, %s884_s18  ;;  %s746_s8 = sshll.u32 (%p947_p3), %s243_s6, 3 }
  0x15   : > { %s245_s12 = scalar_lea.vmem (%p947_p3), [#allocation3], %s746_s8 }
  0x16   : > { %s642_s11 = scalar_lea.vmem (%p947_p3), %s1035_s1, %s747_s7 }
  0x17   : > { %v748_v2 = vld [vmem:[%s642_s11 + $0x4] sm:$0xf] (%p947_p3)  ;;  %v749_v3 = vld [vmem:[%s642_s11 + $0x10] sm:$0xf] (%p947_p3) }
  0x18   : > { %268 = vst [vmem:[%s245_s12] sm:$0xf] %v748_v2 }
  0x19   : > { %270 = vst [vmem:[%s245_s12 + $0x4] sm:$0xf] %v749_v3 }
  0x1a PF: > { %298 = sbr.rel (!%p947_p3) target bundleno = 33 (0x21), region = 102  ;;  %s300_s13 = sand.u32 (%p947_p3), 1, %s876_s16  }
  0x1b   : > { %s751_s14 = smul.u32 (%p947_p3), 24, %s884_s18  ;;  %s750_s22 = sshll.u32 (%p947_p3), %s300_s13, 3 }
  0x1c   : > { %s302_s27 = scalar_lea.vmem (%p947_p3), [#allocation4], %s750_s22 }
  0x1d   : > { %s649_s26 = scalar_lea.vmem (%p947_p3), %s1036_s2, %s751_s14 }
  0x1e   : > { %v752_v4 = vld [vmem:[%s649_s26 + $0x8] sm:$0xf] (%p947_p3)  ;;  %v753_v5 = vld [vmem:[%s649_s26 + $0x14] sm:$0xf] (%p947_p3) }
  0x1f   : > { %325 = vst [vmem:[%s302_s27] sm:$0xf] %v752_v4 }
  0x20   : > { %327 = vst [vmem:[%s302_s27 + $0x4] sm:$0xf] %v753_v5 }
  0x21 PF: > { %p754_p6 = scmp.ge.s32.totalorder %s888_s19, 1  ;;  %p360_p7 = scmp.lt.s32.totalorder %s888_s19, 3 }
  0x23   : > { %p361_p8 = pnand %p754_p6, %p360_p7 }
  0x24   : > { %s367_s21 = sand.u32 (!%p361_p8), 1, %s872_s15   ;;  %p422_p9 = scmp.lt.s32.totalorder (!%p361_p8), %s880_s17, 1 }
  0x25   : > { %364 = sbr.rel (%p361_p8) target bundleno = 827 (0x33b), region = 147  ;;  %s982_s28 = sshll.u32 (!%p361_p8), %s367_s21, 3 }
  0x26   : > { %s376_s29 = scalar_lea.vmem (!%p361_p8), [#allocation3], %s982_s28  ;;  %s369_s30 = scalar_lea.vmem (!%p361_p8), [#allocation2], %s982_s28 }
  0x27   : > { %s890_s5 = smov (!%p361_p8), 64   ;;  %s383_s8 = scalar_lea.vmem (!%p361_p8), [#allocation4], %s982_s28 }
  0x2a   : > { %v775_v6 = vld [vmem:[%s376_s29] sm:$0xff]  ;;  %v778_v7 = vld [vmem:[%s369_s30] sm:$0xff]   ;;  %s1047_s17 = smov (!%p422_p9, %s880_s17), 1  ;;  %vm454_vm0 = vcmask 523264   ;;  %vm475_vm1 = vcmask 130048  }
  0x2b   : > { %v779_v8 = vunpack.c.l.bf16 %v778_v7  ;;  %v780_v9 = vunpack.c.h.bf16 %v778_v7  ;;  %525 = vrot.lane.b32.xlu0 %v775_v6, %s890_s5  ;;  %s424_s15 = scalar_lea.vmem %s1037_s3, %s1047_s17  ;;  %v459_v13 = vsel %vm454_vm0, %v775_v6, 0  ;;  %v776_v33 = vld [vmem:[%s383_s8] sm:$0xff]  ;;  %s774_s9 = sshll.u32 %s1047_s17, 3 }
  0x2c   : > { %468 = vmatpush.bf16.xpose.msra.mxu0 %v459_v13  ;;  %v833_v17 = vld [vmem:[%s424_s15] ss:$0 sm:$0xff]  ;;  %515 = vmatpush.bf16.msra.mxu1 %v776_v33  ;;  %s432_s12 = scalar_lea.vmem %s1038_s4, %s774_s9 }
  0x2d   : > { %v443_v10 = vmul.f32 0.125, %v779_v8  ;;  %v444_v11 = vmul.f32 0.125, %v780_v9 }
  0x2f   : > { %v445_v12 = vpack.c.bf16 %v444_v11, %v443_v10 }
  0x33   : > { %523 = vrot.lane.b32.xlu0 %v445_v12, %s890_s5  ;;  %764 = vmatmul.msk.bf16.vlgmr.msra.gmra.mxu0 %vm454_vm0, %v445_v12 }
  0x9d   : > { %v526_v14 = vpop.permute.xlu0 %525 }
  0x9e   : > { %v531_v15 = vsel %vm454_vm0, %v526_v14, 0 }
  0x9f   : > { %540 = vmatpush.bf16.xpose.msra.mxu2 %v531_v15 }
  0xa5   : > { %v524_v16 = vpop.permute.xlu0 %523 }
  0xa6   : > { %770 = vmatmul.msk.bf16.vlgmr.msra.gmra.mxu2 %vm454_vm0, %v524_v16 }
  0xb0   : > { %v470_v18 = vpop.f32.mrf.mxu0 }
  0xb1   : > { %v471_v19 = vadd.f32 %v833_v17, %v470_v18 }
  0xb3   : > { %v476_v20 = vsel %vm475_vm1, %v471_v19, -inf }
  0xb4   : > { %477 = vmax.xlane.f32.xlu2 %v476_v20 }
  0xb8   : > { %v472_v21 = vpop.f32.mrf.mxu0 }
  0xb9   : > { %v473_v22 = vadd.f32 %v833_v17, %v472_v21 }
  0xbb   : > { %v479_v23 = vsel %vm475_vm1, %v473_v22, -inf }
  0xbc   : > { %480 = vmax.xlane.f32.xlu2 %v479_v23 }
  0xd4   : > { %570 = vrot.lane.b32.xlu2 %v776_v33, %s890_s5 }
 0x127   : > { %v478_v34 = vpop.xlane.xlu2 %477 }
 0x128   : > { %v482_v38 = vsub.f32 %v471_v19, %v478_v34 }
 0x129   : > { %v542_v24 = vpop.f32.mrf.mxu2 }
 0x12a   : > { %v543_v25 = vadd.f32 %v833_v17, %v542_v24  ;;  %v484_v41 = vmul.f32 1.442695, %v482_v38 }
 0x12c   : > { %v547_v26 = vsel %vm475_vm1, %v543_v25, -inf }
 0x12d   : > { %548 = vmax.xlane.f32.xlu1 %v547_v26 }
 0x12f   : > { %v481_v42 = vpop.xlane.xlu2 %480 }
 0x130   : > { %v483_v44 = vsub.f32 %v473_v22, %v481_v42 }
 0x131   : > { %v544_v27 = vpop.f32.mrf.mxu2 }
 0x132   : > { %v545_v28 = vadd.f32 %v833_v17, %v544_v27  ;;  %v486_v46 = vmul.f32 1.442695, %v483_v44 }
 0x134   : > { %v550_v29 = vsel %vm475_vm1, %v545_v28, -inf }
 0x135   : > { %551 = vmax.xlane.f32.xlu1 %v550_v29 }
 0x137   : > { %v571_v51 = vpop.permute.xlu2 %570 }
 0x138   : > { %583 = vmatpush.bf16.msra.mxu3 %v571_v51 }
 0x1a0   : > { %v549_v30 = vpop.xlane.xlu1 %548 }
 0x1a1   : > { %v553_v31 = vsub.f32 %v543_v25, %v549_v30 }
 0x1a3   : > { %v555_v32 = vmul.f32 1.442695, %v553_v31 }
 0x1a5   : > { %834 = vpow2.f32 %v555_v32 }
 0x1a8   : > { %v552_v35 = vpop.xlane.xlu1 %551 }
 0x1a9   : > { %v554_v36 = vsub.f32 %v545_v28, %v552_v35 }
 0x1ab   : > { %v835_v37 = vpop.eup %834  ;;  %v557_v39 = vmul.f32 1.442695, %v554_v36 }
 0x1ac   : > { %v559_v40 = vsel %vm475_vm1, %v835_v37, 0.0 }
 0x1ad   : > { %836 = vpow2.f32 %v557_v39  ;;  %560 = vadd.xlane.f32.xlu0 %v559_v40 }
 0x1ae   : > { %838 = vpow2.f32 %v484_v41 }
 0x1af   : > { %840 = vpow2.f32 %v486_v46 }
 0x1b3   : > { %v837_v43 = vpop.eup %836 }
 0x1b4   : > { %v562_v45 = vsel %vm475_vm1, %v837_v43, 0.0  ;;  %v839_v47 = vpop.eup %838 }
 0x1b5   : > { %563 = vadd.xlane.f32.xlu1 %v562_v45  ;;  %v488_v48 = vsel %vm475_vm1, %v839_v47, 0.0  ;;  %v841_v49 = vpop.eup %840 }
 0x1b6   : > { %v491_v50 = vsel %vm475_vm1, %v841_v49, 0.0 }
 0x1bd   : > { %489 = vadd.xlane.f32.xlu1 %v488_v48 }
 0x1c5   : > { %492 = vadd.xlane.f32.xlu1 %v491_v50 }
 0x220   : > { %v561_v52 = vpop.xlane.xlu0 %560 }
 0x221   : > { %842 = vrcp.f32 %v561_v52 }
 0x227   : > { %v843_v54 = vpop.eup %842 }
 0x228   : > { %v564_v53 = vpop.xlane.xlu1 %563  ;;  %v567_v57 = vmul.f32 %v843_v54, %v835_v37 }
 0x229   : > { %844 = vrcp.f32 %v564_v53 }
 0x22f   : > { %v845_v55 = vpop.eup %844 }
 0x230   : > { %v490_v56 = vpop.xlane.xlu1 %489  ;;  %v568_v58 = vmul.f32 %v845_v55, %v837_v43 }
 0x231   : > { %846 = vrcp.f32 %v490_v56 }
 0x232   : > { %v569_v59 = vpack.c.bf16 %v568_v58, %v567_v57 }
 0x234   : > { %771 = vmatmul.msk.bf16.vlgmr.msra.gmra.mxu3 %vm475_vm1, %v569_v59 }
 0x237   : > { %v847_v61 = vpop.eup %846 }
 0x238   : > { %v493_v60 = vpop.xlane.xlu1 %492  ;;  %v496_v63 = vmul.f32 %v847_v61, %v839_v47 }
 0x239   : > { %848 = vrcp.f32 %v493_v60 }
 0x23f   : > { %v849_v62 = vpop.eup %848 }
 0x240   : > { %v497_v0 = vmul.f32 %v849_v62, %v841_v49 }
 0x242   : > { %v498_v1 = vpack.c.bf16 %v497_v0, %v496_v63 }
 0x244   : > { %769 = vmatmul.msk.bf16.vlgmr.msra.gmra.mxu1 %vm475_vm1, %v498_v1 }
 0x2b7   : > { %v585_v2 = vpop.f32.mrf.mxu3 }
 0x2bf   : > { %v587_v3 = vpop.f32.mrf.mxu3 }
 0x2c0   : > { %v828_v4 = vpack.i.bf16 %v587_v3, %v585_v2 }
 0x2c1   : > { %v517_v5 = vpop.f32.mrf.mxu1 }
 0x2c2   : > { %829 = vrot.lane.b32.xlu1 %v828_v4, %s890_s5 }
 0x2c9   : > { %v519_v9 = vpop.f32.mrf.mxu1 }
 0x334   : > { %v830_v6 = vpop.permute.xlu1 %829 }
 0x335   : > { %v832_v7 = vunpack.i.h.bf16 %v830_v6  ;;  %v831_v8 = vunpack.i.l.bf16 %v830_v6 }
 0x337   : > { %v599_v10 = vsel %vm454_vm0, %v519_v9, %v832_v7  ;;  %v598_v11 = vsel %vm454_vm0, %v517_v5, %v831_v8 }
 0x338   : > { %v784_v12 = vpack.c.bf16 %v599_v10, %v598_v11 }
 0x33a   : > { %785 = vst [vmem:[%s432_s12] sm:$0xff] %v784_v12  }
 0x33b PF: > { %s14_s19 = sadd.s32 1, %s888_s19   ;;  %s1040_s15 = smov %s876_s16 }
 0x33c   : > { %p11_p10 = scmp.ge.s32.totalorder %s14_s19, 4   ;;  %s1041_s16 = smov %s955_s24 }
 0x33d   : > { %s1042_s17 = smov %s884_s18  ;;  %s1043_s18 = smov %s1045_s20 }
 0x33e   :  { %13 = sbr.rel (!%p11_p10) target bundleno = 3 (0x3), region = 213 }

// kernel: closed_call.18
= control target key start
LH: loop header
LB: loop body
LE: loop exit
PB: predicated region body
PF: predicated region fallthrough
CT: control target
= control target key end

     0   :  { %v380_v29 = vmov 128.0   ;;  %s487_s1 = inlined_call_operand.vmem [shape: bf16[128,128], index: 1, kind: input, shape index: {}]   ;;  %s488_s2 = inlined_call_operand.vmem [shape: f32[1,128], index: 2, kind: input, shape index: {}]   ;;  %s489_s0 = inlined_call_operand.vmem [shape: bf16[32,128], index: 0, kind: input, shape index: {}]   ;;  %s490_s3 = inlined_call_operand.vmem [shape: bf16[32,128], index: 3, kind: input, shape index: {}]   ;;  %s491_s4 = inlined_call_operand.vmem [shape: f32[1,128], index: 4, kind: input, shape index: {}]   ;;  %s492_s5 = inlined_call_operand.vmem [shape: f32[1,128], index: 5, kind: input, shape index: {}]   ;;  %s493_s6 = inlined_call_operand.vmem [shape: bf16[32,128], index: 6, kind: output, shape index: {}]  }
   0x1   :  { %v337_v0 = vld [vmem:[%s487_s1 + $0x38] sm:$0xff]  ;;  %v336_v1 = vld [vmem:[%s487_s1 + $0x30] sm:$0xff]  ;;  %v335_v2 = vld [vmem:[%s487_s1 + $0x28] sm:$0xff]  ;;  %370 = vrcp.f32 %v380_v29 }
   0x2   :  { %103 = vmatpush.bf16.msra.mxu0 %v337_v0  ;;  %358 = vmatpush.bf16.msra.mxu1 %v337_v0  ;;  %v334_v3 = vld [vmem:[%s487_s1 + $0x20] sm:$0xff]  ;;  %v333_v4 = vld [vmem:[%s487_s1 + $0x18] sm:$0xff]  ;;  %v332_v5 = vld [vmem:[%s487_s1 + $0x10] sm:$0xff] }
   0x3   :  { %v331_v6 = vld [vmem:[%s487_s1 + $0x8] sm:$0xff]  ;;  %v330_v7 = vld [vmem:[%s487_s1] sm:$0xff] }
   0x4   :  { %v328_v8 = vld [vmem:[%s489_s0] sm:$0xff]  ;;  %v329_v9 = vld [vmem:[%s489_s0 + $0x8] sm:$0xff] }
   0x5   :  { %v356_v10 = vld [vmem:[%s490_s3 + $0x8] sm:$0xff]   ;;  %v339_v11 = vld [vmem:[%s490_s3] sm:$0xff]  }
   0x6   :  { %104 = vmatpush.bf16.msra.mxu0 %v336_v1  ;;  %359 = vmatpush.bf16.msra.mxu1 %v336_v1  ;;  %v367_v12 = vld [vmem:[%s488_s2] ss:$0 sm:$0xff]  ;;  %v344_v13 = vunpack.c.l.bf16 %v356_v10  ;;  %v340_v14 = vunpack.c.l.bf16 %v339_v11  ;;  %v345_v21 = vunpack.c.h.bf16 %v356_v10  ;;  %v341_v22 = vunpack.c.h.bf16 %v339_v11 }
   0x7   :  { %v371_v30 = vpop.eup %370 }
   0x8   :  { %v182_v31 = vmul.f32 128.0, %v371_v30  ;;  %vm186_vm0 = vweird.f32 %v371_v30 }
   0xa   :  { %105 = vmatpush.bf16.msra.mxu0 %v335_v2  ;;  %360 = vmatpush.bf16.msra.mxu1 %v335_v2  ;;  %v183_v32 = vsub.f32 1.0, %v182_v31 }
   0xc   :  { %v184_v33 = vmul.f32 %v371_v30, %v183_v32 }
   0xe   :  { %106 = vmatpush.bf16.msra.mxu0 %v334_v3  ;;  %361 = vmatpush.bf16.msra.mxu1 %v334_v3  ;;  %v185_v34 = vadd.f32 %v371_v30, %v184_v33 }
  0x10   :  { %v187_v35 = vsel %vm186_vm0, %v371_v30, %v185_v34  ;;  %v369_v30 = vld [vmem:[%s492_s5] ss:$0 sm:$0xff] }
  0x12   :  { %107 = vmatpush.bf16.msra.mxu0 %v333_v4  ;;  %362 = vmatpush.bf16.msra.mxu1 %v333_v4 }
  0x16   :  { %108 = vmatpush.bf16.msra.mxu0 %v332_v5  ;;  %363 = vmatpush.bf16.msra.mxu1 %v332_v5 }
  0x1a   :  { %109 = vmatpush.bf16.msra.mxu0 %v331_v6  ;;  %364 = vmatpush.bf16.msra.mxu1 %v331_v6 }
  0x1e   :  { %110 = vmatpush.bf16.msra.mxu0 %v330_v7  ;;  %365 = vmatpush.bf16.msra.mxu1 %v330_v7 }
  0x21   :  { %111 = vmatmul.bf16.vlgmr.msra.gmra.mxu0 %v328_v8  ;;  %116 = vmatmul.bf16.vlgmr.msra.gmra.mxu1 %v329_v9 }
  0x9e   :  { %v112_v15 = vpop.f32.mrf.mxu0  ;;  %v117_v16 = vpop.f32.mrf.mxu1 }
  0x9f   :  { %v157_v17 = vadd.f32 %v367_v12, %v112_v15  ;;  %v159_v18 = vadd.f32 %v367_v12, %v117_v16 }
  0xa1   :  { %v171_v19 = vadd.f32 %v344_v13, %v159_v18  ;;  %v169_v20 = vadd.f32 %v340_v14, %v157_v17 }
  0xa3   :  { %177 = vadd.xlane.f32.xlu1 %v171_v19  ;;  %173 = vadd.xlane.f32.xlu0 %v169_v20 }
  0xa6   :  { %v114_v23 = vpop.f32.mrf.mxu0  ;;  %v119_v24 = vpop.f32.mrf.mxu1 }
  0xa7   :  { %v158_v25 = vadd.f32 %v367_v12, %v114_v23  ;;  %v160_v26 = vadd.f32 %v367_v12, %v119_v24  ;;  %v368_v23 = vld [vmem:[%s491_s4] ss:$0 sm:$0xff] }
  0xa9   :  { %v172_v27 = vadd.f32 %v345_v21, %v160_v26  ;;  %v170_v28 = vadd.f32 %v341_v22, %v158_v25 }
  0xab   :  { %179 = vadd.xlane.f32.xlu1 %v172_v27  ;;  %175 = vadd.xlane.f32.xlu0 %v170_v28 }
 0x116   :  { %v178_v36 = vpop.xlane.xlu1 %177  ;;  %v174_v37 = vpop.xlane.xlu0 %173 }
 0x117   :  { %v190_v38 = vmul.f32 %v187_v35, %v178_v36  ;;  %v188_v39 = vmul.f32 %v187_v35, %v174_v37 }
 0x119   :  { %v455_v40 = vsub.f32 %v171_v19, %v190_v38  ;;  %v457_v41 = vsub.f32 %v169_v20, %v188_v39 }
 0x11b   :  { %v196_v42 = vmul.f32 %v457_v41, %v457_v41  ;;  %v198_v43 = vmul.f32 %v455_v40, %v455_v40 }
 0x11d   :  { %200 = vadd.xlane.f32.xlu2 %v196_v42  ;;  %204 = vadd.xlane.f32.xlu0 %v198_v43 }
 0x11e   :  { %v180_v44 = vpop.xlane.xlu1 %179  ;;  %v176_v45 = vpop.xlane.xlu0 %175 }
 0x11f   :  { %v191_v46 = vmul.f32 %v187_v35, %v180_v44  ;;  %v189_v47 = vmul.f32 %v187_v35, %v176_v45 }
 0x121   :  { %v463_v48 = vsub.f32 %v172_v27, %v191_v46  ;;  %v465_v49 = vsub.f32 %v170_v28, %v189_v47 }
 0x123   :  { %v199_v50 = vmul.f32 %v463_v48, %v463_v48  ;;  %v197_v51 = vmul.f32 %v465_v49, %v465_v49 }
 0x125   :  { %206 = vadd.xlane.f32.xlu1 %v199_v50  ;;  %202 = vadd.xlane.f32.xlu2 %v197_v51 }
 0x190   :  { %v201_v52 = vpop.xlane.xlu2 %200  ;;  %v205_v53 = vpop.xlane.xlu0 %204 }
 0x191   :  { %v208_v54 = vmul.f32 %v201_v52, %v187_v35  ;;  %v210_v55 = vmul.f32 %v205_v53, %v187_v35 }
 0x193   :  { %v212_v56 = vadd.f32 1e-05, %v208_v54  ;;  %v214_v57 = vadd.f32 1e-05, %v210_v55 }
 0x195   :  { %372 = vrsqrt.f32 %v212_v56  ;;  %vm242_vm3 = vweird.f32 %v214_v57  ;;  %vm222_vm4 = vweird.f32 %v212_v56 }
 0x196   :  { %374 = vrsqrt.f32 %v214_v57 }
 0x198   :  { %v207_v58 = vpop.xlane.xlu1 %206  ;;  %v203_v59 = vpop.xlane.xlu2 %202 }
 0x199   :  { %v211_v60 = vmul.f32 %v207_v58, %v187_v35  ;;  %v209_v61 = vmul.f32 %v203_v59, %v187_v35 }
 0x19b   :  { %v373_v62 = vpop.eup %372  ;;  %v215_v63 = vadd.f32 1e-05, %v211_v60  ;;  %v213_v0 = vadd.f32 1e-05, %v209_v61 }
 0x19c   :  { %v375_v1 = vpop.eup %374  ;;  %v217_v2 = vmul.f32 %v373_v62, %v212_v56  ;;  %vm223_vm2 = vweird.f32 %v373_v62 }
 0x19d   :  { %v237_v3 = vmul.f32 %v375_v1, %v214_v57  ;;  %376 = vrsqrt.f32 %v215_v63  ;;  %vm243_vm1 = vweird.f32 %v375_v1  ;;  %vm224_vm6 = vmor %vm222_vm4, %vm223_vm2  ;;  %vm252_vm9 = vweird.f32 %v215_v63 }
 0x19e   :  { %v218_v4 = vmul.f32 %v373_v62, %v217_v2  ;;  %378 = vrsqrt.f32 %v213_v0  ;;  %vm244_vm5 = vmor %vm242_vm3, %vm243_vm1  ;;  %vm232_vm11 = vweird.f32 %v213_v0 }
 0x19f   :  { %v238_v5 = vmul.f32 %v375_v1, %v237_v3 }
 0x1a0   :  { %v219_v6 = vmul.f32 0.5, %v218_v4 }
 0x1a1   :  { %v239_v7 = vmul.f32 0.5, %v238_v5 }
 0x1a2   :  { %v220_v8 = vsub.f32 1.5, %v219_v6 }
 0x1a3   :  { %v377_v9 = vpop.eup %376  ;;  %v240_v10 = vsub.f32 1.5, %v239_v7 }
 0x1a4   :  { %v379_v11 = vpop.eup %378  ;;  %v247_v12 = vmul.f32 %v377_v9, %v215_v63  ;;  %v221_v13 = vmul.f32 %v373_v62, %v220_v8  ;;  %vm253_vm7 = vweird.f32 %v377_v9 }
 0x1a5   :  { %v241_v14 = vmul.f32 %v375_v1, %v240_v10  ;;  %v227_v15 = vmul.f32 %v379_v11, %v213_v0  ;;  %vm233_vm8 = vweird.f32 %v379_v11  ;;  %vm254_vm10 = vmor %vm252_vm9, %vm253_vm7 }
 0x1a6   :  { %v248_v16 = vmul.f32 %v377_v9, %v247_v12  ;;  %v225_v20 = vsel %vm224_vm6, %v373_v62, %v221_v13  ;;  %vm234_vm12 = vmor %vm232_vm11, %vm233_vm8 }
 0x1a7   :  { %v228_v17 = vmul.f32 %v379_v11, %v227_v15  ;;  %v245_v18 = vsel %vm244_vm5, %v375_v1, %v241_v14  ;;  %v256_v26 = vmul.f32 %v225_v20, %v457_v41 }
 0x1a8   :  { %v249_v19 = vmul.f32 0.5, %v248_v16  ;;  %v258_v24 = vmul.f32 %v245_v18, %v455_v40 }
 0x1a9   :  { %v229_v21 = vmul.f32 0.5, %v228_v17  ;;  %v264_v34 = vmul.f32 %v368_v23, %v256_v26 }
 0x1aa   :  { %v250_v22 = vsub.f32 1.5, %v249_v19  ;;  %v266_v31 = vmul.f32 %v368_v23, %v258_v24 }
 0x1ab   :  { %v230_v25 = vsub.f32 1.5, %v229_v21  ;;  %v272_v40 = vadd.f32 %v369_v30, %v264_v34 }
 0x1ac   :  { %v251_v27 = vmul.f32 %v377_v9, %v250_v22  ;;  %v274_v38 = vadd.f32 %v369_v30, %v266_v31 }
 0x1ad   :  { %v231_v28 = vmul.f32 %v379_v11, %v230_v25 }
 0x1ae   :  { %v255_v29 = vsel %vm254_vm10, %v377_v9, %v251_v27 }
 0x1af   :  { %v259_v32 = vmul.f32 %v255_v29, %v463_v48  ;;  %v235_v33 = vsel %vm234_vm12, %v379_v11, %v231_v28 }
 0x1b0   :  { %v257_v35 = vmul.f32 %v235_v33, %v465_v49 }
 0x1b1   :  { %v267_v36 = vmul.f32 %v368_v23, %v259_v32 }
 0x1b2   :  { %v265_v37 = vmul.f32 %v368_v23, %v257_v35 }
 0x1b3   :  { %v275_v39 = vadd.f32 %v369_v30, %v267_v36 }
 0x1b4   :  { %v273_v41 = vadd.f32 %v369_v30, %v265_v37 }
 0x1b5   :  { %v354_v42 = vpack.c.bf16 %v275_v39, %v274_v38 }
 0x1b6   :  { %v349_v43 = vpack.c.bf16 %v273_v41, %v272_v40 }
 0x1b7   :  { %357 = vst [vmem:[%s493_s6 + $0x8] sm:$0xff] %v354_v42  }
 0x1b8   :  { %350 = vst [vmem:[%s493_s6] sm:$0xff] %v349_v43  }

// kernel: closed_call.16
= control target key start
LH: loop header
LB: loop body
LE: loop exit
PB: predicated region body
PF: predicated region fallthrough
CT: control target
= control target key end

     0   :  { %s693_s1 = inlined_call_operand.vmem [shape: bf16[128,384], index: 1, kind: input, shape index: {}]   ;;  %s694_s0 = inlined_call_operand.vmem [shape: bf16[32,128], index: 0, kind: input, shape index: {}]   ;;  %s695_s2 = inlined_call_operand.vmem [shape: f32[1,384], index: 2, kind: input, shape index: {}]   ;;  %s696_s3 = inlined_call_operand.vmem [shape: bf16[32,384], index: 3, kind: output, shape index: {}]  }
   0x1   :  { %v452_v0 = vld [vmem:[%s693_s1 + $0xa8] sm:$0xf]  ;;  %v486_v1 = vld [vmem:[%s693_s1 + $0xb0] sm:$0xf0]  ;;  %v485_v2 = vld [vmem:[%s693_s1 + $0xac] sm:$0xf] }
   0x2   :  { %v453_v3 = vor.u32 %v486_v1, %v452_v0  ;;  %v454_v4 = vld [vmem:[%s693_s1 + $0xb4] sm:$0xf0]  ;;  %v460_v5 = vld [vmem:[%s693_s1 + $0xb0] sm:$0xf]  ;;  %v487_v6 = vld [vmem:[%s693_s1 + $0xb8] sm:$0xf0] }
   0x3   :  { %v457_v7 = vor.u32 %v485_v2, %v454_v4  ;;  %v461_v8 = vor.u32 %v487_v6, %v460_v5  ;;  %v440_v9 = vld [vmem:[%s693_s1 + $0x90] sm:$0xf]  ;;  %v483_v10 = vld [vmem:[%s693_s1 + $0x98] sm:$0xf0]  ;;  %v482_v11 = vld [vmem:[%s693_s1 + $0x94] sm:$0xf] }
   0x4   :  { %190 = vmatpush.bf16.msra.mxu0 %v453_v3  ;;  %v441_v12 = vor.u32 %v483_v10, %v440_v9  ;;  %v442_v13 = vld [vmem:[%s693_s1 + $0x9c] sm:$0xf0]  ;;  %v448_v14 = vld [vmem:[%s693_s1 + $0x98] sm:$0xf]  ;;  %v484_v15 = vld [vmem:[%s693_s1 + $0xa0] sm:$0xf0]  ;;  %488 = vmatpush.bf16.msra.mxu3 %v453_v3 }
   0x5   :  { %209 = vmatpush.bf16.msra.mxu1 %v457_v7  ;;  %228 = vmatpush.bf16.msra.mxu2 %v461_v8  ;;  %v445_v16 = vor.u32 %v482_v11, %v442_v13  ;;  %v449_v17 = vor.u32 %v484_v15, %v448_v14  ;;  %v428_v18 = vld [vmem:[%s693_s1 + $0x78] sm:$0xf]  ;;  %v480_v19 = vld [vmem:[%s693_s1 + $0x80] sm:$0xf0]  ;;  %v479_v20 = vld [vmem:[%s693_s1 + $0x7c] sm:$0xf] }
   0x6   :  { %v430_v21 = vld [vmem:[%s693_s1 + $0x84] sm:$0xf0]  ;;  %v436_v22 = vld [vmem:[%s693_s1 + $0x80] sm:$0xf]  ;;  %v481_v23 = vld [vmem:[%s693_s1 + $0x88] sm:$0xf0]  ;;  %v429_v24 = vor.u32 %v480_v19, %v428_v18 }
   0x7   :  { %v433_v25 = vor.u32 %v479_v20, %v430_v21  ;;  %v437_v26 = vor.u32 %v481_v23, %v436_v22  ;;  %v416_v27 = vld [vmem:[%s693_s1 + $0x60] sm:$0xf]  ;;  %v477_v28 = vld [vmem:[%s693_s1 + $0x68] sm:$0xf0]  ;;  %v476_v29 = vld [vmem:[%s693_s1 + $0x64] sm:$0xf] }
   0x8   :  { %191 = vmatpush.bf16.msra.mxu0 %v441_v12  ;;  %489 = vmatpush.bf16.msra.mxu3 %v441_v12  ;;  %v418_v30 = vld [vmem:[%s693_s1 + $0x6c] sm:$0xf0]  ;;  %v424_v31 = vld [vmem:[%s693_s1 + $0x68] sm:$0xf]  ;;  %v478_v32 = vld [vmem:[%s693_s1 + $0x70] sm:$0xf0]  ;;  %v417_v33 = vor.u32 %v477_v28, %v416_v27 }
   0x9   :  { %210 = vmatpush.bf16.msra.mxu1 %v445_v16  ;;  %229 = vmatpush.bf16.msra.mxu2 %v449_v17  ;;  %v421_v34 = vor.u32 %v476_v29, %v418_v30  ;;  %v425_v35 = vor.u32 %v478_v32, %v424_v31  ;;  %v404_v36 = vld [vmem:[%s693_s1 + $0x48] sm:$0xf]  ;;  %v474_v37 = vld [vmem:[%s693_s1 + $0x50] sm:$0xf0]  ;;  %v473_v38 = vld [vmem:[%s693_s1 + $0x4c] sm:$0xf] }
   0xa   :  { %v406_v39 = vld [vmem:[%s693_s1 + $0x54] sm:$0xf0]  ;;  %v412_v40 = vld [vmem:[%s693_s1 + $0x50] sm:$0xf]  ;;  %v475_v41 = vld [vmem:[%s693_s1 + $0x58] sm:$0xf0]  ;;  %v405_v42 = vor.u32 %v474_v37, %v404_v36 }
   0xb   :  { %v409_v43 = vor.u32 %v473_v38, %v406_v39  ;;  %v413_v44 = vor.u32 %v475_v41, %v412_v40  ;;  %v392_v45 = vld [vmem:[%s693_s1 + $0x30] sm:$0xf]  ;;  %v471_v46 = vld [vmem:[%s693_s1 + $0x38] sm:$0xf0]  ;;  %v470_v47 = vld [vmem:[%s693_s1 + $0x34] sm:$0xf] }
   0xc   :  { %192 = vmatpush.bf16.msra.mxu0 %v429_v24  ;;  %490 = vmatpush.bf16.msra.mxu3 %v429_v24  ;;  %v394_v48 = vld [vmem:[%s693_s1 + $0x3c] sm:$0xf0]  ;;  %v400_v49 = vld [vmem:[%s693_s1 + $0x38] sm:$0xf]  ;;  %v472_v50 = vld [vmem:[%s693_s1 + $0x40] sm:$0xf0]  ;;  %v393_v51 = vor.u32 %v471_v46, %v392_v45 }
   0xd   :  { %211 = vmatpush.bf16.msra.mxu1 %v433_v25  ;;  %230 = vmatpush.bf16.msra.mxu2 %v437_v26  ;;  %v397_v52 = vor.u32 %v470_v47, %v394_v48  ;;  %v401_v53 = vor.u32 %v472_v50, %v400_v49  ;;  %v380_v54 = vld [vmem:[%s693_s1 + $0x18] sm:$0xf]  ;;  %v468_v55 = vld [vmem:[%s693_s1 + $0x20] sm:$0xf0]  ;;  %v467_v56 = vld [vmem:[%s693_s1 + $0x1c] sm:$0xf] }
   0xe   :  { %v382_v57 = vld [vmem:[%s693_s1 + $0x24] sm:$0xf0]  ;;  %v388_v58 = vld [vmem:[%s693_s1 + $0x20] sm:$0xf]  ;;  %v469_v59 = vld [vmem:[%s693_s1 + $0x28] sm:$0xf0]  ;;  %v381_v60 = vor.u32 %v468_v55, %v380_v54 }
   0xf   :  { %v385_v61 = vor.u32 %v467_v56, %v382_v57  ;;  %v389_v62 = vor.u32 %v469_v59, %v388_v58  ;;  %v368_v63 = vld [vmem:[%s693_s1] sm:$0xf]  ;;  %v465_v0 = vld [vmem:[%s693_s1 + $0x8] sm:$0xf0]  ;;  %v464_v1 = vld [vmem:[%s693_s1 + $0x4] sm:$0xf] }
  0x10   :  { %193 = vmatpush.bf16.msra.mxu0 %v417_v33  ;;  %491 = vmatpush.bf16.msra.mxu3 %v417_v33  ;;  %v370_v2 = vld [vmem:[%s693_s1 + $0xc] sm:$0xf0]  ;;  %v376_v3 = vld [vmem:[%s693_s1 + $0x8] sm:$0xf]  ;;  %v466_v4 = vld [vmem:[%s693_s1 + $0x10] sm:$0xf0]  ;;  %v369_v5 = vor.u32 %v465_v0, %v368_v63 }
  0x11   :  { %212 = vmatpush.bf16.msra.mxu1 %v421_v34  ;;  %231 = vmatpush.bf16.msra.mxu2 %v425_v35  ;;  %v373_v6 = vor.u32 %v464_v1, %v370_v2  ;;  %v377_v7 = vor.u32 %v466_v4, %v376_v3  ;;  %v462_v8 = vld [vmem:[%s694_s0] sm:$0xff]  ;;  %v463_v9 = vld [vmem:[%s694_s0 + $0x8] sm:$0xff] }
  0x12   :  { %v318_v10 = vld [vmem:[%s695_s2] sm:$0x7] }
  0x13   :  { %v320_v11 = vperm.slane %v318_v10, 0  ;;  %v321_v12 = vperm.slane %v318_v10, 1  ;;  %v322_v18 = vperm.slane %v318_v10, 2 }
  0x14   :  { %194 = vmatpush.bf16.msra.mxu0 %v405_v42  ;;  %492 = vmatpush.bf16.msra.mxu3 %v405_v42 }
  0x15   :  { %213 = vmatpush.bf16.msra.mxu1 %v409_v43  ;;  %232 = vmatpush.bf16.msra.mxu2 %v413_v44 }
  0x18   :  { %195 = vmatpush.bf16.msra.mxu0 %v393_v51  ;;  %493 = vmatpush.bf16.msra.mxu3 %v393_v51 }
  0x19   :  { %214 = vmatpush.bf16.msra.mxu1 %v397_v52  ;;  %233 = vmatpush.bf16.msra.mxu2 %v401_v53 }
  0x1c   :  { %196 = vmatpush.bf16.msra.mxu0 %v381_v60  ;;  %494 = vmatpush.bf16.msra.mxu3 %v381_v60 }
  0x1d   :  { %215 = vmatpush.bf16.msra.mxu1 %v385_v61  ;;  %234 = vmatpush.bf16.msra.mxu2 %v389_v62 }
  0x20   :  { %197 = vmatpush.bf16.msra.mxu0 %v369_v5  ;;  %495 = vmatpush.bf16.msra.mxu3 %v369_v5 }
  0x21   :  { %216 = vmatpush.bf16.msra.mxu1 %v373_v6  ;;  %235 = vmatpush.bf16.msra.mxu2 %v377_v7 }
  0x23   :  { %198 = vmatmul.bf16.vlgmr.msra.gmra.mxu0 %v462_v8  ;;  %203 = vmatmul.bf16.vlgmr.msra.gmra.mxu3 %v463_v9 }
  0x24   :  { %217 = vmatmul.bf16.vlgmr.msra.gmra.mxu1 %v462_v8  ;;  %236 = vmatmul.bf16.vlgmr.msra.gmra.mxu2 %v462_v8 }
  0x34   :  { %222 = vmatmul.bf16.gmra.mxu1 %v463_v9  ;;  %241 = vmatmul.bf16.gmra.mxu2 %v463_v9 }
  0xa0   :  { %v199_v13 = vpop.f32.mrf.mxu0 }
  0xa1   :  { %v326_v14 = vadd.f32 %v320_v11, %v199_v13  ;;  %v218_v15 = vpop.f32.mrf.mxu1 }
  0xa2   :  { %v327_v16 = vadd.f32 %v321_v12, %v218_v15 }
  0xa4   :  { %v338_v17 = vpack.c.bf16 %v327_v16, %v326_v14 }
  0xa6   :  { %346 = vst [vmem:[%s696_s3] sm:$0xff] %v338_v17  ;;  %v204_v27 = vpop.f32.mrf.mxu3 }
  0xa7   :  { %v237_v19 = vpop.f32.mrf.mxu2  ;;  %v332_v29 = vadd.f32 %v320_v11, %v204_v27 }
  0xa8   :  { %v328_v20 = vadd.f32 %v322_v18, %v237_v19  ;;  %v201_v21 = vpop.f32.mrf.mxu0 }
  0xa9   :  { %v329_v22 = vadd.f32 %v320_v11, %v201_v21  ;;  %v220_v23 = vpop.f32.mrf.mxu1 }
  0xaa   :  { %v339_v24 = vpack.c.bf16 %v328_v20, %v328_v20  ;;  %v330_v25 = vadd.f32 %v321_v12, %v220_v23 }
  0xac   :  { %347 = vst [vmem:[%s696_s3 + $0x8] sm:$0xf] %v339_v24  ;;  %v340_v26 = vpack.c.bf16 %v330_v25, %v329_v22 }
  0xae   :  { %348 = vst [vmem:[%s696_s3 + $0xc] sm:$0xff] %v340_v26  ;;  %v206_v35 = vpop.f32.mrf.mxu3 }
  0xaf   :  { %v239_v28 = vpop.f32.mrf.mxu2  ;;  %v335_v39 = vadd.f32 %v320_v11, %v206_v35 }
  0xb0   :  { %v331_v30 = vadd.f32 %v322_v18, %v239_v28 }
  0xb1   :  { %v223_v31 = vpop.f32.mrf.mxu1 }
  0xb2   :  { %v341_v32 = vpack.c.bf16 %v331_v30, %v331_v30  ;;  %v333_v33 = vadd.f32 %v321_v12, %v223_v31 }
  0xb4   :  { %349 = vst [vmem:[%s696_s3 + $0x14] sm:$0xf] %v341_v32  ;;  %v342_v34 = vpack.c.bf16 %v333_v33, %v332_v29 }
  0xb6   :  { %350 = vst [vmem:[%s696_s3 + $0x18] sm:$0xff] %v342_v34 }
  0xb7   :  { %v242_v36 = vpop.f32.mrf.mxu2 }
  0xb8   :  { %v334_v37 = vadd.f32 %v322_v18, %v242_v36 }
  0xb9   :  { %v225_v38 = vpop.f32.mrf.mxu1 }
  0xba   :  { %v343_v40 = vpack.c.bf16 %v334_v37, %v334_v37  ;;  %v336_v41 = vadd.f32 %v321_v12, %v225_v38 }
  0xbc   :  { %351 = vst [vmem:[%s696_s3 + $0x20] sm:$0xf] %v343_v40  ;;  %v344_v42 = vpack.c.bf16 %v336_v41, %v335_v39 }
  0xbe   :  { %352 = vst [vmem:[%s696_s3 + $0x24] sm:$0xff] %v344_v42 }
  0xbf   :  { %v244_v43 = vpop.f32.mrf.mxu2 }
  0xc0   :  { %v337_v44 = vadd.f32 %v322_v18, %v244_v43 }
  0xc2   :  { %v345_v45 = vpack.c.bf16 %v337_v44, %v337_v44 }
  0xc4   :  { %353 = vst [vmem:[%s696_s3 + $0x2c] sm:$0xf] %v345_v45 }

// kernel: closed_call.19
= control target key start
LH: loop header
LB: loop body
LE: loop exit
PB: predicated region body
PF: predicated region fallthrough
CT: control target
= control target key end

     0   :  { %s2128_s1 = inlined_call_operand.vmem [shape: bf16[128,512], index: 1, kind: input, shape index: {}]   ;;  %s2129_s0 = inlined_call_operand.vmem [shape: bf16[32,128], index: 0, kind: input, shape index: {}]   ;;  %s2130_s2 = inlined_call_operand.vmem [shape: f32[1,512], index: 2, kind: input, shape index: {}]   ;;  %s2131_s3 = inlined_call_operand.vmem [shape: bf16[32,512], index: 3, kind: output, shape index: {}]  }
   0x1   :  { %v1261_v0 = vld [vmem:[%s2128_s1 + $0xe0] sm:$0xf]  ;;  %v1323_v1 = vld [vmem:[%s2128_s1 + $0xec] sm:$0xf0]  ;;  %v1321_v2 = vld [vmem:[%s2128_s1 + $0xe4] sm:$0xf] }
   0x2   :  { %v1262_v3 = vor.u32 %v1323_v1, %v1261_v0  ;;  %v1263_v4 = vld [vmem:[%s2128_s1 + $0xf0] sm:$0xf0]  ;;  %v1269_v5 = vld [vmem:[%s2128_s1 + $0xe8] sm:$0xf]  ;;  %v1324_v6 = vld [vmem:[%s2128_s1 + $0xf4] sm:$0xf0] }
   0x3   :  { %v1266_v7 = vor.u32 %v1321_v2, %v1263_v4  ;;  %v1270_v8 = vor.u32 %v1324_v6, %v1269_v5  ;;  %v1322_v9 = vld [vmem:[%s2128_s1 + $0xec] sm:$0xf]  ;;  %v1271_v10 = vld [vmem:[%s2128_s1 + $0xf8] sm:$0xf0]  ;;  %v1245_v11 = vld [vmem:[%s2128_s1 + $0xc0] sm:$0xf] }
   0x4   :  { %222 = vmatpush.bf16.msra.mxu0 %v1262_v3  ;;  %v1274_v12 = vor.u32 %v1322_v9, %v1271_v10  ;;  %v1319_v13 = vld [vmem:[%s2128_s1 + $0xcc] sm:$0xf0]  ;;  %v1317_v14 = vld [vmem:[%s2128_s1 + $0xc4] sm:$0xf]  ;;  %v1247_v15 = vld [vmem:[%s2128_s1 + $0xd0] sm:$0xf0] }
   0x5   :  { %241 = vmatpush.bf16.msra.mxu1 %v1266_v7  ;;  %260 = vmatpush.bf16.msra.mxu2 %v1270_v8  ;;  %v1246_v16 = vor.u32 %v1319_v13, %v1245_v11  ;;  %v1250_v17 = vor.u32 %v1317_v14, %v1247_v15  ;;  %v1253_v18 = vld [vmem:[%s2128_s1 + $0xc8] sm:$0xf]  ;;  %v1320_v19 = vld [vmem:[%s2128_s1 + $0xd4] sm:$0xf0]  ;;  %v1318_v20 = vld [vmem:[%s2128_s1 + $0xcc] sm:$0xf] }
   0x6   :  { %279 = vmatpush.bf16.msra.mxu3 %v1274_v12  ;;  %v1254_v21 = vor.u32 %v1320_v19, %v1253_v18  ;;  %v1255_v22 = vld [vmem:[%s2128_s1 + $0xd8] sm:$0xf0]  ;;  %v1229_v23 = vld [vmem:[%s2128_s1 + $0xa0] sm:$0xf]  ;;  %v1315_v24 = vld [vmem:[%s2128_s1 + $0xac] sm:$0xf0] }
   0x7   :  { %v1258_v25 = vor.u32 %v1318_v20, %v1255_v22  ;;  %v1313_v26 = vld [vmem:[%s2128_s1 + $0xa4] sm:$0xf]  ;;  %v1231_v27 = vld [vmem:[%s2128_s1 + $0xb0] sm:$0xf0]  ;;  %v1237_v28 = vld [vmem:[%s2128_s1 + $0xa8] sm:$0xf]  ;;  %v1230_v29 = vor.u32 %v1315_v24, %v1229_v23 }
   0x8   :  { %223 = vmatpush.bf16.msra.mxu0 %v1246_v16  ;;  %v1316_v30 = vld [vmem:[%s2128_s1 + $0xb4] sm:$0xf0]  ;;  %v1314_v31 = vld [vmem:[%s2128_s1 + $0xac] sm:$0xf]  ;;  %v1239_v32 = vld [vmem:[%s2128_s1 + $0xb8] sm:$0xf0]  ;;  %v1234_v33 = vor.u32 %v1313_v26, %v1231_v27 }
   0x9   :  { %242 = vmatpush.bf16.msra.mxu1 %v1250_v17  ;;  %261 = vmatpush.bf16.msra.mxu2 %v1254_v21  ;;  %v1238_v34 = vor.u32 %v1316_v30, %v1237_v28  ;;  %v1213_v35 = vld [vmem:[%s2128_s1 + $0x80] sm:$0xf]  ;;  %v1311_v36 = vld [vmem:[%s2128_s1 + $0x8c] sm:$0xf0]  ;;  %v1309_v37 = vld [vmem:[%s2128_s1 + $0x84] sm:$0xf]  ;;  %v1242_v38 = vor.u32 %v1314_v31, %v1239_v32 }
   0xa   :  { %280 = vmatpush.bf16.msra.mxu3 %v1258_v25  ;;  %v1215_v39 = vld [vmem:[%s2128_s1 + $0x90] sm:$0xf0]  ;;  %v1221_v40 = vld [vmem:[%s2128_s1 + $0x88] sm:$0xf]  ;;  %v1312_v41 = vld [vmem:[%s2128_s1 + $0x94] sm:$0xf0]  ;;  %v1214_v44 = vor.u32 %v1311_v36, %v1213_v35 }
   0xb   :  { %v1310_v42 = vld [vmem:[%s2128_s1 + $0x8c] sm:$0xf]  ;;  %v1223_v43 = vld [vmem:[%s2128_s1 + $0x98] sm:$0xf0]  ;;  %v1218_v45 = vor.u32 %v1309_v37, %v1215_v39  ;;  %v1222_v46 = vor.u32 %v1312_v41, %v1221_v40  ;;  %v1197_v47 = vld [vmem:[%s2128_s1 + $0x60] sm:$0xf] }
   0xc   :  { %224 = vmatpush.bf16.msra.mxu0 %v1230_v29  ;;  %v1307_v48 = vld [vmem:[%s2128_s1 + $0x6c] sm:$0xf0]  ;;  %v1305_v49 = vld [vmem:[%s2128_s1 + $0x64] sm:$0xf]  ;;  %v1226_v50 = vor.u32 %v1310_v42, %v1223_v43  ;;  %v1199_v51 = vld [vmem:[%s2128_s1 + $0x70] sm:$0xf0] }
   0xd   :  { %243 = vmatpush.bf16.msra.mxu1 %v1234_v33  ;;  %262 = vmatpush.bf16.msra.mxu2 %v1238_v34  ;;  %v1205_v52 = vld [vmem:[%s2128_s1 + $0x68] sm:$0xf]  ;;  %v1308_v53 = vld [vmem:[%s2128_s1 + $0x74] sm:$0xf0]  ;;  %v1306_v54 = vld [vmem:[%s2128_s1 + $0x6c] sm:$0xf]  ;;  %v1198_v56 = vor.u32 %v1307_v48, %v1197_v47  ;;  %v1202_v57 = vor.u32 %v1305_v49, %v1199_v51 }
   0xe   :  { %281 = vmatpush.bf16.msra.mxu3 %v1242_v38  ;;  %v1207_v55 = vld [vmem:[%s2128_s1 + $0x78] sm:$0xf0]  ;;  %v1206_v58 = vor.u32 %v1308_v53, %v1205_v52  ;;  %v1181_v59 = vld [vmem:[%s2128_s1 + $0x40] sm:$0xf]  ;;  %v1303_v60 = vld [vmem:[%s2128_s1 + $0x4c] sm:$0xf0] }
   0xf   :  { %v1301_v61 = vld [vmem:[%s2128_s1 + $0x44] sm:$0xf]  ;;  %v1210_v62 = vor.u32 %v1306_v54, %v1207_v55  ;;  %v1183_v63 = vld [vmem:[%s2128_s1 + $0x50] sm:$0xf0]  ;;  %v1189_v0 = vld [vmem:[%s2128_s1 + $0x48] sm:$0xf]  ;;  %v1182_v4 = vor.u32 %v1303_v60, %v1181_v59 }
  0x10   :  { %225 = vmatpush.bf16.msra.mxu0 %v1214_v44  ;;  %v1304_v1 = vld [vmem:[%s2128_s1 + $0x54] sm:$0xf0]  ;;  %v1302_v2 = vld [vmem:[%s2128_s1 + $0x4c] sm:$0xf]  ;;  %v1191_v3 = vld [vmem:[%s2128_s1 + $0x58] sm:$0xf0]  ;;  %v1186_v5 = vor.u32 %v1301_v61, %v1183_v63 }
  0x11   :  { %244 = vmatpush.bf16.msra.mxu1 %v1218_v45  ;;  %263 = vmatpush.bf16.msra.mxu2 %v1222_v46  ;;  %v1190_v6 = vor.u32 %v1304_v1, %v1189_v0  ;;  %v1165_v7 = vld [vmem:[%s2128_s1 + $0x20] sm:$0xf]  ;;  %v1299_v8 = vld [vmem:[%s2128_s1 + $0x2c] sm:$0xf0]  ;;  %v1297_v9 = vld [vmem:[%s2128_s1 + $0x24] sm:$0xf]  ;;  %v1194_v10 = vor.u32 %v1302_v2, %v1191_v3 }
  0x12   :  { %282 = vmatpush.bf16.msra.mxu3 %v1226_v50  ;;  %v1167_v11 = vld [vmem:[%s2128_s1 + $0x30] sm:$0xf0]  ;;  %v1173_v12 = vld [vmem:[%s2128_s1 + $0x28] sm:$0xf]  ;;  %v1300_v13 = vld [vmem:[%s2128_s1 + $0x34] sm:$0xf0]  ;;  %v1166_v16 = vor.u32 %v1299_v8, %v1165_v7 }
  0x13   :  { %v1298_v14 = vld [vmem:[%s2128_s1 + $0x2c] sm:$0xf]  ;;  %v1175_v15 = vld [vmem:[%s2128_s1 + $0x38] sm:$0xf0]  ;;  %v1170_v17 = vor.u32 %v1297_v9, %v1167_v11  ;;  %v1174_v18 = vor.u32 %v1300_v13, %v1173_v12  ;;  %v1149_v19 = vld [vmem:[%s2128_s1] sm:$0xf] }
  0x14   :  { %226 = vmatpush.bf16.msra.mxu0 %v1198_v56  ;;  %v1295_v20 = vld [vmem:[%s2128_s1 + $0xc] sm:$0xf0]  ;;  %v1293_v21 = vld [vmem:[%s2128_s1 + $0x4] sm:$0xf]  ;;  %v1178_v22 = vor.u32 %v1298_v14, %v1175_v15  ;;  %v1151_v23 = vld [vmem:[%s2128_s1 + $0x10] sm:$0xf0] }
  0x15   :  { %245 = vmatpush.bf16.msra.mxu1 %v1202_v57  ;;  %264 = vmatpush.bf16.msra.mxu2 %v1206_v58  ;;  %v1157_v24 = vld [vmem:[%s2128_s1 + $0x8] sm:$0xf]  ;;  %v1296_v25 = vld [vmem:[%s2128_s1 + $0x14] sm:$0xf0]  ;;  %v1294_v26 = vld [vmem:[%s2128_s1 + $0xc] sm:$0xf]  ;;  %v1150_v28 = vor.u32 %v1295_v20, %v1149_v19  ;;  %v1154_v29 = vor.u32 %v1293_v21, %v1151_v23 }
  0x16   :  { %283 = vmatpush.bf16.msra.mxu3 %v1210_v62  ;;  %v1159_v27 = vld [vmem:[%s2128_s1 + $0x18] sm:$0xf0]  ;;  %v1158_v30 = vor.u32 %v1296_v25, %v1157_v24  ;;  %v1291_v32 = vld [vmem:[%s2129_s0] sm:$0xff]  ;;  %v1292_v33 = vld [vmem:[%s2129_s0 + $0x8] sm:$0xff] }
  0x17   :  { %v1162_v31 = vor.u32 %v1294_v26, %v1159_v27  ;;  %v389_v34 = vld [vmem:[%s2130_s2] sm:$0xf] }
  0x18   :  { %227 = vmatpush.bf16.msra.mxu0 %v1182_v4  ;;  %v1578_v35 = vperm.slane %v389_v34, 0  ;;  %v1580_v36 = vperm.slane %v389_v34, 1  ;;  %v1594_v43 = vperm.slane %v389_v34, 2  ;;  %v1598_v45 = vperm.slane %v389_v34, 3 }
  0x19   :  { %246 = vmatpush.bf16.msra.mxu1 %v1186_v5  ;;  %265 = vmatpush.bf16.msra.mxu2 %v1190_v6 }
  0x1a   :  { %284 = vmatpush.bf16.msra.mxu3 %v1194_v10 }
  0x1c   :  { %228 = vmatpush.bf16.msra.mxu0 %v1166_v16 }
  0x1d   :  { %247 = vmatpush.bf16.msra.mxu1 %v1170_v17  ;;  %266 = vmatpush.bf16.msra.mxu2 %v1174_v18 }
  0x1e   :  { %285 = vmatpush.bf16.msra.mxu3 %v1178_v22 }
  0x20   :  { %229 = vmatpush.bf16.msra.mxu0 %v1150_v28 }
  0x21   :  { %248 = vmatpush.bf16.msra.mxu1 %v1154_v29  ;;  %267 = vmatpush.bf16.msra.mxu2 %v1158_v30 }
  0x22   :  { %286 = vmatpush.bf16.msra.mxu3 %v1162_v31 }
  0x23   :  { %230 = vmatmul.bf16.vlgmr.msra.gmra.mxu0 %v1291_v32 }
  0x24   :  { %249 = vmatmul.bf16.vlgmr.msra.gmra.mxu1 %v1291_v32  ;;  %268 = vmatmul.bf16.vlgmr.msra.gmra.mxu2 %v1291_v32 }
  0x25   :  { %287 = vmatmul.bf16.vlgmr.msra.gmra.mxu3 %v1291_v32 }
  0x33   :  { %235 = vmatmul.bf16.gmra.mxu0 %v1292_v33 }
  0x34   :  { %254 = vmatmul.bf16.gmra.mxu1 %v1292_v33  ;;  %273 = vmatmul.bf16.gmra.mxu2 %v1292_v33 }
  0x35   :  { %292 = vmatmul.bf16.gmra.mxu3 %v1292_v33 }
  0xa0   :  { %v231_v37 = vpop.f32.mrf.mxu0 }
  0xa1   :  { %v1583_v38 = vadd.f32 %v1578_v35, %v231_v37  ;;  %v250_v39 = vpop.f32.mrf.mxu1 }
  0xa2   :  { %v1586_v40 = vadd.f32 %v1580_v36, %v250_v39 }
  0xa3   :  { %v1589_v41 = vmul.f32 0.70710677, %v1583_v38 }
  0xa4   :  { %v1592_v42 = vmul.f32 0.70710677, %v1586_v40 }
  0xa5   :  { %v447_v44 = vmul.f32 %v1589_v41, %v1589_v41 }
  0xa6   :  { %v487_v46 = vmul.f32 %v1592_v42, %v1592_v42 }
  0xa7   :  { %v448_v47 = vmin.f32 %v447_v44, 16.0  ;;  %v269_v48 = vpop.f32.mrf.mxu2 }
  0xa8   :  { %v1602_v49 = vmin.f32 %v487_v46, 16.0  ;;  %v1605_v50 = vadd.f32 %v1594_v43, %v269_v48  ;;  %v288_v51 = vpop.f32.mrf.mxu3  ;;  %v233_v55 = vpop.f32.mrf.mxu0 }
  0xa9   :  { %v449_v52 = vmul.f32 2.1237322e-06, %v448_v47  ;;  %v460_v53 = vmul.f32 3.8918573e-05, %v448_v47  ;;  %v1608_v54 = vadd.f32 %v1598_v45, %v288_v51  ;;  %v252_v61 = vpop.f32.mrf.mxu1  ;;  %v1616_v0 = vadd.f32 %v1578_v35, %v233_v55 }
  0xaa   :  { %v489_v56 = vmul.f32 2.1237322e-06, %v1602_v49  ;;  %v500_v57 = vmul.f32 3.8918573e-05, %v1602_v49  ;;  %v1613_v60 = vmul.f32 0.70710677, %v1605_v50  ;;  %v1626_v7 = vadd.f32 %v1580_v36, %v252_v61 }
  0xab   :  { %v450_v58 = vadd.f32 0.00028619796, %v449_v52  ;;  %v461_v59 = vadd.f32 0.001143296, %v460_v53  ;;  %v1621_v4 = vmul.f32 0.70710677, %v1608_v54 }
  0xac   :  { %v490_v62 = vadd.f32 0.00028619796, %v489_v56  ;;  %v501_v63 = vadd.f32 0.001143296, %v500_v57  ;;  %v527_v3 = vmul.f32 %v1613_v60, %v1613_v60  ;;  %v1633_v14 = vmul.f32 0.70710677, %v1616_v0 }
  0xad   :  { %v451_v1 = vmul.f32 %v450_v58, %v448_v47  ;;  %v462_v2 = vmul.f32 %v461_v59, %v448_v47  ;;  %v567_v11 = vmul.f32 %v1621_v4, %v1621_v4  ;;  %v1642_v22 = vmul.f32 0.70710677, %v1626_v7 }
  0xae   :  { %v491_v5 = vmul.f32 %v490_v62, %v1602_v49  ;;  %v502_v6 = vmul.f32 %v501_v63, %v1602_v49  ;;  %v1628_v10 = vmin.f32 %v527_v3, 16.0  ;;  %v607_v55 = vmul.f32 %v1633_v14, %v1633_v14 }
  0xaf   :  { %v452_v8 = vadd.f32 0.0036580483, %v451_v1  ;;  %v463_v9 = vadd.f32 0.014752088, %v462_v2  ;;  %v1639_v21 = vmin.f32 %v567_v11, 16.0 }
  0xb0   :  { %v492_v12 = vadd.f32 0.0036580483, %v491_v5  ;;  %v503_v13 = vadd.f32 0.014752088, %v502_v6  ;;  %v529_v17 = vmul.f32 2.1237322e-06, %v1628_v10 }
  0xb1   :  { %v453_v15 = vmul.f32 %v452_v8, %v448_v47  ;;  %v464_v16 = vmul.f32 %v463_v9, %v448_v47  ;;  %v540_v18 = vmul.f32 3.8918573e-05, %v1628_v10  ;;  %v569_v32 = vmul.f32 2.1237322e-06, %v1639_v21 }
  0xb2   :  { %v493_v19 = vmul.f32 %v492_v12, %v1602_v49  ;;  %v504_v20 = vmul.f32 %v503_v13, %v1602_v49  ;;  %v530_v25 = vadd.f32 0.00028619796, %v529_v17  ;;  %v580_v39 = vmul.f32 3.8918573e-05, %v1639_v21 }
  0xb3   :  { %v454_v23 = vadd.f32 0.05243302, %v453_v15  ;;  %v465_v24 = vadd.f32 0.112945676, %v464_v16  ;;  %v541_v28 = vadd.f32 0.001143296, %v540_v18 }
  0xb4   :  { %v494_v26 = vadd.f32 0.05243302, %v493_v19  ;;  %v505_v27 = vadd.f32 0.112945676, %v504_v20  ;;  %v531_v31 = vmul.f32 %v530_v25, %v1628_v10  ;;  %v570_v59 = vadd.f32 0.00028619796, %v569_v32 }
  0xb5   :  { %v455_v29 = vmul.f32 %v454_v23, %v448_v47  ;;  %v466_v30 = vmul.f32 %v465_v24, %v448_v47  ;;  %v542_v37 = vmul.f32 %v541_v28, %v1628_v10  ;;  %v581_v1 = vadd.f32 0.001143296, %v580_v39 }
  0xb6   :  { %v495_v33 = vmul.f32 %v494_v26, %v1602_v49  ;;  %v506_v34 = vmul.f32 %v505_v27, %v1602_v49  ;;  %v532_v48 = vadd.f32 0.0036580483, %v531_v31  ;;  %v571_v9 = vmul.f32 %v570_v59, %v1639_v21 }
  0xb7   :  { %v456_v44 = vadd.f32 0.18741608, %v455_v29  ;;  %v467_v46 = vadd.f32 0.4994258, %v466_v30  ;;  %v543_v53 = vadd.f32 0.014752088, %v542_v37 }
  0xb8   :  { %v496_v51 = vadd.f32 0.18741608, %v495_v33  ;;  %v507_v52 = vadd.f32 0.4994258, %v506_v34  ;;  %v533_v58 = vmul.f32 %v532_v48, %v1628_v10  ;;  %v1663_v12 = vmin.f32 %v607_v55, 16.0 }
  0xb9   :  { %v457_v56 = vmul.f32 %v456_v44, %v448_v47  ;;  %v468_v57 = vmul.f32 %v467_v46, %v448_v47  ;;  %v544_v63 = vmul.f32 %v543_v53, %v1628_v10  ;;  %v582_v47 = vmul.f32 %v581_v1, %v1639_v21 }
  0xba   :  { %v497_v61 = vmul.f32 %v496_v51, %v1602_v49  ;;  %v508_v62 = vmul.f32 %v507_v52, %v1602_v49  ;;  %v534_v5 = vadd.f32 0.05243302, %v533_v58  ;;  %v1666_v49 = vmul.f32 0.5, %v1583_v38 }
  0xbb   :  { %v458_v2 = vadd.f32 1.1283791, %v457_v56  ;;  %v1656_v3 = vadd.f32 1.0, %v468_v57  ;;  %v545_v8 = vadd.f32 0.112945676, %v544_v63  ;;  %v1669_v13 = vmul.f32 0.5, %v1586_v40 }
  0xbc   :  { %v1658_v6 = vadd.f32 1.0, %v508_v62  ;;  %v498_v11 = vadd.f32 1.1283791, %v497_v61  ;;  %v1673_v15 = vmul.f32 0.5, %v1605_v50  ;;  %v535_v17 = vmul.f32 %v534_v5, %v1628_v10 }
  0xbd   :  { %1325 = vrcp.f32 %v1656_v3  ;;  %v1676_v16 = vmul.f32 %v458_v2, %v1589_v41  ;;  %v1680_v18 = vmul.f32 0.5, %v1608_v54  ;;  %v647_v38 = vmul.f32 %v1642_v22, %v1642_v22 }
  0xbe   :  { %1327 = vrcp.f32 %v1658_v6  ;;  %v479_v19 = vand.u32 2147483647, %v1656_v3  ;;  %v546_v40 = vmul.f32 %v545_v8, %v1628_v10  ;;  %v572_v20 = vadd.f32 0.0036580483, %v571_v9 }
  0xbf   :  { %v583_v23 = vadd.f32 0.014752088, %v582_v47  ;;  %v481_v50 = vand.u32 2147483648, %v1656_v3  ;;  %v499_v24 = vmul.f32 %v498_v11, %v1592_v42  ;;  %v519_v41 = vand.u32 2147483647, %v1658_v6 }
  0xc0   :  { %v609_v25 = vmul.f32 2.1237322e-06, %v1663_v12  ;;  %vm475_vm0 = vweird.f32 %v1656_v3  ;;  %v536_v54 = vadd.f32 0.18741608, %v535_v17  ;;  %v547_v26 = vadd.f32 0.4994258, %v546_v40 }
  0xc1   :  { %v573_v27 = vmul.f32 %v572_v20, %v1639_v21  ;;  %v584_v28 = vmul.f32 %v583_v23, %v1639_v21  ;;  %vm515_vm1 = vweird.f32 %v1658_v6  ;;  %v521_v30 = vand.u32 2147483648, %v1658_v6 }
  0xc2   :  { %v610_v31 = vadd.f32 0.00028619796, %v609_v25  ;;  %v620_v42 = vmul.f32 3.8918573e-05, %v1663_v12  ;;  %vm1697_vm2 = vcmp.eq.f32.partialorder %v479_v19, 8.507059e+37  ;;  %v548_v37 = vmul.f32 %v547_v26, %v1628_v10 }
  0xc3   :  { %v1326_v29 = vpop.eup %1325  ;;  %v574_v39 = vadd.f32 0.05243302, %v573_v27  ;;  %v482_v44 = vor.u32 1.1754944e-38, %v481_v50  ;;  %vm1703_vm3 = vcmp.eq.f32.partialorder %v519_v41, 8.507059e+37  ;;  %v585_v51 = vadd.f32 0.112945676, %v584_v28  ;;  %v271_v41 = vpop.f32.mrf.mxu2 }
  0xc4   :  { %v1328_v32 = vpop.eup %1327  ;;  %v471_v33 = vmul.f32 %v1326_v29, %v1656_v3  ;;  %v537_v53 = vmul.f32 %v536_v54, %v1628_v10  ;;  %v1708_v55 = vadd.f32 1.0, %v548_v37  ;;  %v611_v56 = vmul.f32 %v610_v31, %v1663_v12 }
  0xc5   :  { %v511_v46 = vmul.f32 %v1328_v32, %v1658_v6  ;;  %v522_v58 = vor.u32 1.1754944e-38, %v521_v30  ;;  %v586_v59 = vmul.f32 %v585_v51, %v1639_v21  ;;  %v621_v61 = vadd.f32 0.001143296, %v620_v42 }
  0xc6   :  { %v472_v52 = vsub.f32 1.0, %v471_v33  ;;  %vm476_vm4 = vweird.f32 %v1326_v29  ;;  %1329 = vrcp.f32 %v1708_v55  ;;  %v575_v63 = vmul.f32 %v574_v39, %v1639_v21 }
  0xc7   :  { %v512_v57 = vsub.f32 1.0, %v511_v46  ;;  %vm516_vm5 = vweird.f32 %v1328_v32  ;;  %v587_v2 = vadd.f32 0.4994258, %v586_v59  ;;  %v1714_v5 = vmin.f32 %v647_v38, 16.0  ;;  %vm477_vm6 = vmor %vm475_vm0, %vm476_vm4 }
  0xc8   :  { %v473_v62 = vmul.f32 %v1326_v29, %v472_v52  ;;  %v538_v8 = vadd.f32 1.1283791, %v537_v53  ;;  %v612_v9 = vadd.f32 0.0036580483, %v611_v56  ;;  %v622_v47 = vmul.f32 %v621_v61, %v1663_v12  ;;  %vm517_vm7 = vmor %vm515_vm1, %vm516_vm5 }
  0xc9   :  { %v513_v1 = vmul.f32 %v1328_v32, %v512_v57  ;;  %v559_v17 = vand.u32 2147483647, %v1708_v55  ;;  %v561_v19 = vand.u32 2147483648, %v1708_v55  ;;  %v588_v40 = vmul.f32 %v587_v2, %v1639_v21 }
  0xca   :  { %v474_v10 = vadd.f32 %v1326_v29, %v473_v62  ;;  %v576_v38 = vadd.f32 0.18741608, %v575_v63  ;;  %v613_v23 = vmul.f32 %v612_v9, %v1663_v12  ;;  %v623_v50 = vadd.f32 0.014752088, %v622_v47 }
  0xcb   :  { %v514_v11 = vadd.f32 %v1328_v32, %v513_v1  ;;  %v1727_v54 = vadd.f32 1.0, %v588_v40  ;;  %v649_v26 = vmul.f32 2.1237322e-06, %v1714_v5  ;;  %v539_v42 = vmul.f32 %v538_v8, %v1613_v60 }
  0xcc   :  { %v478_v20 = vsel %vm477_vm6, %v1326_v29, %v474_v10  ;;  %v1330_v27 = vpop.eup %1329  ;;  %v614_v29 = vadd.f32 0.05243302, %v613_v23  ;;  %v624_v30 = vmul.f32 %v623_v50, %v1663_v12  ;;  %vm555_vm8 = vweird.f32 %v1708_v55 }
  0xcd   :  { %v483_v3 = vsel %vm1697_vm2, %v482_v44, %v478_v20  ;;  %v518_v25 = vsel %vm517_vm7, %v1328_v32, %v514_v11  ;;  %v551_v33 = vmul.f32 %v1330_v27, %v1708_v55  ;;  %v1737_v32 = vadd.f32 %v1594_v43, %v271_v41 }
  0xce   :  { %v484_v28 = vmul.f32 %v483_v3, %v1676_v16  ;;  %v523_v6 = vsel %vm1703_vm3, %v522_v58, %v518_v25  ;;  %vm1740_vm9 = vcmp.eq.f32.partialorder %v559_v17, 8.507059e+37  ;;  %1331 = vrcp.f32 %v1727_v54  ;;  %v290_v3 = vpop.f32.mrf.mxu3 }
  0xcf   :  { %v524_v31 = vmul.f32 %v523_v6, %v499_v24  ;;  %v552_v39 = vsub.f32 1.0, %v551_v33  ;;  %v577_v24 = vmul.f32 %v576_v38, %v1639_v21  ;;  %v615_v60 = vmul.f32 %v614_v29, %v1663_v12 }
  0xd0   :  { %v1275_v34 = vclamps-f32 %v484_v28, 1.0  ;;  %v562_v46 = vor.u32 1.1754944e-38, %v561_v19  ;;  %v625_v48 = vadd.f32 0.112945676, %v624_v30  ;;  %v650_v51 = vadd.f32 0.00028619796, %v649_v26  ;;  %v236_v30 = vpop.f32.mrf.mxu0 }
  0xd1   :  { %v1276_v16 = vclamps-f32 %v524_v31, 1.0  ;;  %v553_v53 = vmul.f32 %v1330_v27, %v552_v39  ;;  %vm556_vm10 = vweird.f32 %v1330_v27  ;;  %v616_v56 = vadd.f32 0.18741608, %v615_v60 }
  0xd2   :  { %v1087_v44 = vadd.f32 1.0, %v1275_v34  ;;  %v626_v58 = vmul.f32 %v625_v48, %v1663_v12  ;;  %v651_v59 = vmul.f32 %v650_v51, %v1714_v5  ;;  %v660_v61 = vmul.f32 3.8918573e-05, %v1714_v5  ;;  %vm557_vm11 = vmor %vm555_vm8, %vm556_vm10 }
  0xd3   :  { %v1088_v52 = vadd.f32 1.0, %v1276_v16  ;;  %v554_v62 = vadd.f32 %v1330_v27, %v553_v53  ;;  %v578_v63 = vadd.f32 1.1283791, %v577_v24  ;;  %v1753_v1 = vmul.f32 0.70710677, %v1737_v32 }
  0xd4   :  { %v1103_v57 = vmul.f32 %v1087_v44, %v1666_v49  ;;  %v1332_v2 = vpop.eup %1331  ;;  %v617_v10 = vmul.f32 %v616_v56, %v1663_v12  ;;  %v627_v49 = vadd.f32 0.4994258, %v626_v58  ;;  %v652_v8 = vadd.f32 0.0036580483, %v651_v59 }
  0xd5   :  { %v1104_v21 = vmul.f32 %v1088_v52, %v1669_v13  ;;  %v661_v9 = vadd.f32 0.001143296, %v660_v61  ;;  %v558_v11 = vsel %vm557_vm11, %v1330_v27, %v554_v62  ;;  %v591_v17 = vmul.f32 %v1332_v2, %v1727_v54 }
  0xd6   :  { %v599_v13 = vand.u32 2147483647, %v1727_v54  ;;  %v563_v19 = vsel %vm1740_vm9, %v562_v46, %v558_v11  ;;  %v601_v40 = vand.u32 2147483648, %v1727_v54  ;;  %v628_v20 = vmul.f32 %v627_v49, %v1663_v12 }
  0xd7   :  { %v1119_v47 = vpack.c.bf16 %v1104_v21, %v1103_v57  ;;  %v653_v55 = vmul.f32 %v652_v8, %v1714_v5  ;;  %v564_v38 = vmul.f32 %v563_v19, %v539_v42  ;;  %v592_v23 = vsub.f32 1.0, %v591_v17 }
  0xd8   :  { %v662_v50 = vmul.f32 %v661_v9, %v1714_v5  ;;  %v687_v41 = vmul.f32 %v1753_v1, %v1753_v1  ;;  %vm596_vm12 = vweird.f32 %v1332_v2  ;;  %v618_v25 = vadd.f32 1.1283791, %v617_v10 }
  0xd9   :  { %1127 = vst [vmem:[%s2131_s3] sm:$0xff] %v1119_v47  ;;  %v1771_v26 = vadd.f32 1.0, %v628_v20  ;;  %v654_v27 = vadd.f32 0.05243302, %v653_v55  ;;  %v1277_v12 = vclamps-f32 %v564_v38, 1.0  ;;  %v593_v28 = vmul.f32 %v1332_v2, %v592_v23 }
  0xda   :  { %v663_v6 = vadd.f32 0.014752088, %v662_v50  ;;  %v1773_v29 = vmin.f32 %v687_v41, 16.0  ;;  %v579_v31 = vmul.f32 %v578_v63, %v1621_v4  ;;  %vm595_vm13 = vweird.f32 %v1727_v54 }
  0xdb   :  { %1333 = vrcp.f32 %v1771_v26  ;;  %v1779_v42 = vadd.f32 %v1598_v45, %v290_v3  ;;  %v594_v33 = vadd.f32 %v1332_v2, %v593_v28  ;;  %vm600_vm14 = vcmp.eq.f32.partialorder %v599_v13, 8.507059e+37  ;;  %vm597_vm15 = vmor %vm595_vm13, %vm596_vm12 }
  0xdc   :  { %v602_v34 = vor.u32 1.1754944e-38, %v601_v40  ;;  %v664_v37 = vmul.f32 %v663_v6, %v1714_v5  ;;  %v619_v16 = vmul.f32 %v618_v25, %v1633_v14  ;;  %v689_v39 = vmul.f32 2.1237322e-06, %v1773_v29 }
  0xdd   :  { %v700_v4 = vmul.f32 3.8918573e-05, %v1773_v29  ;;  %v1787_v54 = vadd.f32 %v1578_v35, %v236_v30  ;;  %v1089_v24 = vadd.f32 1.0, %v1277_v12  ;;  %v598_v60 = vsel %vm597_vm15, %v1332_v2, %v594_v33 }
  0xde   :  { %v655_v44 = vmul.f32 %v654_v27, %v1714_v5  ;;  %v665_v46 = vadd.f32 0.112945676, %v664_v37  ;;  %v603_v48 = vsel %vm600_vm14, %v602_v34, %v598_v60  ;;  %v690_v51 = vadd.f32 0.00028619796, %v689_v39 }
  0xdf   :  { %v701_v52 = vadd.f32 0.001143296, %v700_v4  ;;  %v1791_v53 = vmul.f32 0.70710677, %v1779_v42  ;;  %v604_v56 = vmul.f32 %v603_v48, %v579_v31  ;;  %vm635_vm0 = vweird.f32 %v1771_v26 }
  0xe0   :  { %v639_v14 = vand.u32 2147483647, %v1771_v26  ;;  %v666_v57 = vmul.f32 %v665_v46, %v1714_v5  ;;  %v691_v59 = vmul.f32 %v690_v51, %v1773_v29  ;;  %v1801_v62 = vmul.f32 0.70710677, %v1787_v54 }
  0xe1   :  { %v1334_v58 = vpop.eup %1333  ;;  %v702_v61 = vmul.f32 %v701_v52, %v1773_v29  ;;  %v727_v21 = vmul.f32 %v1791_v53, %v1791_v53  ;;  %v1278_v63 = vclamps-f32 %v604_v56, 1.0  ;;  %v641_v10 = vand.u32 2147483648, %v1771_v26  ;;  %v255_v56 = vpop.f32.mrf.mxu1 }
  0xe2   :  { %v631_v2 = vmul.f32 %v1334_v58, %v1771_v26  ;;  %v656_v49 = vadd.f32 0.18741608, %v655_v44  ;;  %v1105_v8 = vmul.f32 %v1089_v24, %v1673_v15  ;;  %v667_v9 = vadd.f32 0.4994258, %v666_v57 }
  0xe3   :  { %v692_v47 = vadd.f32 0.0036580483, %v691_v59  ;;  %v703_v11 = vadd.f32 0.014752088, %v702_v61  ;;  %v1090_v17 = vadd.f32 1.0, %v1278_v63  ;;  %vm636_vm1 = vweird.f32 %v1334_v58 }
  0xe4   :  { %v632_v13 = vsub.f32 1.0, %v631_v2  ;;  %v1806_v19 = vmin.f32 %v727_v21, 16.0  ;;  %v668_v40 = vmul.f32 %v667_v9, %v1714_v5  ;;  %v767_v38 = vmul.f32 %v1801_v62, %v1801_v62  ;;  %vm637_vm2 = vmor %vm635_vm0, %vm636_vm1 }
  0xe5   :  { %v693_v20 = vmul.f32 %v692_v47, %v1773_v29  ;;  %v704_v55 = vmul.f32 %v703_v11, %v1773_v29  ;;  %v1106_v23 = vmul.f32 %v1090_v17, %v1680_v18  ;;  %v657_v3 = vmul.f32 %v656_v49, %v1714_v5 }
  0xe6   :  { %v633_v15 = vmul.f32 %v1334_v58, %v632_v13  ;;  %v729_v50 = vmul.f32 2.1237322e-06, %v1806_v19  ;;  %v740_v41 = vmul.f32 3.8918573e-05, %v1806_v19  ;;  %v1817_v25 = vadd.f32 1.0, %v668_v40 }
  0xe7   :  { %v694_v27 = vadd.f32 0.05243302, %v693_v20  ;;  %v705_v12 = vadd.f32 0.112945676, %v704_v55  ;;  %v1120_v28 = vpack.c.bf16 %v1106_v23, %v1105_v8  ;;  %vm640_vm3 = vcmp.eq.f32.partialorder %v639_v14, 8.507059e+37  ;;  %v274_v55 = vpop.f32.mrf.mxu2 }
  0xe8   :  { %v634_v6 = vadd.f32 %v1334_v58, %v633_v15  ;;  %v730_v30 = vadd.f32 0.00028619796, %v729_v50  ;;  %v741_v31 = vadd.f32 0.001143296, %v740_v41  ;;  %v642_v18 = vor.u32 1.1754944e-38, %v641_v10 }
  0xe9   :  { %1335 = vrcp.f32 %v1817_v25  ;;  %v1823_v33 = vmin.f32 %v767_v38, 16.0  ;;  %1128 = vst [vmem:[%s2131_s3 + $0x8] sm:$0xff] %v1120_v28  ;;  %v695_v34 = vmul.f32 %v694_v27, %v1773_v29  ;;  %v706_v37 = vmul.f32 %v705_v12, %v1773_v29 }
  0xea   :  { %v638_v5 = vsel %vm637_vm2, %v1334_v58, %v634_v6  ;;  %v731_v39 = vmul.f32 %v730_v30, %v1806_v19  ;;  %v742_v26 = vmul.f32 %v741_v31, %v1806_v19  ;;  %v658_v60 = vadd.f32 1.1283791, %v657_v3 }
  0xeb   :  { %v643_v4 = vsel %vm640_vm3, %v642_v18, %v638_v5  ;;  %v707_v44 = vadd.f32 0.4994258, %v706_v37  ;;  %v769_v51 = vmul.f32 2.1237322e-06, %v1823_v33  ;;  %v780_v52 = vmul.f32 3.8918573e-05, %v1823_v33 }
  0xec   :  { %v644_v24 = vmul.f32 %v643_v4, %v619_v16  ;;  %v732_v46 = vadd.f32 0.0036580483, %v731_v39  ;;  %v743_v48 = vadd.f32 0.014752088, %v742_v26  ;;  %v419_v14 = vmul.f32 0.5, %v1616_v0 }
  0xed   :  { %v696_v57 = vadd.f32 0.18741608, %v695_v34  ;;  %v708_v58 = vmul.f32 %v707_v44, %v1773_v29  ;;  %v770_v63 = vadd.f32 0.00028619796, %v769_v51  ;;  %v781_v2 = vadd.f32 0.001143296, %v780_v52 }
  0xee   :  { %v733_v59 = vmul.f32 %v732_v46, %v1806_v19  ;;  %v1279_v21 = vclamps-f32 %v644_v24, 1.0  ;;  %v744_v16 = vmul.f32 %v743_v48, %v1806_v19  ;;  %v1839_v10 = vmul.f32 0.5, %v1626_v7 }
  0xef   :  { %v1336_v61 = vpop.eup %1335  ;;  %v659_v49 = vmul.f32 %v658_v60, %v1642_v22  ;;  %v1844_v0 = vadd.f32 %v1580_v36, %v255_v56  ;;  %v1846_v9 = vadd.f32 1.0, %v708_v58  ;;  %v771_v17 = vmul.f32 %v770_v63, %v1823_v33 }
  0xf0   :  { %v671_v8 = vmul.f32 %v1336_v61, %v1817_v25  ;;  %v734_v47 = vadd.f32 0.05243302, %v733_v59  ;;  %v745_v11 = vadd.f32 0.112945676, %v744_v16  ;;  %v679_v40 = vand.u32 2147483647, %v1817_v25 }
  0xf1   :  { %v697_v20 = vmul.f32 %v696_v57, %v1773_v29  ;;  %v782_v7 = vmul.f32 %v781_v2, %v1823_v33  ;;  %v1091_v22 = vadd.f32 1.0, %v1279_v21  ;;  %vm676_vm4 = vweird.f32 %v1336_v61 }
  0xf2   :  { %v672_v13 = vsub.f32 1.0, %v671_v8  ;;  %v681_v38 = vand.u32 2147483648, %v1817_v25  ;;  %1337 = vrcp.f32 %v1846_v9  ;;  %v735_v15 = vmul.f32 %v734_v47, %v1806_v19 }
  0xf3   :  { %v746_v50 = vmul.f32 %v745_v11, %v1806_v19  ;;  %v772_v41 = vadd.f32 0.0036580483, %v771_v17  ;;  %vm675_vm5 = vweird.f32 %v1817_v25  ;;  %v783_v3 = vadd.f32 0.014752088, %v782_v7 }
  0xf4   :  { %v673_v23 = vmul.f32 %v1336_v61, %v672_v13  ;;  %v1858_v29 = vmul.f32 0.70710677, %v1844_v0  ;;  %v1861_v27 = vadd.f32 %v1594_v43, %v274_v55  ;;  %v698_v28 = vadd.f32 1.1283791, %v697_v20  ;;  %vm677_vm6 = vmor %vm675_vm5, %vm676_vm4 }
  0xf5   :  { %v747_v6 = vadd.f32 0.4994258, %v746_v50  ;;  %v773_v30 = vmul.f32 %v772_v41, %v1823_v33  ;;  %vm680_vm7 = vcmp.eq.f32.partialorder %v679_v40, 8.507059e+37  ;;  %v682_v31 = vor.u32 1.1754944e-38, %v681_v38 }
  0xf6   :  { %v674_v12 = vadd.f32 %v1336_v61, %v673_v23  ;;  %v784_v18 = vmul.f32 %v783_v3, %v1823_v33  ;;  %v807_v25 = vmul.f32 %v1858_v29, %v1858_v29  ;;  %v1107_v5 = vmul.f32 %v1091_v22, %v419_v14  ;;  %v293_v3 = vpop.f32.mrf.mxu3 }
  0xf7   :  { %v736_v37 = vadd.f32 0.18741608, %v735_v15  ;;  %v748_v39 = vmul.f32 %v747_v6, %v1806_v19  ;;  %v1872_v44 = vmul.f32 0.70710677, %v1861_v27  ;;  %v699_v48 = vmul.f32 %v698_v28, %v1753_v1 }
  0xf8   :  { %v678_v34 = vsel %vm677_vm6, %v1336_v61, %v674_v12  ;;  %v1338_v4 = vpop.eup %1337  ;;  %v785_v24 = vadd.f32 0.112945676, %v784_v18  ;;  %v1869_v60 = vmin.f32 %v807_v25, 16.0  ;;  %v774_v52 = vadd.f32 0.05243302, %v773_v30 }
  0xf9   :  { %v683_v26 = vsel %vm680_vm7, %v682_v31, %v678_v34  ;;  %v711_v51 = vmul.f32 %v1338_v4, %v1846_v9  ;;  %v719_v56 = vand.u32 2147483647, %v1846_v9  ;;  %v1877_v14 = vadd.f32 1.0, %v748_v39 }
  0xfa   :  { %v684_v46 = vmul.f32 %v683_v26, %v659_v49  ;;  %v786_v57 = vmul.f32 %v785_v24, %v1823_v33  ;;  %v809_v58 = vmul.f32 2.1237322e-06, %v1869_v60  ;;  %v737_v21 = vmul.f32 %v736_v37, %v1806_v19 }
  0xfb   :  { %v712_v61 = vsub.f32 1.0, %v711_v51  ;;  %v820_v16 = vmul.f32 3.8918573e-05, %v1869_v60  ;;  %vm716_vm8 = vweird.f32 %v1338_v4  ;;  %v721_v1 = vand.u32 2147483648, %v1846_v9 }
  0xfc   :  { %v1280_v59 = vclamps-f32 %v684_v46, 1.0  ;;  %1339 = vrcp.f32 %v1877_v14  ;;  %v847_v63 = vmul.f32 %v1872_v44, %v1872_v44  ;;  %v775_v8 = vmul.f32 %v774_v52, %v1823_v33 }
  0xfd   :  { %v713_v49 = vmul.f32 %v1338_v4, %v712_v61  ;;  %v787_v47 = vadd.f32 0.4994258, %v786_v57  ;;  %vm715_vm9 = vweird.f32 %v1846_v9  ;;  %vm1889_vm10 = vcmp.eq.f32.partialorder %v719_v56, 8.507059e+37 }
  0xfe   :  { %v1092_v2 = vadd.f32 1.0, %v1280_v59  ;;  %v810_v19 = vadd.f32 0.00028619796, %v809_v58  ;;  %v821_v17 = vadd.f32 0.001143296, %v820_v16  ;;  %vm717_vm11 = vmor %vm715_vm9, %vm716_vm8  ;;  %v722_v55 = vor.u32 1.1754944e-38, %v721_v1 }
  0xff   :  { %v714_v40 = vadd.f32 %v1338_v4, %v713_v49  ;;  %v738_v20 = vadd.f32 1.1283791, %v737_v21  ;;  %v788_v7 = vmul.f32 %v787_v47, %v1823_v33  ;;  %v1898_v9 = vmin.f32 %v847_v63, 16.0 }
 0x100   :  { %v1108_v13 = vmul.f32 %v1092_v2, %v1839_v10  ;;  %v811_v22 = vmul.f32 %v810_v19, %v1869_v60  ;;  %v822_v38 = vmul.f32 %v821_v17, %v1869_v60  ;;  %v776_v50 = vadd.f32 0.18741608, %v775_v8 }
 0x101   :  { %v718_v15 = vsel %vm717_vm11, %v1338_v4, %v714_v40  ;;  %v1900_v41 = vadd.f32 1.0, %v788_v7  ;;  %v849_v30 = vmul.f32 2.1237322e-06, %v1898_v9  ;;  %v421_v31 = vmul.f32 0.5, %v1737_v32 }
 0x102   :  { %v1121_v23 = vpack.c.bf16 %v1108_v13, %v1107_v5  ;;  %v1340_v10 = vpop.eup %1339  ;;  %v723_v12 = vsel %vm1889_vm10, %v722_v55, %v718_v15  ;;  %v812_v28 = vadd.f32 0.0036580483, %v811_v22  ;;  %v823_v6 = vadd.f32 0.014752088, %v822_v38 }
 0x103   :  { %v1910_v18 = vmul.f32 0.5, %v1779_v42  ;;  %v739_v25 = vmul.f32 %v738_v20, %v1791_v53  ;;  %v751_v5 = vmul.f32 %v1340_v10, %v1877_v14  ;;  %v724_v34 = vmul.f32 %v723_v12, %v699_v48  ;;  %v238_v12 = vpop.f32.mrf.mxu0 }
 0x104   :  { %1129 = vst [vmem:[%s2131_s3 + $0x10] sm:$0xff] %v1121_v23  ;;  %vm755_vm12 = vweird.f32 %v1877_v14  ;;  %1341 = vrcp.f32 %v1900_v41  ;;  %v1917_v37 = vadd.f32 %v1598_v45, %v293_v3  ;;  %v759_v4 = vand.u32 2147483647, %v1877_v14 }
 0x105   :  { %v752_v39 = vsub.f32 1.0, %v751_v5  ;;  %v813_v32 = vmul.f32 %v812_v28, %v1869_v60  ;;  %v824_v42 = vmul.f32 %v823_v6, %v1869_v60  ;;  %v761_v26 = vand.u32 2147483648, %v1877_v14 }
 0x106   :  { %v777_v53 = vmul.f32 %v776_v50, %v1823_v33  ;;  %v850_v24 = vadd.f32 0.00028619796, %v849_v30  ;;  %v860_v46 = vmul.f32 3.8918573e-05, %v1898_v9  ;;  %vm756_vm13 = vweird.f32 %v1340_v10 }
 0x107   :  { %v753_v48 = vmul.f32 %v1340_v10, %v752_v39  ;;  %v814_v51 = vadd.f32 0.05243302, %v813_v32  ;;  %v825_v52 = vadd.f32 0.112945676, %v824_v42  ;;  %v1281_v56 = vclamps-f32 %v724_v34, 1.0  ;;  %vm757_vm15 = vmor %vm755_vm12, %vm756_vm13 }
 0x108   :  { %v851_v57 = vmul.f32 %v850_v24, %v1898_v9  ;;  %v861_v58 = vadd.f32 0.001143296, %v860_v46  ;;  %v1927_v59 = vmul.f32 0.70710677, %v1917_v37  ;;  %vm760_vm14 = vcmp.eq.f32.partialorder %v759_v4, 8.507059e+37 }
 0x109   :  { %v754_v61 = vadd.f32 %v1340_v10, %v753_v48  ;;  %v815_v21 = vmul.f32 %v814_v51, %v1869_v60  ;;  %v826_v33 = vmul.f32 %v825_v52, %v1869_v60  ;;  %v762_v1 = vor.u32 1.1754944e-38, %v761_v26  ;;  %v257_v48 = vpop.f32.mrf.mxu1 }
 0x10a   :  { %v1342_v16 = vpop.eup %1341  ;;  %v778_v63 = vadd.f32 1.1283791, %v777_v53  ;;  %v862_v2 = vmul.f32 %v861_v58, %v1898_v9  ;;  %v887_v49 = vmul.f32 %v1927_v59, %v1927_v59  ;;  %vm795_vm0 = vweird.f32 %v1900_v41 }
 0x10b   :  { %v758_v8 = vsel %vm757_vm15, %v1340_v10, %v754_v61  ;;  %v791_v47 = vmul.f32 %v1342_v16, %v1900_v41  ;;  %v852_v11 = vadd.f32 0.0036580483, %v851_v57  ;;  %v1093_v19 = vadd.f32 1.0, %v1281_v56 }
 0x10c   :  { %v763_v17 = vsel %vm760_vm14, %v762_v1, %v758_v8  ;;  %v827_v13 = vadd.f32 0.4994258, %v826_v33  ;;  %v863_v40 = vadd.f32 0.014752088, %v862_v2  ;;  %v816_v7 = vadd.f32 0.18741608, %v815_v21 }
 0x10d   :  { %v764_v20 = vmul.f32 %v763_v17, %v739_v25  ;;  %v792_v14 = vsub.f32 1.0, %v791_v47  ;;  %v1938_v55 = vmin.f32 %v887_v49, 16.0  ;;  %vm796_vm1 = vweird.f32 %v1342_v16 }
 0x10e   :  { %v801_v22 = vand.u32 2147483648, %v1900_v41  ;;  %v828_v38 = vmul.f32 %v827_v13, %v1869_v60  ;;  %v864_v23 = vmul.f32 %v863_v40, %v1898_v9  ;;  %v853_v3 = vmul.f32 %v852_v11, %v1898_v9  ;;  %vm797_vm2 = vmor %vm795_vm0, %vm796_vm1 }
 0x10f   :  { %v1282_v15 = vclamps-f32 %v764_v20, 1.0  ;;  %v793_v50 = vmul.f32 %v1342_v16, %v792_v14  ;;  %v889_v10 = vmul.f32 2.1237322e-06, %v1938_v55  ;;  %v1109_v28 = vmul.f32 %v1093_v19, %v421_v31 }
 0x110   :  { %v799_v6 = vand.u32 2147483647, %v1900_v41  ;;  %v1946_v30 = vadd.f32 1.0, %v828_v38  ;;  %v865_v25 = vadd.f32 0.112945676, %v864_v23  ;;  %v817_v39 = vmul.f32 %v816_v7, %v1869_v60 }
 0x111   :  { %v1094_v5 = vadd.f32 1.0, %v1282_v15  ;;  %v794_v34 = vadd.f32 %v1342_v16, %v793_v50  ;;  %v890_v4 = vadd.f32 0.00028619796, %v889_v10  ;;  %v802_v32 = vor.u32 1.1754944e-38, %v801_v22 }
 0x112   :  { %1343 = vrcp.f32 %v1946_v30  ;;  %v900_v42 = vmul.f32 3.8918573e-05, %v1938_v55  ;;  %v1955_v31 = vadd.f32 %v1578_v35, %v238_v12  ;;  %v854_v24 = vadd.f32 0.05243302, %v853_v3 }
 0x113   :  { %v1110_v26 = vmul.f32 %v1094_v5, %v1910_v18  ;;  %v798_v53 = vsel %vm797_vm2, %v1342_v16, %v794_v34  ;;  %v866_v46 = vmul.f32 %v865_v25, %v1898_v9  ;;  %vm800_vm3 = vcmp.eq.f32.partialorder %v799_v6, 8.507059e+37 }
 0x114   :  { %v891_v60 = vmul.f32 %v890_v4, %v1938_v55  ;;  %v803_v51 = vsel %vm800_vm3, %v802_v32, %v798_v53  ;;  %v818_v52 = vadd.f32 1.1283791, %v817_v39  ;;  %v779_v57 = vmul.f32 %v778_v63, %v1801_v62 }
 0x115   :  { %v1122_v41 = vpack.c.bf16 %v1110_v26, %v1109_v28  ;;  %v867_v56 = vadd.f32 0.4994258, %v866_v46  ;;  %v901_v61 = vadd.f32 0.001143296, %v900_v42  ;;  %v1962_v35 = vmul.f32 0.70710677, %v1955_v31 }
 0x116   :  { %v892_v58 = vadd.f32 0.0036580483, %v891_v60  ;;  %v423_v18 = vmul.f32 0.5, %v1787_v54  ;;  %v855_v21 = vmul.f32 %v854_v24, %v1898_v9  ;;  %v1971_v16 = vadd.f32 %v1580_v36, %v257_v48  ;;  %v276_v36 = vpop.f32.mrf.mxu2 }
 0x117   :  { %1130 = vst [vmem:[%s2131_s3 + $0x18] sm:$0xff] %v1122_v41  ;;  %v868_v33 = vmul.f32 %v867_v56, %v1898_v9  ;;  %v804_v62 = vmul.f32 %v803_v51, %v779_v57  ;;  %v902_v2 = vmul.f32 %v901_v61, %v1938_v55  ;;  %v927_v49 = vmul.f32 %v1962_v35, %v1962_v35 }
 0x118   :  { %v1344_v1 = vpop.eup %1343  ;;  %v893_v63 = vmul.f32 %v892_v58, %v1938_v55  ;;  %v1978_v8 = vmul.f32 0.5, %v1844_v0  ;;  %v819_v54 = vmul.f32 %v818_v52, %v1858_v29  ;;  %v839_v11 = vand.u32 2147483647, %v1946_v30 }
 0x119   :  { %v831_v47 = vmul.f32 %v1344_v1, %v1946_v30  ;;  %v841_v19 = vand.u32 2147483648, %v1946_v30  ;;  %v1984_v17 = vadd.f32 1.0, %v868_v33  ;;  %v903_v13 = vadd.f32 0.014752088, %v902_v2 }
 0x11a   :  { %v1986_v40 = vmin.f32 %v927_v49, 16.0  ;;  %vm835_vm4 = vweird.f32 %v1946_v30  ;;  %v856_v14 = vadd.f32 0.18741608, %v855_v21  ;;  %v1990_v0 = vmul.f32 0.70710677, %v1971_v16 }
 0x11b   :  { %v832_v20 = vsub.f32 1.0, %v831_v47  ;;  %v1283_v29 = vclamps-f32 %v804_v62, 1.0  ;;  %1345 = vrcp.f32 %v1984_v17  ;;  %v894_v7 = vadd.f32 0.05243302, %v893_v63 }
 0x11c   :  { %v1994_v22 = vadd.f32 %v1594_v43, %v276_v36  ;;  %vm836_vm5 = vweird.f32 %v1344_v1  ;;  %v904_v23 = vmul.f32 %v903_v13, %v1938_v55  ;;  %v929_v15 = vmul.f32 2.1237322e-06, %v1986_v40 }
 0x11d   :  { %v833_v38 = vmul.f32 %v1344_v1, %v832_v20  ;;  %vm1998_vm6 = vcmp.eq.f32.partialorder %v839_v11, 8.507059e+37  ;;  %v842_v3 = vor.u32 1.1754944e-38, %v841_v19  ;;  %v940_v10 = vmul.f32 3.8918573e-05, %v1986_v40  ;;  %vm837_vm7 = vmor %vm835_vm4, %vm836_vm5 }
 0x11e   :  { %v967_v12 = vmul.f32 %v1990_v0, %v1990_v0  ;;  %v857_v43 = vmul.f32 %v856_v14, %v1898_v9  ;;  %v905_v6 = vadd.f32 0.112945676, %v904_v23  ;;  %v930_v25 = vadd.f32 0.00028619796, %v929_v15 }
 0x11f   :  { %v834_v28 = vadd.f32 %v1344_v1, %v833_v38  ;;  %v1095_v5 = vadd.f32 1.0, %v1283_v29  ;;  %v895_v34 = vmul.f32 %v894_v7, %v1938_v55  ;;  %v941_v39 = vadd.f32 0.001143296, %v940_v10  ;;  %v295_v38 = vpop.f32.mrf.mxu3 }
 0x120   :  { %v2009_v4 = vmin.f32 %v967_v12, 16.0  ;;  %v906_v42 = vmul.f32 %v905_v6, %v1938_v55  ;;  %v931_v26 = vmul.f32 %v930_v25, %v1986_v40  ;;  %v2014_v53 = vmul.f32 0.70710677, %v1994_v22 }
 0x121   :  { %v838_v32 = vsel %vm837_vm7, %v1344_v1, %v834_v28  ;;  %v1346_v9 = vpop.eup %1345  ;;  %v942_v30 = vmul.f32 %v941_v39, %v1986_v40  ;;  %v858_v41 = vadd.f32 1.1283791, %v857_v43  ;;  %v881_v52 = vand.u32 2147483648, %v1984_v17 }
 0x122   :  { %v843_v24 = vsel %vm1998_vm6, %v842_v3, %v838_v32  ;;  %v969_v46 = vmul.f32 2.1237322e-06, %v2009_v4  ;;  %v980_v60 = vmul.f32 3.8918573e-05, %v2009_v4  ;;  %v871_v51 = vmul.f32 %v1346_v9, %v1984_v17 }
 0x123   :  { %v844_v48 = vmul.f32 %v843_v24, %v819_v54  ;;  %v1111_v56 = vmul.f32 %v1095_v5, %v423_v18  ;;  %v907_v57 = vadd.f32 0.4994258, %v906_v42  ;;  %v932_v58 = vadd.f32 0.0036580483, %v931_v26 }
 0x124   :  { %v943_v61 = vadd.f32 0.014752088, %v942_v30  ;;  %v872_v33 = vsub.f32 1.0, %v871_v51  ;;  %v970_v1 = vadd.f32 0.00028619796, %v969_v46  ;;  %v1007_v62 = vmul.f32 %v2014_v53, %v2014_v53 }
 0x125   :  { %v1284_v21 = vclamps-f32 %v844_v48, 1.0  ;;  %v896_v63 = vadd.f32 0.18741608, %v895_v34  ;;  %v908_v2 = vmul.f32 %v907_v57, %v1938_v55  ;;  %v981_v54 = vadd.f32 0.001143296, %v980_v60 }
 0x126   :  { %v944_v49 = vmul.f32 %v943_v61, %v1986_v40  ;;  %v873_v11 = vmul.f32 %v1346_v9, %v872_v33  ;;  %vm876_vm8 = vweird.f32 %v1346_v9  ;;  %v971_v18 = vmul.f32 %v970_v1, %v2009_v4 }
 0x127   :  { %v1096_v47 = vadd.f32 1.0, %v1284_v21  ;;  %v879_v36 = vand.u32 2147483647, %v1984_v17  ;;  %v2029_v19 = vadd.f32 1.0, %v908_v2  ;;  %v933_v13 = vmul.f32 %v932_v58, %v1986_v40 }
 0x128   :  { %v945_v20 = vadd.f32 0.112945676, %v944_v49  ;;  %v874_v29 = vadd.f32 %v1346_v9, %v873_v11  ;;  %vm875_vm9 = vweird.f32 %v1984_v17  ;;  %v2034_v7 = vmin.f32 %v1007_v62, 16.0 }
 0x129   :  { %v1112_v14 = vmul.f32 %v1096_v47, %v1978_v8  ;;  %vm877_vm10 = vmor %vm875_vm9, %vm876_vm8  ;;  %v882_v23 = vor.u32 1.1754944e-38, %v881_v52  ;;  %v897_v15 = vmul.f32 %v896_v63, %v1938_v55  ;;  %1347 = vrcp.f32 %v2029_v19 }
 0x12a   :  { %v982_v50 = vmul.f32 %v981_v54, %v2009_v4  ;;  %v878_v10 = vsel %vm877_vm10, %v1346_v9, %v874_v29  ;;  %v946_v12 = vmul.f32 %v945_v20, %v1986_v40  ;;  %v972_v28 = vadd.f32 0.0036580483, %v971_v18 }
 0x12b   :  { %v1123_v3 = vpack.c.bf16 %v1112_v14, %v1111_v56  ;;  %vm880_vm11 = vcmp.eq.f32.partialorder %v879_v36, 8.507059e+37  ;;  %v934_v8 = vadd.f32 0.05243302, %v933_v13  ;;  %v2041_v17 = vadd.f32 %v1598_v45, %v295_v38 }
 0x12c   :  { %v883_v43 = vsel %vm880_vm11, %v882_v23, %v878_v10  ;;  %v947_v55 = vadd.f32 0.4994258, %v946_v12  ;;  %v1009_v6 = vmul.f32 2.1237322e-06, %v2034_v7  ;;  %v859_v25 = vmul.f32 %v858_v41, %v1872_v44 }
 0x12d   :  { %1131 = vst [vmem:[%s2131_s3 + $0x20] sm:$0xff] %v1123_v3  ;;  %v983_v5 = vadd.f32 0.014752088, %v982_v50  ;;  %v898_v34 = vadd.f32 1.1283791, %v897_v15  ;;  %v973_v32 = vmul.f32 %v972_v28, %v2009_v4  ;;  %v935_v45 = vmul.f32 %v934_v8, %v1986_v40 }
 0x12e   :  { %v948_v39 = vmul.f32 %v947_v55, %v1986_v40  ;;  %v884_v26 = vmul.f32 %v883_v43, %v859_v25  ;;  %v2053_v24 = vmul.f32 0.70710677, %v2041_v17  ;;  %v425_v30 = vmul.f32 0.5, %v1861_v27 }
 0x12f   :  { %v1348_v42 = vpop.eup %1347  ;;  %v984_v9 = vmul.f32 %v983_v5, %v2009_v4  ;;  %v919_v44 = vand.u32 2147483647, %v2029_v19  ;;  %v1010_v60 = vadd.f32 0.00028619796, %v1009_v6  ;;  %v1020_v51 = vmul.f32 3.8918573e-05, %v2034_v7 }
 0x130   :  { %v911_v46 = vmul.f32 %v1348_v42, %v2029_v19  ;;  %v2058_v48 = vadd.f32 1.0, %v948_v39  ;;  %v1047_v52 = vmul.f32 %v2053_v24, %v2053_v24  ;;  %v426_v56 = vmul.f32 0.5, %v1917_v37 }
 0x131   :  { %v985_v41 = vadd.f32 0.112945676, %v984_v9  ;;  %v921_v58 = vand.u32 2147483648, %v2029_v19  ;;  %v974_v61 = vadd.f32 0.05243302, %v973_v32  ;;  %v1285_v27 = vclamps-f32 %v884_v26, 1.0 }
 0x132   :  { %v912_v57 = vsub.f32 1.0, %v911_v46  ;;  %v899_v21 = vmul.f32 %v898_v34, %v1927_v59  ;;  %v936_v33 = vadd.f32 0.18741608, %v935_v45  ;;  %1349 = vrcp.f32 %v2058_v48 }
 0x133   :  { %vm916_vm12 = vweird.f32 %v1348_v42  ;;  %v986_v62 = vmul.f32 %v985_v41, %v2009_v4  ;;  %v1011_v63 = vmul.f32 %v1010_v60, %v2034_v7  ;;  %vm915_vm13 = vweird.f32 %v2029_v19 }
 0x134   :  { %v913_v1 = vmul.f32 %v1348_v42, %v912_v57  ;;  %vm2070_vm14 = vcmp.eq.f32.partialorder %v919_v44, 8.507059e+37  ;;  %v1021_v2 = vadd.f32 0.001143296, %v1020_v51  ;;  %v2074_v49 = vmin.f32 %v1047_v52, 16.0  ;;  %vm917_vm15 = vmor %vm915_vm13, %vm916_vm12 }
 0x135   :  { %v922_v59 = vor.u32 1.1754944e-38, %v921_v58  ;;  %v975_v47 = vmul.f32 %v974_v61, %v2009_v4  ;;  %v987_v11 = vadd.f32 0.4994258, %v986_v62  ;;  %v1097_v18 = vadd.f32 1.0, %v1285_v27 }
 0x136   :  { %v914_v54 = vadd.f32 %v1348_v42, %v913_v1  ;;  %v1022_v36 = vmul.f32 %v1021_v2, %v2034_v7  ;;  %v1049_v13 = vmul.f32 2.1237322e-06, %v2074_v49  ;;  %v1060_v19 = vmul.f32 3.8918573e-05, %v2074_v49 }
 0x137   :  { %v937_v14 = vmul.f32 %v936_v33, %v1986_v40  ;;  %v988_v29 = vmul.f32 %v987_v11, %v2009_v4  ;;  %v1012_v38 = vadd.f32 0.0036580483, %v1011_v63  ;;  %v976_v8 = vadd.f32 0.18741608, %v975_v47 }
 0x138   :  { %v918_v20 = vsel %vm917_vm15, %v1348_v42, %v914_v54  ;;  %v1350_v23 = vpop.eup %1349  ;;  %v1023_v50 = vadd.f32 0.014752088, %v1022_v36  ;;  %v1050_v3 = vadd.f32 0.00028619796, %v1049_v13  ;;  %v1061_v10 = vadd.f32 0.001143296, %v1060_v19 }
 0x139   :  { %v923_v15 = vsel %vm2070_vm14, %v922_v59, %v918_v20  ;;  %v951_v28 = vmul.f32 %v1350_v23, %v2058_v48  ;;  %v2085_v43 = vadd.f32 1.0, %v988_v29  ;;  %v1113_v55 = vmul.f32 %v1097_v18, %v425_v30 }
 0x13a   :  { %v924_v12 = vmul.f32 %v923_v15, %v899_v21  ;;  %v1024_v6 = vmul.f32 %v1023_v50, %v2034_v7  ;;  %v1051_v40 = vmul.f32 %v1050_v3, %v2074_v49  ;;  %v1062_v25 = vmul.f32 %v1061_v10, %v2074_v49 }
 0x13b   :  { %v952_v34 = vsub.f32 1.0, %v951_v28  ;;  %v959_v39 = vand.u32 2147483647, %v2058_v48  ;;  %1351 = vrcp.f32 %v2085_v43  ;;  %vm956_vm0 = vweird.f32 %v1350_v23 }
 0x13c   :  { %v1286_v5 = vclamps-f32 %v924_v12, 1.0  ;;  %v961_v32 = vand.u32 2147483648, %v2058_v48  ;;  %v1013_v42 = vmul.f32 %v1012_v38, %v2034_v7  ;;  %v1025_v26 = vadd.f32 0.112945676, %v1024_v6 }
 0x13d   :  { %v953_v9 = vmul.f32 %v1350_v23, %v952_v34  ;;  %v1052_v30 = vadd.f32 0.0036580483, %v1051_v40  ;;  %v1063_v46 = vadd.f32 0.014752088, %v1062_v25  ;;  %v938_v44 = vadd.f32 1.1283791, %v937_v14 }
 0x13e   :  { %v1098_v45 = vadd.f32 1.0, %v1286_v5  ;;  %vm955_vm1 = vweird.f32 %v2058_v48  ;;  %v1026_v60 = vmul.f32 %v1025_v26, %v2034_v7  ;;  %v977_v52 = vmul.f32 %v976_v8, %v2009_v4 }
 0x13f   :  { %v954_v51 = vadd.f32 %v1350_v23, %v953_v9  ;;  %v1064_v57 = vmul.f32 %v1063_v46, %v2074_v49  ;;  %vm957_vm2 = vmor %vm955_vm1, %vm956_vm0  ;;  %vm960_vm3 = vcmp.eq.f32.partialorder %v959_v39, 8.507059e+37  ;;  %v962_v58 = vor.u32 1.1754944e-38, %v961_v32 }
 0x140   :  { %v1114_v41 = vmul.f32 %v1098_v45, %v426_v56  ;;  %v1014_v61 = vadd.f32 0.05243302, %v1013_v42  ;;  %v1027_v27 = vadd.f32 0.4994258, %v1026_v60  ;;  %v1053_v62 = vmul.f32 %v1052_v30, %v2074_v49 }
 0x141   :  { %v1352_v21 = vpop.eup %1351  ;;  %v958_v1 = vsel %vm957_vm2, %v1350_v23, %v954_v51  ;;  %v1065_v48 = vadd.f32 0.112945676, %v1064_v57  ;;  %v939_v63 = vmul.f32 %v938_v44, %v1962_v35  ;;  %v978_v2 = vadd.f32 1.1283791, %v977_v52 }
 0x142   :  { %v1124_v33 = vpack.c.bf16 %v1114_v41, %v1113_v55  ;;  %v963_v56 = vsel %vm960_vm3, %v962_v58, %v958_v1  ;;  %v991_v37 = vmul.f32 %v1352_v21, %v2085_v43  ;;  %v1028_v4 = vmul.f32 %v1027_v27, %v2034_v7 }
 0x143   :  { %v1066_v54 = vmul.f32 %v1065_v48, %v2074_v49  ;;  %v964_v59 = vmul.f32 %v963_v56, %v939_v63  ;;  %v1015_v11 = vmul.f32 %v1014_v61, %v2034_v7  ;;  %v1001_v36 = vand.u32 2147483648, %v2085_v43 }
 0x144   :  { %1132 = vst [vmem:[%s2131_s3 + $0x28] sm:$0xff] %v1124_v33  ;;  %v992_v47 = vsub.f32 1.0, %v991_v37  ;;  %v1029_v18 = vadd.f32 1.0, %v1028_v4  ;;  %v1054_v35 = vadd.f32 0.05243302, %v1053_v62  ;;  %vm996_vm4 = vweird.f32 %v1352_v21 }
 0x145   :  { %v1067_v13 = vadd.f32 0.4994258, %v1066_v54  ;;  %v999_v20 = vand.u32 2147483647, %v2085_v43  ;;  %v1287_v29 = vclamps-f32 %v964_v59, 1.0  ;;  %vm995_vm5 = vweird.f32 %v2085_v43 }
 0x146   :  { %v993_v19 = vmul.f32 %v1352_v21, %v992_v47  ;;  %1353 = vrcp.f32 %v1029_v18  ;;  %v1016_v23 = vadd.f32 0.18741608, %v1015_v11  ;;  %vm997_vm6 = vmor %vm995_vm5, %vm996_vm4  ;;  %v1002_v15 = vor.u32 1.1754944e-38, %v1001_v36 }
 0x147   :  { %v1068_v14 = vmul.f32 %v1067_v13, %v2074_v49  ;;  %v1055_v50 = vmul.f32 %v1054_v35, %v2074_v49  ;;  %v979_v10 = vmul.f32 %v978_v2, %v1990_v0  ;;  %vm1000_vm7 = vcmp.eq.f32.partialorder %v999_v20, 8.507059e+37 }
 0x148   :  { %v994_v38 = vadd.f32 %v1352_v21, %v993_v19  ;;  %v1099_v55 = vadd.f32 1.0, %v1287_v29  ;;  %v1017_v40 = vmul.f32 %v1016_v23, %v2034_v7  ;;  %v427_v43 = vmul.f32 0.5, %v1955_v31 }
 0x149   :  { %v1069_v3 = vadd.f32 1.0, %v1068_v14  ;;  %v1056_v5 = vadd.f32 0.18741608, %v1055_v50  ;;  %v428_v39 = vmul.f32 0.5, %v1971_v16  ;;  %v1041_v45 = vand.u32 2147483648, %v1029_v18 }
 0x14a   :  { %v998_v12 = vsel %vm997_vm6, %v1352_v21, %v994_v38  ;;  %v1115_v42 = vmul.f32 %v1099_v55, %v427_v43  ;;  %v1018_v0 = vadd.f32 1.1283791, %v1017_v40  ;;  %v1039_v46 = vand.u32 2147483647, %v1029_v18 }
 0x14b   :  { %v1003_v28 = vsel %vm1000_vm7, %v1002_v15, %v998_v12  ;;  %1355 = vrcp.f32 %v1069_v3  ;;  %v1057_v44 = vmul.f32 %v1056_v5, %v2074_v49  ;;  %vm1035_vm9 = vweird.f32 %v1029_v18 }
 0x14c   :  { %v1354_v8 = vpop.eup %1353  ;;  %v1004_v6 = vmul.f32 %v1003_v28, %v979_v10  ;;  %v1019_v31 = vmul.f32 %v1018_v0, %v2014_v53  ;;  %v1042_v16 = vor.u32 1.1754944e-38, %v1041_v45  ;;  %vm1040_vm11 = vcmp.eq.f32.partialorder %v1039_v46, 8.507059e+37 }
 0x14d   :  { %v1031_v25 = vmul.f32 %v1354_v8, %v1029_v18  ;;  %vm1036_vm8 = vweird.f32 %v1354_v8  ;;  %v1058_v58 = vadd.f32 1.1283791, %v1057_v44  ;;  %v1081_v61 = vand.u32 2147483648, %v1069_v3 }
 0x14e   :  { %v1288_v34 = vclamps-f32 %v1004_v6, 1.0  ;;  %vm1037_vm10 = vmor %vm1035_vm9, %vm1036_vm8  ;;  %v1079_v21 = vand.u32 2147483647, %v1069_v3  ;;  %vm1075_vm13 = vweird.f32 %v1069_v3  ;;  %v429_v2 = vmul.f32 0.5, %v1994_v22 }
 0x14f   :  { %v1032_v32 = vsub.f32 1.0, %v1031_v25  ;;  %v1082_v53 = vor.u32 1.1754944e-38, %v1081_v61  ;;  %v1059_v48 = vmul.f32 %v1058_v58, %v2053_v24  ;;  %v430_v47 = vmul.f32 0.5, %v2041_v17 }
 0x150   :  { %v1100_v26 = vadd.f32 1.0, %v1288_v34  ;;  %vm1080_vm15 = vcmp.eq.f32.partialorder %v1079_v21, 8.507059e+37 }
 0x151   :  { %v1356_v9 = vpop.eup %1355  ;;  %v1033_v30 = vmul.f32 %v1354_v8, %v1032_v32 }
 0x152   :  { %v1116_v60 = vmul.f32 %v1100_v26, %v428_v39  ;;  %v1071_v7 = vmul.f32 %v1356_v9, %v1069_v3  ;;  %vm1076_vm12 = vweird.f32 %v1356_v9 }
 0x153   :  { %v1034_v41 = vadd.f32 %v1354_v8, %v1033_v30  ;;  %vm1077_vm14 = vmor %vm1075_vm13, %vm1076_vm12 }
 0x154   :  { %v1125_v51 = vpack.c.bf16 %v1116_v60, %v1115_v42  ;;  %v1072_v52 = vsub.f32 1.0, %v1071_v7 }
 0x155   :  { %v1038_v57 = vsel %vm1037_vm10, %v1354_v8, %v1034_v41 }
 0x156   :  { %1133 = vst [vmem:[%s2131_s3 + $0x30] sm:$0xff] %v1125_v51  ;;  %v1043_v27 = vsel %vm1040_vm11, %v1042_v16, %v1038_v57  ;;  %v1073_v49 = vmul.f32 %v1356_v9, %v1072_v52 }
 0x157   :  { %v1044_v33 = vmul.f32 %v1043_v27, %v1019_v31 }
 0x158   :  { %v1074_v1 = vadd.f32 %v1356_v9, %v1073_v49 }
 0x159   :  { %v1289_v62 = vclamps-f32 %v1044_v33, 1.0 }
 0x15a   :  { %v1078_v63 = vsel %vm1077_vm14, %v1356_v9, %v1074_v1 }
 0x15b   :  { %v1083_v56 = vsel %vm1080_vm15, %v1082_v53, %v1078_v63  ;;  %v1101_v37 = vadd.f32 1.0, %v1289_v62 }
 0x15c   :  { %v1084_v4 = vmul.f32 %v1083_v56, %v1059_v48 }
 0x15d   :  { %v1117_v59 = vmul.f32 %v1101_v37, %v429_v2 }
 0x15e   :  { %v1290_v54 = vclamps-f32 %v1084_v4, 1.0 }
 0x160   :  { %v1102_v11 = vadd.f32 1.0, %v1290_v54 }
 0x162   :  { %v1118_v18 = vmul.f32 %v1102_v11, %v430_v47 }
 0x164   :  { %v1126_v36 = vpack.c.bf16 %v1118_v18, %v1117_v59 }
 0x166   :  { %1134 = vst [vmem:[%s2131_s3 + $0x38] sm:$0xff] %v1126_v36 }

// kernel: closed_call.20
= control target key start
LH: loop header
LB: loop body
LE: loop exit
PB: predicated region body
PF: predicated region fallthrough
CT: control target
= control target key end

     0   :  { %s1014_s1 = inlined_call_operand.vmem [shape: bf16[512,128], index: 1, kind: input, shape index: {}]   ;;  %s1015_s0 = inlined_call_operand.vmem [shape: bf16[32,512], index: 0, kind: input, shape index: {}]   ;;  %s1016_s2 = inlined_call_operand.vmem [shape: f32[1,128], index: 2, kind: input, shape index: {}]   ;;  %s1017_s3 = inlined_call_operand.vmem [shape: bf16[32,128], index: 3, kind: input, shape index: {}]   ;;  %s1018_s4 = inlined_call_operand.vmem [shape: f32[1,128], index: 4, kind: input, shape index: {}]   ;;  %s1019_s5 = inlined_call_operand.vmem [shape: f32[1,128], index: 5, kind: input, shape index: {}]   ;;  %s1020_s6 = inlined_call_operand.vmem [shape: bf16[32,128], index: 6, kind: output, shape index: {}]  }
   0x1   :  { %v744_v0 = vld [vmem:[%s1014_s1 + $0x38] sm:$0xff]  ;;  %v743_v4 = vld [vmem:[%s1014_s1 + $0x30] sm:$0xff]  ;;  %v742_v8 = vld [vmem:[%s1014_s1 + $0x28] sm:$0xff] }
   0x2   :  { %v752_v1 = vld [vmem:[%s1014_s1 + $0x78] sm:$0xff]  ;;  %327 = vmatpush.bf16.msra.mxu0 %v744_v0  ;;  %v751_v5 = vld [vmem:[%s1014_s1 + $0x70] sm:$0xff]  ;;  %v750_v9 = vld [vmem:[%s1014_s1 + $0x68] sm:$0xff] }
   0x3   :  { %v760_v2 = vld [vmem:[%s1014_s1 + $0xb8] sm:$0xff]  ;;  %346 = vmatpush.bf16.msra.mxu1 %v752_v1  ;;  %v759_v6 = vld [vmem:[%s1014_s1 + $0xb0] sm:$0xff]  ;;  %v758_v10 = vld [vmem:[%s1014_s1 + $0xa8] sm:$0xff] }
   0x4   :  { %v768_v3 = vld [vmem:[%s1014_s1 + $0xf8] sm:$0xff]  ;;  %365 = vmatpush.bf16.msra.mxu2 %v760_v2  ;;  %v767_v7 = vld [vmem:[%s1014_s1 + $0xf0] sm:$0xff]  ;;  %v766_v11 = vld [vmem:[%s1014_s1 + $0xe8] sm:$0xff] }
   0x5   :  { %384 = vmatpush.bf16.msra.mxu3 %v768_v3  ;;  %v741_v12 = vld [vmem:[%s1014_s1 + $0x20] sm:$0xff]  ;;  %v740_v16 = vld [vmem:[%s1014_s1 + $0x18] sm:$0xff]  ;;  %v739_v20 = vld [vmem:[%s1014_s1 + $0x10] sm:$0xff] }
   0x6   :  { %328 = vmatpush.bf16.msra.mxu0 %v743_v4  ;;  %v749_v13 = vld [vmem:[%s1014_s1 + $0x60] sm:$0xff]  ;;  %v748_v17 = vld [vmem:[%s1014_s1 + $0x58] sm:$0xff]  ;;  %v747_v21 = vld [vmem:[%s1014_s1 + $0x50] sm:$0xff] }
   0x7   :  { %347 = vmatpush.bf16.msra.mxu1 %v751_v5  ;;  %v757_v14 = vld [vmem:[%s1014_s1 + $0xa0] sm:$0xff]  ;;  %v756_v18 = vld [vmem:[%s1014_s1 + $0x98] sm:$0xff]  ;;  %v755_v22 = vld [vmem:[%s1014_s1 + $0x90] sm:$0xff] }
   0x8   :  { %366 = vmatpush.bf16.msra.mxu2 %v759_v6  ;;  %v765_v15 = vld [vmem:[%s1014_s1 + $0xe0] sm:$0xff]  ;;  %v764_v19 = vld [vmem:[%s1014_s1 + $0xd8] sm:$0xff]  ;;  %v763_v23 = vld [vmem:[%s1014_s1 + $0xd0] sm:$0xff] }
   0x9   :  { %385 = vmatpush.bf16.msra.mxu3 %v767_v7  ;;  %v738_v24 = vld [vmem:[%s1014_s1 + $0x8] sm:$0xff]  ;;  %v737_v28 = vld [vmem:[%s1014_s1] sm:$0xff]  ;;  %v731_v33 = vld [vmem:[%s1015_s0 + $0xc] sm:$0xf0] }
   0xa   :  { %329 = vmatpush.bf16.msra.mxu0 %v742_v8  ;;  %v746_v25 = vld [vmem:[%s1014_s1 + $0x48] sm:$0xff]  ;;  %v745_v29 = vld [vmem:[%s1014_s1 + $0x40] sm:$0xff]  ;;  %v573_v35 = vld [vmem:[%s1015_s0 + $0x10] sm:$0xf0] }
   0xb   :  { %348 = vmatpush.bf16.msra.mxu1 %v750_v9  ;;  %v754_v26 = vld [vmem:[%s1014_s1 + $0x88] sm:$0xff]  ;;  %v753_v30 = vld [vmem:[%s1014_s1 + $0x80] sm:$0xff]  ;;  %v732_v37 = vld [vmem:[%s1015_s0 + $0x14] sm:$0xf0] }
   0xc   :  { %367 = vmatpush.bf16.msra.mxu2 %v758_v10  ;;  %v762_v27 = vld [vmem:[%s1014_s1 + $0xc8] sm:$0xff]  ;;  %v761_v31 = vld [vmem:[%s1014_s1 + $0xc0] sm:$0xff]  ;;  %v581_v39 = vld [vmem:[%s1015_s0 + $0x18] sm:$0xf0] }
   0xd   :  { %386 = vmatpush.bf16.msra.mxu3 %v766_v11  ;;  %v571_v32 = vld [vmem:[%s1015_s0] sm:$0xf]  ;;  %v729_v34 = vld [vmem:[%s1015_s0 + $0x4] sm:$0xf]  ;;  %v579_v36 = vld [vmem:[%s1015_s0 + $0x8] sm:$0xf] }
   0xe   :  { %330 = vmatpush.bf16.msra.mxu0 %v741_v12  ;;  %v730_v38 = vld [vmem:[%s1015_s0 + $0xc] sm:$0xf]  ;;  %v572_v40 = vor.u32 %v731_v33, %v571_v32  ;;  %v576_v41 = vor.u32 %v729_v34, %v573_v35  ;;  %v580_v42 = vor.u32 %v732_v37, %v579_v36  ;;  %v587_v44 = vld [vmem:[%s1015_s0 + $0x20] sm:$0xf]  ;;  %v735_v45 = vld [vmem:[%s1015_s0 + $0x2c] sm:$0xf0] }
   0xf   :  { %349 = vmatpush.bf16.msra.mxu1 %v749_v13  ;;  %v584_v43 = vor.u32 %v730_v38, %v581_v39  ;;  %v733_v46 = vld [vmem:[%s1015_s0 + $0x24] sm:$0xf]  ;;  %v589_v47 = vld [vmem:[%s1015_s0 + $0x30] sm:$0xf0]  ;;  %v595_v48 = vld [vmem:[%s1015_s0 + $0x28] sm:$0xf]  ;;  %v588_v52 = vor.u32 %v735_v45, %v587_v44 }
  0x10   :  { %368 = vmatpush.bf16.msra.mxu2 %v757_v14  ;;  %v736_v49 = vld [vmem:[%s1015_s0 + $0x34] sm:$0xf0]  ;;  %v734_v50 = vld [vmem:[%s1015_s0 + $0x2c] sm:$0xf]  ;;  %v597_v51 = vld [vmem:[%s1015_s0 + $0x38] sm:$0xf0]  ;;  %v592_v53 = vor.u32 %v733_v46, %v589_v47 }
  0x11   :  { %387 = vmatpush.bf16.msra.mxu3 %v765_v15  ;;  %v596_v54 = vor.u32 %v736_v49, %v595_v48  ;;  %v600_v55 = vor.u32 %v734_v50, %v597_v51  ;;  %v770_v61 = vld [vmem:[%s1017_s3] sm:$0xff]   ;;  %v803_v35 = vmov 128.0  }
  0x12   :  { %331 = vmatpush.bf16.msra.mxu0 %v740_v16  ;;  %v790_v63 = vld [vmem:[%s1016_s2] ss:$0 sm:$0xff]  ;;  %v771_v3 = vunpack.c.l.bf16 %v770_v61  ;;  %v772_v13 = vunpack.c.h.bf16 %v770_v61  ;;  %793 = vrcp.f32 %v803_v35 }
  0x13   :  { %350 = vmatpush.bf16.msra.mxu1 %v748_v17 }
  0x14   :  { %369 = vmatpush.bf16.msra.mxu2 %v756_v18 }
  0x15   :  { %388 = vmatpush.bf16.msra.mxu3 %v764_v19  ;;  %v787_v19 = vld [vmem:[%s1017_s3 + $0x8] sm:$0xff]  }
  0x16   :  { %332 = vmatpush.bf16.msra.mxu0 %v739_v20  ;;  %v776_v32 = vunpack.c.h.bf16 %v787_v19 }
  0x17   :  { %351 = vmatpush.bf16.msra.mxu1 %v747_v21 }
  0x18   :  { %370 = vmatpush.bf16.msra.mxu2 %v755_v22  ;;  %v775_v22 = vunpack.c.l.bf16 %v787_v19  ;;  %v794_v36 = vpop.eup %793 }
  0x19   :  { %389 = vmatpush.bf16.msra.mxu3 %v763_v23  ;;  %v463_v37 = vmul.f32 128.0, %v794_v36  ;;  %vm467_vm0 = vweird.f32 %v794_v36 }
  0x1a   :  { %333 = vmatpush.bf16.msra.mxu0 %v738_v24 }
  0x1b   :  { %352 = vmatpush.bf16.msra.mxu1 %v746_v25  ;;  %v464_v38 = vsub.f32 1.0, %v463_v37 }
  0x1c   :  { %371 = vmatpush.bf16.msra.mxu2 %v754_v26 }
  0x1d   :  { %390 = vmatpush.bf16.msra.mxu3 %v762_v27  ;;  %v465_v39 = vmul.f32 %v794_v36, %v464_v38 }
  0x1e   :  { %334 = vmatpush.bf16.msra.mxu0 %v737_v28 }
  0x1f   :  { %353 = vmatpush.bf16.msra.mxu1 %v745_v29 }
  0x20   :  { %372 = vmatpush.bf16.msra.mxu2 %v753_v30 }
  0x21   :  { %391 = vmatpush.bf16.msra.mxu3 %v761_v31  ;;  %335 = vmatmul.bf16.vlgmr.msra.gmra.mxu0 %v572_v40  ;;  %v466_v40 = vadd.f32 %v794_v36, %v465_v39 }
  0x22   :  { %354 = vmatmul.bf16.vlgmr.msra.gmra.mxu1 %v576_v41 }
  0x23   :  { %373 = vmatmul.bf16.vlgmr.msra.gmra.mxu2 %v580_v42  ;;  %v468_v41 = vsel %vm467_vm0, %v794_v36, %v466_v40 }
  0x24   :  { %392 = vmatmul.bf16.vlgmr.msra.gmra.mxu3 %v584_v43 }
  0x31   :  { %340 = vmatmul.bf16.gmra.mxu0 %v588_v52 }
  0x32   :  { %359 = vmatmul.bf16.gmra.mxu1 %v592_v53 }
  0x33   :  { %378 = vmatmul.bf16.gmra.mxu2 %v596_v54 }
  0x34   :  { %397 = vmatmul.bf16.gmra.mxu3 %v600_v55 }
  0x9e   :  { %v336_v56 = vpop.f32.mrf.mxu0 }
  0x9f   :  { %v355_v57 = vpop.f32.mrf.mxu1 }
  0xa0   :  { %v356_v58 = vadd.f32 %v355_v57, %v336_v56 }
  0xa6   :  { %v374_v59 = vpop.f32.mrf.mxu2  ;;  %v338_v0 = vpop.f32.mrf.mxu0 }
  0xa7   :  { %v393_v60 = vpop.f32.mrf.mxu3  ;;  %v375_v62 = vadd.f32 %v374_v59, %v356_v58  ;;  %v357_v1 = vpop.f32.mrf.mxu1 }
  0xa8   :  { %v358_v5 = vadd.f32 %v357_v1, %v338_v0 }
  0xa9   :  { %v394_v2 = vadd.f32 %v393_v60, %v375_v62 }
  0xab   :  { %v438_v4 = vadd.f32 %v790_v63, %v394_v2 }
  0xad   :  { %v450_v6 = vadd.f32 %v771_v3, %v438_v4 }
  0xae   :  { %v376_v7 = vpop.f32.mrf.mxu2  ;;  %v341_v10 = vpop.f32.mrf.mxu0 }
  0xaf   :  { %v395_v8 = vpop.f32.mrf.mxu3  ;;  %v377_v9 = vadd.f32 %v376_v7, %v358_v5  ;;  %454 = vadd.xlane.f32.xlu0 %v450_v6  ;;  %v360_v11 = vpop.f32.mrf.mxu1 }
  0xb0   :  { %v361_v15 = vadd.f32 %v360_v11, %v341_v10 }
  0xb1   :  { %v396_v12 = vadd.f32 %v395_v8, %v377_v9 }
  0xb3   :  { %v439_v14 = vadd.f32 %v790_v63, %v396_v12 }
  0xb5   :  { %v451_v16 = vadd.f32 %v772_v13, %v439_v14 }
  0xb6   :  { %v379_v17 = vpop.f32.mrf.mxu2  ;;  %v343_v23 = vpop.f32.mrf.mxu0 }
  0xb7   :  { %v398_v18 = vpop.f32.mrf.mxu3  ;;  %v380_v20 = vadd.f32 %v379_v17, %v361_v15  ;;  %456 = vadd.xlane.f32.xlu0 %v451_v16  ;;  %v362_v24 = vpop.f32.mrf.mxu1 }
  0xb8   :  { %v363_v26 = vadd.f32 %v362_v24, %v343_v23 }
  0xb9   :  { %v399_v21 = vadd.f32 %v398_v18, %v380_v20  ;;  %v791_v18 = vld [vmem:[%s1018_s4] ss:$0 sm:$0xff] }
  0xbb   :  { %v440_v25 = vadd.f32 %v790_v63, %v399_v21 }
  0xbd   :  { %v452_v27 = vadd.f32 %v775_v22, %v440_v25  ;;  %v792_v25 = vld [vmem:[%s1019_s5] ss:$0 sm:$0xff] }
  0xbe   :  { %v381_v28 = vpop.f32.mrf.mxu2 }
  0xbf   :  { %v382_v29 = vadd.f32 %v381_v28, %v363_v26  ;;  %458 = vadd.xlane.f32.xlu1 %v452_v27  ;;  %v400_v30 = vpop.f32.mrf.mxu3 }
  0xc1   :  { %v401_v31 = vadd.f32 %v400_v30, %v382_v29 }
  0xc3   :  { %v441_v33 = vadd.f32 %v790_v63, %v401_v31 }
  0xc5   :  { %v453_v34 = vadd.f32 %v776_v32, %v441_v33 }
  0xc7   :  { %460 = vadd.xlane.f32.xlu1 %v453_v34 }
 0x122   :  { %v455_v42 = vpop.xlane.xlu0 %454 }
 0x123   :  { %v469_v43 = vmul.f32 %v468_v41, %v455_v42 }
 0x125   :  { %v473_v44 = vsub.f32 %v450_v6, %v469_v43 }
 0x127   :  { %v477_v45 = vmul.f32 %v473_v44, %v473_v44 }
 0x129   :  { %481 = vadd.xlane.f32.xlu2 %v477_v45 }
 0x12a   :  { %v457_v46 = vpop.xlane.xlu0 %456 }
 0x12b   :  { %v470_v47 = vmul.f32 %v468_v41, %v457_v46 }
 0x12d   :  { %v474_v48 = vsub.f32 %v451_v16, %v470_v47 }
 0x12f   :  { %v478_v49 = vmul.f32 %v474_v48, %v474_v48 }
 0x131   :  { %483 = vadd.xlane.f32.xlu2 %v478_v49 }
 0x132   :  { %v459_v50 = vpop.xlane.xlu1 %458 }
 0x133   :  { %v471_v51 = vmul.f32 %v468_v41, %v459_v50 }
 0x135   :  { %v992_v52 = vsub.f32 %v452_v27, %v471_v51 }
 0x137   :  { %v479_v53 = vmul.f32 %v992_v52, %v992_v52 }
 0x139   :  { %485 = vadd.xlane.f32.xlu0 %v479_v53 }
 0x13a   :  { %v461_v54 = vpop.xlane.xlu1 %460 }
 0x13b   :  { %v472_v55 = vmul.f32 %v468_v41, %v461_v54 }
 0x13d   :  { %v996_v56 = vsub.f32 %v453_v34, %v472_v55 }
 0x13f   :  { %v480_v57 = vmul.f32 %v996_v56, %v996_v56 }
 0x141   :  { %487 = vadd.xlane.f32.xlu1 %v480_v57 }
 0x19c   :  { %v482_v58 = vpop.xlane.xlu2 %481 }
 0x19d   :  { %v489_v59 = vmul.f32 %v482_v58, %v468_v41 }
 0x19f   :  { %v493_v60 = vadd.f32 1e-05, %v489_v59 }
 0x1a1   :  { %795 = vrsqrt.f32 %v493_v60  ;;  %vm503_vm2 = vweird.f32 %v493_v60 }
 0x1a4   :  { %v484_v61 = vpop.xlane.xlu2 %483 }
 0x1a5   :  { %v490_v62 = vmul.f32 %v484_v61, %v468_v41 }
 0x1a7   :  { %v796_v63 = vpop.eup %795  ;;  %v494_v0 = vadd.f32 1e-05, %v490_v62 }
 0x1a8   :  { %v498_v1 = vmul.f32 %v796_v63, %v493_v60  ;;  %vm504_vm1 = vweird.f32 %v796_v63 }
 0x1a9   :  { %797 = vrsqrt.f32 %v494_v0  ;;  %vm505_vm3 = vmor %vm503_vm2, %vm504_vm1  ;;  %vm513_vm5 = vweird.f32 %v494_v0 }
 0x1aa   :  { %v499_v2 = vmul.f32 %v796_v63, %v498_v1 }
 0x1ac   :  { %v500_v3 = vmul.f32 0.5, %v499_v2  ;;  %v486_v4 = vpop.xlane.xlu0 %485 }
 0x1ad   :  { %v491_v5 = vmul.f32 %v486_v4, %v468_v41 }
 0x1ae   :  { %v501_v6 = vsub.f32 1.5, %v500_v3 }
 0x1af   :  { %v798_v7 = vpop.eup %797  ;;  %v495_v8 = vadd.f32 1e-05, %v491_v5 }
 0x1b0   :  { %v502_v9 = vmul.f32 %v796_v63, %v501_v6  ;;  %v508_v10 = vmul.f32 %v798_v7, %v494_v0  ;;  %vm514_vm4 = vweird.f32 %v798_v7 }
 0x1b1   :  { %799 = vrsqrt.f32 %v495_v8  ;;  %vm515_vm6 = vmor %vm513_vm5, %vm514_vm4  ;;  %vm523_vm8 = vweird.f32 %v495_v8 }
 0x1b2   :  { %v509_v11 = vmul.f32 %v798_v7, %v508_v10  ;;  %v506_v12 = vsel %vm505_vm3, %v796_v63, %v502_v9 }
 0x1b3   :  { %v537_v19 = vmul.f32 %v506_v12, %v473_v44 }
 0x1b4   :  { %v510_v13 = vmul.f32 0.5, %v509_v11  ;;  %v488_v14 = vpop.xlane.xlu1 %487 }
 0x1b5   :  { %v492_v15 = vmul.f32 %v488_v14, %v468_v41  ;;  %v545_v26 = vmul.f32 %v791_v18, %v537_v19 }
 0x1b6   :  { %v511_v16 = vsub.f32 1.5, %v510_v13 }
 0x1b7   :  { %v800_v17 = vpop.eup %799  ;;  %v496_v20 = vadd.f32 1e-05, %v492_v15  ;;  %v553_v32 = vadd.f32 %v792_v25, %v545_v26 }
 0x1b8   :  { %v512_v21 = vmul.f32 %v798_v7, %v511_v16  ;;  %v518_v22 = vmul.f32 %v800_v17, %v495_v8  ;;  %vm524_vm7 = vweird.f32 %v800_v17 }
 0x1b9   :  { %801 = vrsqrt.f32 %v496_v20  ;;  %vm525_vm9 = vmor %vm523_vm8, %vm524_vm7  ;;  %vm533_vm11 = vweird.f32 %v496_v20 }
 0x1ba   :  { %v516_v23 = vsel %vm515_vm6, %v798_v7, %v512_v21  ;;  %v519_v24 = vmul.f32 %v800_v17, %v518_v22 }
 0x1bb   :  { %v538_v27 = vmul.f32 %v516_v23, %v474_v48 }
 0x1bc   :  { %v520_v28 = vmul.f32 0.5, %v519_v24 }
 0x1bd   :  { %v546_v29 = vmul.f32 %v791_v18, %v538_v27 }
 0x1be   :  { %v521_v30 = vsub.f32 1.5, %v520_v28 }
 0x1bf   :  { %v802_v31 = vpop.eup %801  ;;  %v554_v33 = vadd.f32 %v792_v25, %v546_v29 }
 0x1c0   :  { %v522_v34 = vmul.f32 %v800_v17, %v521_v30  ;;  %v528_v35 = vmul.f32 %v802_v31, %v496_v20  ;;  %vm534_vm10 = vweird.f32 %v802_v31 }
 0x1c1   :  { %v780_v36 = vpack.c.bf16 %v554_v33, %v553_v32  ;;  %vm535_vm12 = vmor %vm533_vm11, %vm534_vm10 }
 0x1c2   :  { %v529_v37 = vmul.f32 %v802_v31, %v528_v35  ;;  %v526_v38 = vsel %vm525_vm9, %v800_v17, %v522_v34 }
 0x1c3   :  { %781 = vst [vmem:[%s1020_s6] sm:$0xff] %v780_v36   ;;  %v539_v41 = vmul.f32 %v526_v38, %v992_v52 }
 0x1c4   :  { %v530_v39 = vmul.f32 0.5, %v529_v37 }
 0x1c5   :  { %v547_v44 = vmul.f32 %v791_v18, %v539_v41 }
 0x1c6   :  { %v531_v40 = vsub.f32 1.5, %v530_v39 }
 0x1c7   :  { %v555_v47 = vadd.f32 %v792_v25, %v547_v44 }
 0x1c8   :  { %v532_v42 = vmul.f32 %v802_v31, %v531_v40 }
 0x1ca   :  { %v536_v43 = vsel %vm535_vm12, %v802_v31, %v532_v42 }
 0x1cb   :  { %v540_v45 = vmul.f32 %v536_v43, %v996_v56 }
 0x1cd   :  { %v548_v46 = vmul.f32 %v791_v18, %v540_v45 }
 0x1cf   :  { %v556_v48 = vadd.f32 %v792_v25, %v548_v46 }
 0x1d1   :  { %v785_v49 = vpack.c.bf16 %v556_v48, %v555_v47 }
 0x1d3   :  { %788 = vst [vmem:[%s1020_s6 + $0x8] sm:$0xff] %v785_v49  }

</bundles_post_ra>
